<compile_context>
chip_gen: v7x
topology: tpu7x:2x2x1
jax: 0.10.0
libtpu: 0.0.40
codegen_flags: <defaults>
</compile_context>

<pallas_src>
import math

import jax
import jax.numpy as jnp
from jax import lax
from jax.experimental import pallas as pl
from jax.experimental.pallas import tpu as pltpu

# ----------------------- scaled-down config -----------------------
B, T = 2, 8              # batch (bags), max_tiles (sequence length for MIL attention)
BT = B * T               # 16 rows -> fills a bf16 (16,128) packed sublane tile
C, H, W = 3, 16, 16      # per-tile channels / spatial (NCHW)
FLAT = C * H * W         # 768 flattened tile (stands in for 224*224*3)
D = 384                  # feature_dim (vit_small)
NH = 4                   # num_heads
HD = D // NH             # 96 head dim
HP = 128                 # per-head lane-padded slot width (96 -> 128)
DP = NH * HP             # 512 padded "concat heads" width
CLS_HID = 256
NUM_CLASSES = 2
NC_PAD = 128             # lane-dense padded logits width
AW_PAD = 128             # lane-dense padded attention-weights width (T -> 128)
LN_EPS = 1e-5


# ----------------------- fused forward kernel ---------------------------
def snuffy_kernel(x_ref, bbw_ref, bbb_ref, lng_ref, lnb_ref,
                  wqkv_ref, bqkv_ref, wo_ref, bo_ref,
                  w1_ref, b1_ref, w2_ref, b2_ref,
                  aw_ref, logit_ref):
    # ---- backbone: Linear -> LayerNorm -> GELU(exact erf) on all B*T rows at once
    h = jnp.dot(x_ref[...], bbw_ref[...],
                preferred_element_type=jnp.float32) + bbb_ref[...]       # (BT, D) f32
    mu = jnp.mean(h, axis=-1, keepdims=True)
    var = jnp.mean(jnp.square(h - mu), axis=-1, keepdims=True)
    h = (h - mu) * lax.rsqrt(var + LN_EPS)
    h = h * lng_ref[...] + lnb_ref[...]
    feats = 0.5 * h * (1.0 + lax.erf(h * (1.0 / math.sqrt(2.0))))        # (BT, D) f32

    # ---- fused QKV projection on all rows; each head is a zero-padded 128-lane slot
    qkv = jnp.dot(feats.astype(jnp.bfloat16), wqkv_ref[...],
                  preferred_element_type=jnp.float32) + bqkv_ref[...]    # (BT, 3*DP)
    qkv_bf = qkv.astype(jnp.bfloat16)

    def stack_heads(col0):
        # gather (B*NH) lane-aligned (T, HP) tiles into one batched operand
        parts = []
        for b in range(B):
            for hh in range(NH):
                blk = qkv_bf[b * T:(b + 1) * T, col0 + hh * HP: col0 + (hh + 1) * HP]
                parts.append(blk[None])                                  # (1, T, HP)
        return jnp.concatenate(parts, axis=0)                            # (B*NH, T, HP)

    q = stack_heads(0)
    k = stack_heads(DP)
    v = stack_heads(2 * DP)

    # ---- head-batched scaled dot-product attention (exact softmax)
    scale = 1.0 / math.sqrt(HD)
    s = jnp.einsum('bqd,bkd->bqk', q, k,
                   preferred_element_type=jnp.float32) * scale           # (B*NH, T, T)
    s = s - jnp.max(s, axis=-1, keepdims=True)
    e = jnp.exp(s)
    p = e / jnp.sum(e, axis=-1, keepdims=True)                           # exact softmax
    o = jnp.einsum('bqk,bkd->bqd', p.astype(jnp.bfloat16), v,
                   preferred_element_type=jnp.float32)                   # (B*NH, T, HP)

    # ---- attention weights averaged over heads, stored lane-dense (BT, AW_PAD)
    aw_rows = []
    for b in range(B):
        s_b = p[b * NH]
        for hh in range(1, NH):
            s_b = s_b + p[b * NH + hh]
        aw_rows.append(s_b * (1.0 / NH))                                 # (T, T)
    aw_bt = jnp.concatenate(aw_rows, axis=0)                             # (BT, T)
    aw_ref[...] = jnp.zeros_like(aw_ref)                                 # full-lane block
    aw_ref[:, :T] = aw_bt

    # ---- concat heads (whole 128-lane tiles -> no relayout) + out-proj on all rows
    rows = []
    for b in range(B):
        rows.append(jnp.concatenate([o[b * NH + hh] for hh in range(NH)], axis=-1))
    concat = jnp.concatenate(rows, axis=0)                               # (BT, DP) f32
    attn_out = (jnp.dot(concat.astype(jnp.bfloat16), wo_ref[...],
                        preferred_element_type=jnp.float32) + bo_ref[...])  # (BT, D)

    # ---- pooled = attn_output.mean(dim=1), then classifier -----------------
    pooled = jnp.mean(attn_out.reshape(B, T, D), axis=1)                 # (B, D)
    c = jnp.dot(pooled.astype(jnp.bfloat16), w1_ref[...],
                preferred_element_type=jnp.float32) + b1_ref[...]
    c = jnp.maximum(c, 0.0)                                              # ReLU
    # Dropout(p=0.1) is identity in eval/inference mode.
    logit_ref[...] = jnp.dot(c.astype(jnp.bfloat16), w2_ref[...],
                             preferred_element_type=jnp.float32) + b2_ref[...]  # (B, NC_PAD)


def snuffy_forward(x, pp):
    # x: [B, T, C, H, W] -> flatten each tile (== tile.view(batch_size, -1)); bf16 pre-cast
    x_flat = x.reshape(BT, FLAT).astype(jnp.bfloat16)
    z2 = lambda: (0, 0)

    flops = (2 * BT * (FLAT * D + D * 3 * DP + DP * D)
             + 2 * (B * NH) * (T * T * HP) * 2
             + 2 * B * (D * CLS_HID + CLS_HID * NC_PAD))
    transcendentals = BT * D + (B * NH) * T * T + BT
    bytes_accessed = (2 * BT * FLAT
                      + 2 * (FLAT * D + D * 3 * DP + DP * D + D * CLS_HID + CLS_HID * NC_PAD)
                      + 4 * (3 * D + 3 * DP + D + CLS_HID + NC_PAD)
                      + 4 * (BT * AW_PAD + B * NC_PAD))

    aw_pad, logits_pad = pl.pallas_call(
        snuffy_kernel,
        out_shape=(jax.ShapeDtypeStruct((BT, AW_PAD), jnp.float32),
                   jax.ShapeDtypeStruct((B, NC_PAD), jnp.float32)),
        in_specs=[
            pl.BlockSpec((BT, FLAT), z2),          # all B*T tiles (bf16)
            pl.BlockSpec((FLAT, D), z2),           # backbone weight (bf16)
            pl.BlockSpec((1, D), z2),              # backbone bias
            pl.BlockSpec((1, D), z2),              # LN gamma
            pl.BlockSpec((1, D), z2),              # LN beta
            pl.BlockSpec((D, 3 * DP), z2),         # fused, head-padded W_qkv (bf16)
            pl.BlockSpec((1, 3 * DP), z2),         # fused, head-padded b_qkv
            pl.BlockSpec((DP, D), z2),             # head-padded W_o (bf16)
            pl.BlockSpec((1, D), z2),              # b_o
            pl.BlockSpec((D, CLS_HID), z2),        # classifier W1 (bf16)
            pl.BlockSpec((1, CLS_HID), z2),        # classifier b1
            pl.BlockSpec((CLS_HID, NC_PAD), z2),   # lane-padded W2 (bf16)
            pl.BlockSpec((1, NC_PAD), z2),         # lane-padded b2
        ],
        out_specs=(pl.BlockSpec((BT, AW_PAD), z2),
                   pl.BlockSpec((B, NC_PAD), z2)),
        cost_estimate=pl.CostEstimate(flops=flops,
                                      transcendentals=transcendentals,
                                      bytes_accessed=bytes_accessed),
    )(x_flat, pp["bb_w"], pp["bb_b"], pp["ln_g"], pp["ln_b"],
      pp["w_qkv"], pp["b_qkv"], pp["wo_pad"], pp["bo"],
      pp["w1"], pp["b1"], pp["w2_pad"], pp["b2_pad"])

    aw = aw_pad.reshape(B, T, AW_PAD)[:, :, :T]
    logits = logits_pad[:, :NUM_CLASSES]
    return logits, aw


# ----------------------- deterministic param init ----------------------
def init_params(key):
    ks = jax.random.split(key, 16)
    s = 0.02
    f32 = jnp.float32
    return {
        "bb_w": jax.random.normal(ks[0], (FLAT, D), f32) * s,
        "bb_b": jax.random.normal(ks[1], (1, D), f32) * s,
        "ln_g": jnp.ones((1, D), f32),
        "ln_b": jnp.zeros((1, D), f32),
        "wq": jax.random.normal(ks[2], (D, D), f32) * s,
        "wk": jax.random.normal(ks[3], (D, D), f32) * s,
        "wv": jax.random.normal(ks[4], (D, D), f32) * s,
        "bq": jax.random.normal(ks[5], (1, D), f32) * s,
        "bk": jax.random.normal(ks[6], (1, D), f32) * s,
        "bv": jax.random.normal(ks[7], (1, D), f32) * s,
        "wo": jax.random.normal(ks[8], (D, D), f32) * s,
        "bo": jax.random.normal(ks[9], (1, D), f32) * s,
        "w1": jax.random.normal(ks[10], (D, CLS_HID), f32) * s,
        "b1": jax.random.normal(ks[11], (1, CLS_HID), f32) * s,
        "w2": jax.random.normal(ks[12], (CLS_HID, NUM_CLASSES), f32) * s,
        "b2": jax.random.normal(ks[13], (1, NUM_CLASSES), f32) * s,
    }


def _pad_head_cols(w):
    # (D_in, NH*HD) -> (D_in, NH*HP): each head's 96 columns land at the start
    # of a 128-lane slot, pad lanes are zero.
    d_in = w.shape[0]
    w = w.reshape(d_in, NH, HD)
    w = jnp.pad(w, ((0, 0), (0, 0), (0, HP - HD)))
    return w.reshape(d_in, NH * HP)


def _pad_head_bias(b):
    b = b.reshape(1, NH, HD)
    b = jnp.pad(b, ((0, 0), (0, 0), (0, HP - HD)))
    return b.reshape(1, NH * HP)


def pack_params(p):
    """Repack params once (done outside jit): bf16 weights, fused/padded layouts.
    NOTE(v5e): the 96->128 head padding adds ~15% weight bytes; kept because it makes
    every per-head slice / concat a whole 128-lane tile (no Mosaic relayout copies)."""
    bf16 = jnp.bfloat16
    w_qkv = jnp.concatenate(
        [_pad_head_cols(p["wq"]), _pad_head_cols(p["wk"]), _pad_head_cols(p["wv"])],
        axis=1).astype(bf16)                                           # (D, 3*DP)
    b_qkv = jnp.concatenate(
        [_pad_head_bias(p["bq"]), _pad_head_bias(p["bk"]), _pad_head_bias(p["bv"])],
        axis=1)                                                        # (1, 3*DP) f32
    wo_pad = jnp.pad(p["wo"].reshape(NH, HD, D),
                     ((0, 0), (0, HP - HD), (0, 0))).reshape(DP, D).astype(bf16)
    w2_pad = jnp.pad(p["w2"], ((0, 0), (0, NC_PAD - NUM_CLASSES))).astype(bf16)
    b2_pad = jnp.pad(p["b2"], ((0, 0), (0, NC_PAD - NUM_CLASSES)))
    return {
        "bb_w": p["bb_w"].astype(bf16), "bb_b": p["bb_b"],
        "ln_g": p["ln_g"], "ln_b": p["ln_b"],
        "w_qkv": w_qkv, "b_qkv": b_qkv,
        "wo_pad": wo_pad, "bo": p["bo"],
        "w1": p["w1"].astype(bf16), "b1": p["b1"],
        "w2_pad": w2_pad, "b2_pad": b2_pad,
    }


if __name__ == "__main__":
    key = jax.random.PRNGKey(0)
    pkey, xkey = jax.random.split(key)
    packed = pack_params(init_params(pkey))
    x = jax.random.normal(xkey, (B, T, C, H, W), jnp.float32)

    logits, attn_w = jax.jit(snuffy_forward)(x, packed)
    jax.block_until_ready((logits, attn_w))

    assert logits.shape == (B, NUM_CLASSES), logits.shape
    assert attn_w.shape == (B, T, T), attn_w.shape
    assert bool(jnp.all(jnp.isfinite(logits)))
    assert bool(jnp.all(jnp.isfinite(attn_w)))
    # rows of the head-averaged attention weights are exactly softmax-normalized
    assert bool(jnp.allclose(jnp.sum(attn_w, axis=-1), 1.0, atol=1e-4))
    print("KERNEL_OK")
</pallas_src>

<mosaic_0001>
module attributes {stable_mosaic.version = 11 : i64} {
  func.func @snuffy_kernel(%arg0: memref<16x768xbf16, #tpu.memory_space<vmem>>, %arg1: memref<768x384xbf16, #tpu.memory_space<vmem>>, %arg2: memref<1x384xf32, #tpu.memory_space<vmem>>, %arg3: memref<1x384xf32, #tpu.memory_space<vmem>>, %arg4: memref<1x384xf32, #tpu.memory_space<vmem>>, %arg5: memref<384x1536xbf16, #tpu.memory_space<vmem>>, %arg6: memref<1x1536xf32, #tpu.memory_space<vmem>>, %arg7: memref<512x384xbf16, #tpu.memory_space<vmem>>, %arg8: memref<1x384xf32, #tpu.memory_space<vmem>>, %arg9: memref<384x256xbf16, #tpu.memory_space<vmem>>, %arg10: memref<1x256xf32, #tpu.memory_space<vmem>>, %arg11: memref<256x128xbf16, #tpu.memory_space<vmem>>, %arg12: memref<1x128xf32, #tpu.memory_space<vmem>>, %arg13: memref<16x128xf32, #tpu.memory_space<vmem>>, %arg14: memref<2x128xf32, #tpu.memory_space<vmem>>) attributes {dimension_semantics = [], scalar_prefetch = 0 : i64, scratch_operands = 0 : i64, tpu.core_type = #tpu.core_type<tc>} {
    %c0 = arith.constant 0 : index
    %c0_0 = arith.constant 0 : index
    %0 = vector.load %arg0[%c0, %c0_0] : memref<16x768xbf16, #tpu.memory_space<vmem>>, vector<16x768xbf16>
    %c0_1 = arith.constant 0 : index
    %c0_2 = arith.constant 0 : index
    %1 = vector.load %arg1[%c0_1, %c0_2] : memref<768x384xbf16, #tpu.memory_space<vmem>>, vector<768x384xbf16>
    %cst = arith.constant dense<0.000000e+00> : vector<16x384xf32>
    %2 = tpu.matmul %0, %1, %cst {dimension_numbers = #tpu.dot_dimension_numbers<[1], [0], [0], [1], [0, 0, 1, 1], [], []>} : vector<16x768xbf16>, vector<768x384xbf16>, vector<16x384xf32> -> vector<16x384xf32>
    %c0_3 = arith.constant 0 : index
    %c0_4 = arith.constant 0 : index
    %3 = vector.load %arg2[%c0_3, %c0_4] : memref<1x384xf32, #tpu.memory_space<vmem>>, vector<1x384xf32>
    %4 = vector.broadcast %3 : vector<1x384xf32> to vector<16x384xf32>
    %5 = arith.addf %2, %4 : vector<16x384xf32>
    %cst_5 = arith.constant dense<0.000000e+00> : vector<16xf32>
    %6 = vector.multi_reduction <add>, %5, %cst_5 [1] : vector<16x384xf32> to vector<16xf32>
    %7 = vector.shape_cast %6 : vector<16xf32> to vector<16x1xf32>
    %cst_6 = arith.constant 3.840000e+02 : f32
    %8 = vector.broadcast %cst_6 : f32 to vector<16x1xf32>
    %9 = arith.divf %7, %8 : vector<16x1xf32>
    %10 = vector.broadcast %9 : vector<16x1xf32> to vector<16x384xf32>
    %11 = arith.subf %5, %10 : vector<16x384xf32>
    %12 = arith.mulf %11, %11 : vector<16x384xf32>
    %cst_7 = arith.constant dense<0.000000e+00> : vector<16xf32>
    %13 = vector.multi_reduction <add>, %12, %cst_7 [1] : vector<16x384xf32> to vector<16xf32>
    %14 = vector.shape_cast %13 : vector<16xf32> to vector<16x1xf32>
    %cst_8 = arith.constant 3.840000e+02 : f32
    %15 = vector.broadcast %cst_8 : f32 to vector<16x1xf32>
    %16 = arith.divf %14, %15 : vector<16x1xf32>
    %17 = vector.broadcast %9 : vector<16x1xf32> to vector<16x384xf32>
    %18 = arith.subf %5, %17 : vector<16x384xf32>
    %cst_9 = arith.constant 9.99999974E-6 : f32
    %19 = vector.broadcast %cst_9 : f32 to vector<16x1xf32>
    %20 = arith.addf %16, %19 : vector<16x1xf32>
    %21 = math.rsqrt %20 : vector<16x1xf32>
    %22 = vector.broadcast %21 : vector<16x1xf32> to vector<16x384xf32>
    %23 = arith.mulf %18, %22 : vector<16x384xf32>
    %c0_10 = arith.constant 0 : index
    %c0_11 = arith.constant 0 : index
    %24 = vector.load %arg3[%c0_10, %c0_11] : memref<1x384xf32, #tpu.memory_space<vmem>>, vector<1x384xf32>
    %25 = vector.broadcast %24 : vector<1x384xf32> to vector<16x384xf32>
    %26 = arith.mulf %23, %25 : vector<16x384xf32>
    %c0_12 = arith.constant 0 : index
    %c0_13 = arith.constant 0 : index
    %27 = vector.load %arg4[%c0_12, %c0_13] : memref<1x384xf32, #tpu.memory_space<vmem>>, vector<1x384xf32>
    %28 = vector.broadcast %27 : vector<1x384xf32> to vector<16x384xf32>
    %29 = arith.addf %26, %28 : vector<16x384xf32>
    %cst_14 = arith.constant 5.000000e-01 : f32
    %30 = vector.broadcast %cst_14 : f32 to vector<16x384xf32>
    %31 = arith.mulf %30, %29 : vector<16x384xf32>
    %cst_15 = arith.constant 0.707106769 : f32
    %32 = vector.broadcast %cst_15 : f32 to vector<16x384xf32>
    %33 = arith.mulf %29, %32 : vector<16x384xf32>
    %34 = math.erf %33 : vector<16x384xf32>
    %cst_16 = arith.constant 1.000000e+00 : f32
    %35 = vector.broadcast %cst_16 : f32 to vector<16x384xf32>
    %36 = arith.addf %35, %34 : vector<16x384xf32>
    %37 = arith.mulf %31, %36 : vector<16x384xf32>
    %38 = arith.truncf %37 : vector<16x384xf32> to vector<16x384xbf16>
    %c0_17 = arith.constant 0 : index
    %c0_18 = arith.constant 0 : index
    %39 = vector.load %arg5[%c0_17, %c0_18] : memref<384x1536xbf16, #tpu.memory_space<vmem>>, vector<384x1536xbf16>
    %cst_19 = arith.constant dense<0.000000e+00> : vector<16x1536xf32>
    %40 = tpu.matmul %38, %39, %cst_19 {dimension_numbers = #tpu.dot_dimension_numbers<[1], [0], [0], [1], [0, 0, 1, 1], [], []>} : vector<16x384xbf16>, vector<384x1536xbf16>, vector<16x1536xf32> -> vector<16x1536xf32>
    %c0_20 = arith.constant 0 : index
    %c0_21 = arith.constant 0 : index
    %41 = vector.load %arg6[%c0_20, %c0_21] : memref<1x1536xf32, #tpu.memory_space<vmem>>, vector<1x1536xf32>
    %42 = vector.broadcast %41 : vector<1x1536xf32> to vector<16x1536xf32>
    %43 = arith.addf %40, %42 : vector<16x1536xf32>
    %44 = arith.truncf %43 : vector<16x1536xf32> to vector<16x1536xbf16>
    %45 = vector.extract_strided_slice %44 {offsets = [0, 0], sizes = [8, 128], strides = [1, 1]} : vector<16x1536xbf16> to vector<8x128xbf16>
    %46 = vector.shape_cast %45 : vector<8x128xbf16> to vector<1x8x128xbf16>
    %47 = vector.extract_strided_slice %44 {offsets = [0, 128], sizes = [8, 128], strides = [1, 1]} : vector<16x1536xbf16> to vector<8x128xbf16>
    %48 = vector.shape_cast %47 : vector<8x128xbf16> to vector<1x8x128xbf16>
    %49 = vector.extract_strided_slice %44 {offsets = [0, 256], sizes = [8, 128], strides = [1, 1]} : vector<16x1536xbf16> to vector<8x128xbf16>
    %50 = vector.shape_cast %49 : vector<8x128xbf16> to vector<1x8x128xbf16>
    %51 = vector.extract_strided_slice %44 {offsets = [0, 384], sizes = [8, 128], strides = [1, 1]} : vector<16x1536xbf16> to vector<8x128xbf16>
    %52 = vector.shape_cast %51 : vector<8x128xbf16> to vector<1x8x128xbf16>
    %53 = vector.extract_strided_slice %44 {offsets = [8, 0], sizes = [8, 128], strides = [1, 1]} : vector<16x1536xbf16> to vector<8x128xbf16>
    %54 = vector.shape_cast %53 : vector<8x128xbf16> to vector<1x8x128xbf16>
    %55 = vector.extract_strided_slice %44 {offsets = [8, 128], sizes = [8, 128], strides = [1, 1]} : vector<16x1536xbf16> to vector<8x128xbf16>
    %56 = vector.shape_cast %55 : vector<8x128xbf16> to vector<1x8x128xbf16>
    %57 = vector.extract_strided_slice %44 {offsets = [8, 256], sizes = [8, 128], strides = [1, 1]} : vector<16x1536xbf16> to vector<8x128xbf16>
    %58 = vector.shape_cast %57 : vector<8x128xbf16> to vector<1x8x128xbf16>
    %59 = vector.extract_strided_slice %44 {offsets = [8, 384], sizes = [8, 128], strides = [1, 1]} : vector<16x1536xbf16> to vector<8x128xbf16>
    %60 = vector.shape_cast %59 : vector<8x128xbf16> to vector<1x8x128xbf16>
    %61 = tpu.concatenate %46, %48, %50, %52, %54, %56, %58, %60 in 0 : vector<1x8x128xbf16>, vector<1x8x128xbf16>, vector<1x8x128xbf16>, vector<1x8x128xbf16>, vector<1x8x128xbf16>, vector<1x8x128xbf16>, vector<1x8x128xbf16>, vector<1x8x128xbf16> -> vector<8x8x128xbf16>
    %62 = vector.extract_strided_slice %44 {offsets = [0, 512], sizes = [8, 128], strides = [1, 1]} : vector<16x1536xbf16> to vector<8x128xbf16>
    %63 = vector.shape_cast %62 : vector<8x128xbf16> to vector<1x8x128xbf16>
    %64 = vector.extract_strided_slice %44 {offsets = [0, 640], sizes = [8, 128], strides = [1, 1]} : vector<16x1536xbf16> to vector<8x128xbf16>
    %65 = vector.shape_cast %64 : vector<8x128xbf16> to vector<1x8x128xbf16>
    %66 = vector.extract_strided_slice %44 {offsets = [0, 768], sizes = [8, 128], strides = [1, 1]} : vector<16x1536xbf16> to vector<8x128xbf16>
    %67 = vector.shape_cast %66 : vector<8x128xbf16> to vector<1x8x128xbf16>
    %68 = vector.extract_strided_slice %44 {offsets = [0, 896], sizes = [8, 128], strides = [1, 1]} : vector<16x1536xbf16> to vector<8x128xbf16>
    %69 = vector.shape_cast %68 : vector<8x128xbf16> to vector<1x8x128xbf16>
    %70 = vector.extract_strided_slice %44 {offsets = [8, 512], sizes = [8, 128], strides = [1, 1]} : vector<16x1536xbf16> to vector<8x128xbf16>
    %71 = vector.shape_cast %70 : vector<8x128xbf16> to vector<1x8x128xbf16>
    %72 = vector.extract_strided_slice %44 {offsets = [8, 640], sizes = [8, 128], strides = [1, 1]} : vector<16x1536xbf16> to vector<8x128xbf16>
    %73 = vector.shape_cast %72 : vector<8x128xbf16> to vector<1x8x128xbf16>
    %74 = vector.extract_strided_slice %44 {offsets = [8, 768], sizes = [8, 128], strides = [1, 1]} : vector<16x1536xbf16> to vector<8x128xbf16>
    %75 = vector.shape_cast %74 : vector<8x128xbf16> to vector<1x8x128xbf16>
    %76 = vector.extract_strided_slice %44 {offsets = [8, 896], sizes = [8, 128], strides = [1, 1]} : vector<16x1536xbf16> to vector<8x128xbf16>
    %77 = vector.shape_cast %76 : vector<8x128xbf16> to vector<1x8x128xbf16>
    %78 = tpu.concatenate %63, %65, %67, %69, %71, %73, %75, %77 in 0 : vector<1x8x128xbf16>, vector<1x8x128xbf16>, vector<1x8x128xbf16>, vector<1x8x128xbf16>, vector<1x8x128xbf16>, vector<1x8x128xbf16>, vector<1x8x128xbf16>, vector<1x8x128xbf16> -> vector<8x8x128xbf16>
    %79 = vector.extract_strided_slice %44 {offsets = [0, 1024], sizes = [8, 128], strides = [1, 1]} : vector<16x1536xbf16> to vector<8x128xbf16>
    %80 = vector.shape_cast %79 : vector<8x128xbf16> to vector<1x8x128xbf16>
    %81 = vector.extract_strided_slice %44 {offsets = [0, 1152], sizes = [8, 128], strides = [1, 1]} : vector<16x1536xbf16> to vector<8x128xbf16>
    %82 = vector.shape_cast %81 : vector<8x128xbf16> to vector<1x8x128xbf16>
    %83 = vector.extract_strided_slice %44 {offsets = [0, 1280], sizes = [8, 128], strides = [1, 1]} : vector<16x1536xbf16> to vector<8x128xbf16>
    %84 = vector.shape_cast %83 : vector<8x128xbf16> to vector<1x8x128xbf16>
    %85 = vector.extract_strided_slice %44 {offsets = [0, 1408], sizes = [8, 128], strides = [1, 1]} : vector<16x1536xbf16> to vector<8x128xbf16>
    %86 = vector.shape_cast %85 : vector<8x128xbf16> to vector<1x8x128xbf16>
    %87 = vector.extract_strided_slice %44 {offsets = [8, 1024], sizes = [8, 128], strides = [1, 1]} : vector<16x1536xbf16> to vector<8x128xbf16>
    %88 = vector.shape_cast %87 : vector<8x128xbf16> to vector<1x8x128xbf16>
    %89 = vector.extract_strided_slice %44 {offsets = [8, 1152], sizes = [8, 128], strides = [1, 1]} : vector<16x1536xbf16> to vector<8x128xbf16>
    %90 = vector.shape_cast %89 : vector<8x128xbf16> to vector<1x8x128xbf16>
    %91 = vector.extract_strided_slice %44 {offsets = [8, 1280], sizes = [8, 128], strides = [1, 1]} : vector<16x1536xbf16> to vector<8x128xbf16>
    %92 = vector.shape_cast %91 : vector<8x128xbf16> to vector<1x8x128xbf16>
    %93 = vector.extract_strided_slice %44 {offsets = [8, 1408], sizes = [8, 128], strides = [1, 1]} : vector<16x1536xbf16> to vector<8x128xbf16>
    %94 = vector.shape_cast %93 : vector<8x128xbf16> to vector<1x8x128xbf16>
    %95 = tpu.concatenate %80, %82, %84, %86, %88, %90, %92, %94 in 0 : vector<1x8x128xbf16>, vector<1x8x128xbf16>, vector<1x8x128xbf16>, vector<1x8x128xbf16>, vector<1x8x128xbf16>, vector<1x8x128xbf16>, vector<1x8x128xbf16>, vector<1x8x128xbf16> -> vector<8x8x128xbf16>
    "tpu.trace_start"() <{level = 10 : i32, message = "bqd,bkd->bqk"}> : () -> ()
    %cst_22 = arith.constant dense<0.000000e+00> : vector<8x8x8xf32>
    %96 = tpu.matmul %61, %78, %cst_22 {dimension_numbers = #tpu.dot_dimension_numbers<[2], [2], [1], [1], [0, 0, 0, 1, 1, 1], [0], [0]>} : vector<8x8x128xbf16>, vector<8x8x128xbf16>, vector<8x8x8xf32> -> vector<8x8x8xf32>
    "tpu.trace_stop"() : () -> ()
    %cst_23 = arith.constant 0.102062076 : f32
    %97 = vector.broadcast %cst_23 : f32 to vector<8x8x8xf32>
    %98 = arith.mulf %96, %97 : vector<8x8x8xf32>
    %cst_24 = arith.constant dense<0xFF800000> : vector<8x8xf32>
    %99 = vector.multi_reduction <maximumf>, %98, %cst_24 [2] : vector<8x8x8xf32> to vector<8x8xf32>
    %100 = vector.shape_cast %99 : vector<8x8xf32> to vector<8x8x1xf32>
    %101 = vector.broadcast %100 : vector<8x8x1xf32> to vector<8x8x8xf32>
    %102 = arith.subf %98, %101 : vector<8x8x8xf32>
    %103 = math.exp %102 : vector<8x8x8xf32>
    %cst_25 = arith.constant dense<0.000000e+00> : vector<8x8xf32>
    %104 = vector.multi_reduction <add>, %103, %cst_25 [2] : vector<8x8x8xf32> to vector<8x8xf32>
    %105 = vector.shape_cast %104 : vector<8x8xf32> to vector<8x8x1xf32>
    %106 = vector.broadcast %105 : vector<8x8x1xf32> to vector<8x8x8xf32>
    %107 = arith.divf %103, %106 : vector<8x8x8xf32>
    %108 = arith.truncf %107 : vector<8x8x8xf32> to vector<8x8x8xbf16>
    "tpu.trace_start"() <{level = 10 : i32, message = "bqk,bkd->bqd"}> : () -> ()
    %cst_26 = arith.constant dense<0.000000e+00> : vector<8x8x128xf32>
    %109 = tpu.matmul %108, %95, %cst_26 {dimension_numbers = #tpu.dot_dimension_numbers<[2], [1], [1], [2], [0, 0, 0, 1, 1, 2], [0], [0]>} : vector<8x8x8xbf16>, vector<8x8x128xbf16>, vector<8x8x128xf32> -> vector<8x8x128xf32>
    "tpu.trace_stop"() : () -> ()
    %110 = vector.extract_strided_slice %107 {offsets = [0, 0, 0], sizes = [1, 8, 8], strides = [1, 1, 1]} : vector<8x8x8xf32> to vector<1x8x8xf32>
    %111 = vector.shape_cast %110 : vector<1x8x8xf32> to vector<8x8xf32>
    %112 = vector.extract_strided_slice %107 {offsets = [1, 0, 0], sizes = [1, 8, 8], strides = [1, 1, 1]} : vector<8x8x8xf32> to vector<1x8x8xf32>
    %113 = vector.shape_cast %112 : vector<1x8x8xf32> to vector<8x8xf32>
    %114 = arith.addf %111, %113 : vector<8x8xf32>
    %115 = vector.extract_strided_slice %107 {offsets = [2, 0, 0], sizes = [1, 8, 8], strides = [1, 1, 1]} : vector<8x8x8xf32> to vector<1x8x8xf32>
    %116 = vector.shape_cast %115 : vector<1x8x8xf32> to vector<8x8xf32>
    %117 = arith.addf %114, %116 : vector<8x8xf32>
    %118 = vector.extract_strided_slice %107 {offsets = [3, 0, 0], sizes = [1, 8, 8], strides = [1, 1, 1]} : vector<8x8x8xf32> to vector<1x8x8xf32>
    %119 = vector.shape_cast %118 : vector<1x8x8xf32> to vector<8x8xf32>
    %120 = arith.addf %117, %119 : vector<8x8xf32>
    %cst_27 = arith.constant 2.500000e-01 : f32
    %121 = vector.broadcast %cst_27 : f32 to vector<8x8xf32>
    %122 = arith.mulf %120, %121 : vector<8x8xf32>
    %123 = vector.extract_strided_slice %107 {offsets = [4, 0, 0], sizes = [1, 8, 8], strides = [1, 1, 1]} : vector<8x8x8xf32> to vector<1x8x8xf32>
    %124 = vector.shape_cast %123 : vector<1x8x8xf32> to vector<8x8xf32>
    %125 = vector.extract_strided_slice %107 {offsets = [5, 0, 0], sizes = [1, 8, 8], strides = [1, 1, 1]} : vector<8x8x8xf32> to vector<1x8x8xf32>
    %126 = vector.shape_cast %125 : vector<1x8x8xf32> to vector<8x8xf32>
    %127 = arith.addf %124, %126 : vector<8x8xf32>
    %128 = vector.extract_strided_slice %107 {offsets = [6, 0, 0], sizes = [1, 8, 8], strides = [1, 1, 1]} : vector<8x8x8xf32> to vector<1x8x8xf32>
    %129 = vector.shape_cast %128 : vector<1x8x8xf32> to vector<8x8xf32>
    %130 = arith.addf %127, %129 : vector<8x8xf32>
    %131 = vector.extract_strided_slice %107 {offsets = [7, 0, 0], sizes = [1, 8, 8], strides = [1, 1, 1]} : vector<8x8x8xf32> to vector<1x8x8xf32>
    %132 = vector.shape_cast %131 : vector<1x8x8xf32> to vector<8x8xf32>
    %133 = arith.addf %130, %132 : vector<8x8xf32>
    %cst_28 = arith.constant 2.500000e-01 : f32
    %134 = vector.broadcast %cst_28 : f32 to vector<8x8xf32>
    %135 = arith.mulf %133, %134 : vector<8x8xf32>
    %136 = tpu.concatenate %122, %135 in 0 : vector<8x8xf32>, vector<8x8xf32> -> vector<16x8xf32>
    %cst_29 = arith.constant 0.000000e+00 : f32
    %137 = vector.broadcast %cst_29 : f32 to vector<16x128xf32>
    %c0_30 = arith.constant 0 : index
    %c0_31 = arith.constant 0 : index
    %138 = vector.load %arg13[%c0_30, %c0_31] : memref<16x128xf32, #tpu.memory_space<vmem>>, vector<16x128xf32>
    tpu.vector_store %arg13[%c0_30, %c0_31], %137 {strides = array<i32>} : memref<16x128xf32, #tpu.memory_space<vmem>>, vector<16x128xf32>,
    %c0_32 = arith.constant 0 : index
    %c0_33 = arith.constant 0 : index
    %139 = vector.load %arg13[%c0_32, %c0_33] : memref<16x128xf32, #tpu.memory_space<vmem>>, vector<16x8xf32>
    tpu.vector_store %arg13[%c0_32, %c0_33], %136 {strides = array<i32>} : memref<16x128xf32, #tpu.memory_space<vmem>>, vector<16x8xf32>,
    %140 = vector.extract_strided_slice %109 {offsets = [0, 0, 0], sizes = [1, 8, 128], strides = [1, 1, 1]} : vector<8x8x128xf32> to vector<1x8x128xf32>
    %141 = vector.shape_cast %140 : vector<1x8x128xf32> to vector<8x128xf32>
    %142 = vector.extract_strided_slice %109 {offsets = [1, 0, 0], sizes = [1, 8, 128], strides = [1, 1, 1]} : vector<8x8x128xf32> to vector<1x8x128xf32>
    %143 = vector.shape_cast %142 : vector<1x8x128xf32> to vector<8x128xf32>
    %144 = vector.extract_strided_slice %109 {offsets = [2, 0, 0], sizes = [1, 8, 128], strides = [1, 1, 1]} : vector<8x8x128xf32> to vector<1x8x128xf32>
    %145 = vector.shape_cast %144 : vector<1x8x128xf32> to vector<8x128xf32>
    %146 = vector.extract_strided_slice %109 {offsets = [3, 0, 0], sizes = [1, 8, 128], strides = [1, 1, 1]} : vector<8x8x128xf32> to vector<1x8x128xf32>
    %147 = vector.shape_cast %146 : vector<1x8x128xf32> to vector<8x128xf32>
    %148 = tpu.concatenate %141, %143, %145, %147 in 1 : vector<8x128xf32>, vector<8x128xf32>, vector<8x128xf32>, vector<8x128xf32> -> vector<8x512xf32>
    %149 = vector.extract_strided_slice %109 {offsets = [4, 0, 0], sizes = [1, 8, 128], strides = [1, 1, 1]} : vector<8x8x128xf32> to vector<1x8x128xf32>
    %150 = vector.shape_cast %149 : vector<1x8x128xf32> to vector<8x128xf32>
    %151 = vector.extract_strided_slice %109 {offsets = [5, 0, 0], sizes = [1, 8, 128], strides = [1, 1, 1]} : vector<8x8x128xf32> to vector<1x8x128xf32>
    %152 = vector.shape_cast %151 : vector<1x8x128xf32> to vector<8x128xf32>
    %153 = vector.extract_strided_slice %109 {offsets = [6, 0, 0], sizes = [1, 8, 128], strides = [1, 1, 1]} : vector<8x8x128xf32> to vector<1x8x128xf32>
    %154 = vector.shape_cast %153 : vector<1x8x128xf32> to vector<8x128xf32>
    %155 = vector.extract_strided_slice %109 {offsets = [7, 0, 0], sizes = [1, 8, 128], strides = [1, 1, 1]} : vector<8x8x128xf32> to vector<1x8x128xf32>
    %156 = vector.shape_cast %155 : vector<1x8x128xf32> to vector<8x128xf32>
    %157 = tpu.concatenate %150, %152, %154, %156 in 1 : vector<8x128xf32>, vector<8x128xf32>, vector<8x128xf32>, vector<8x128xf32> -> vector<8x512xf32>
    %158 = tpu.concatenate %148, %157 in 0 : vector<8x512xf32>, vector<8x512xf32> -> vector<16x512xf32>
    %159 = arith.truncf %158 : vector<16x512xf32> to vector<16x512xbf16>
    %c0_34 = arith.constant 0 : index
    %c0_35 = arith.constant 0 : index
    %160 = vector.load %arg7[%c0_34, %c0_35] : memref<512x384xbf16, #tpu.memory_space<vmem>>, vector<512x384xbf16>
    %cst_36 = arith.constant dense<0.000000e+00> : vector<16x384xf32>
    %161 = tpu.matmul %159, %160, %cst_36 {dimension_numbers = #tpu.dot_dimension_numbers<[1], [0], [0], [1], [0, 0, 1, 1], [], []>} : vector<16x512xbf16>, vector<512x384xbf16>, vector<16x384xf32> -> vector<16x384xf32>
    %c0_37 = arith.constant 0 : index
    %c0_38 = arith.constant 0 : index
    %162 = vector.load %arg8[%c0_37, %c0_38] : memref<1x384xf32, #tpu.memory_space<vmem>>, vector<1x384xf32>
    %163 = vector.broadcast %162 : vector<1x384xf32> to vector<16x384xf32>
    %164 = arith.addf %161, %163 : vector<16x384xf32>
    %165 = vector.shape_cast %164 : vector<16x384xf32> to vector<2x8x384xf32>
    %cst_39 = arith.constant dense<0.000000e+00> : vector<2x384xf32>
    %166 = vector.multi_reduction <add>, %165, %cst_39 [1] : vector<2x8x384xf32> to vector<2x384xf32>
    %cst_40 = arith.constant 8.000000e+00 : f32
    %167 = vector.broadcast %cst_40 : f32 to vector<2x384xf32>
    %168 = arith.divf %166, %167 : vector<2x384xf32>
    %169 = arith.truncf %168 : vector<2x384xf32> to vector<2x384xbf16>
    %c0_41 = arith.constant 0 : index
    %c0_42 = arith.constant 0 : index
    %170 = vector.load %arg9[%c0_41, %c0_42] : memref<384x256xbf16, #tpu.memory_space<vmem>>, vector<384x256xbf16>
    %cst_43 = arith.constant dense<0.000000e+00> : vector<2x256xf32>
    %171 = tpu.matmul %169, %170, %cst_43 {dimension_numbers = #tpu.dot_dimension_numbers<[1], [0], [0], [1], [0, 0, 1, 1], [], []>} : vector<2x384xbf16>, vector<384x256xbf16>, vector<2x256xf32> -> vector<2x256xf32>
    %c0_44 = arith.constant 0 : index
    %c0_45 = arith.constant 0 : index
    %172 = vector.load %arg10[%c0_44, %c0_45] : memref<1x256xf32, #tpu.memory_space<vmem>>, vector<1x256xf32>
    %173 = vector.broadcast %172 : vector<1x256xf32> to vector<2x256xf32>
    %174 = arith.addf %171, %173 : vector<2x256xf32>
    %cst_46 = arith.constant 0.000000e+00 : f32
    %175 = vector.broadcast %cst_46 : f32 to vector<2x256xf32>
    %176 = arith.maximumf %174, %175 : vector<2x256xf32>
    %177 = arith.truncf %176 : vector<2x256xf32> to vector<2x256xbf16>
    %c0_47 = arith.constant 0 : index
    %c0_48 = arith.constant 0 : index
    %178 = vector.load %arg11[%c0_47, %c0_48] : memref<256x128xbf16, #tpu.memory_space<vmem>>, vector<256x128xbf16>
    %cst_49 = arith.constant dense<0.000000e+00> : vector<2x128xf32>
    %179 = tpu.matmul %177, %178, %cst_49 {dimension_numbers = #tpu.dot_dimension_numbers<[1], [0], [0], [1], [0, 0, 1, 1], [], []>} : vector<2x256xbf16>, vector<256x128xbf16>, vector<2x128xf32> -> vector<2x128xf32>
    %c0_50 = arith.constant 0 : index
    %c0_51 = arith.constant 0 : index
    %180 = vector.load %arg12[%c0_50, %c0_51] : memref<1x128xf32, #tpu.memory_space<vmem>>, vector<1x128xf32>
    %181 = vector.broadcast %180 : vector<1x128xf32> to vector<2x128xf32>
    %182 = arith.addf %179, %181 : vector<2x128xf32>
    %c0_52 = arith.constant 0 : index
    %c0_53 = arith.constant 0 : index
    %183 = vector.load %arg14[%c0_52, %c0_53] : memref<2x128xf32, #tpu.memory_space<vmem>>, vector<2x128xf32>
    tpu.vector_store %arg14[%c0_52, %c0_53], %182 {strides = array<i32>} : memref<2x128xf32, #tpu.memory_space<vmem>>, vector<2x128xf32>,
    return
  }
}

</mosaic_0001>

<bundles_post_ra>
// kernel: snuffy_forward.1
= control target key start
LH: loop header
LB: loop body
LE: loop exit
PB: predicated region body
PF: predicated region fallthrough
CT: control target
= control target key end

     0   :  { %20 = vsyncpa [#allocation3], 0  ;;  %s9355_s0 = inlined_call_operand.vmem [shape: bf16[16,768], index: 0, kind: input, shape index: {}]   ;;  %s9356_s1 = inlined_call_operand.vmem [shape: bf16[768,384], index: 1, kind: input, shape index: {}]   ;;  %s9357_s2 = inlined_call_operand.hbm [shape: f32[1,384], index: 2, kind: input, shape index: {}]   ;;  %s9358_s3 = inlined_call_operand.hbm [shape: f32[1,384], index: 3, kind: input, shape index: {}]   ;;  %s9359_s4 = inlined_call_operand.hbm [shape: f32[1,384], index: 4, kind: input, shape index: {}]   ;;  %s9360_s5 = inlined_call_operand.hbm [shape: bf16[384,1536], index: 5, kind: input, shape index: {}]   ;;  %s9361_s6 = inlined_call_operand.hbm [shape: f32[1,1536], index: 6, kind: input, shape index: {}]   ;;  %s9362_s7 = inlined_call_operand.hbm [shape: bf16[512,384], index: 7, kind: input, shape index: {}]   ;;  %s9363_s8 = inlined_call_operand.hbm [shape: f32[1,384], index: 8, kind: input, shape index: {}]   ;;  %s9364_s9 = inlined_call_operand.hbm [shape: bf16[384,256], index: 9, kind: input, shape index: {}]   ;;  %s9365_s10 = inlined_call_operand.hbm [shape: f32[1,256], index: 10, kind: input, shape index: {}]   ;;  %s9366_s11 = inlined_call_operand.hbm [shape: bf16[256,128], index: 11, kind: input, shape index: {}]   ;;  %s9367_s12 = inlined_call_operand.hbm [shape: f32[1,128], index: 12, kind: input, shape index: {}]   ;;  %s9368_s13 = inlined_call_operand.hbm [shape: f32[16,128], index: 13, kind: output, shape index: {0}]   ;;  %s9369_s14 = inlined_call_operand.hbm [shape: f32[2,128], index: 14, kind: output, shape index: {1}]  }
   0x1   :  { %21 = vsyncpa [#allocation6], 0 }
   0x2   :  { %22 = vsyncpa [#allocation9], 0 }
   0x3   :  { %23 = vsyncpa [#allocation12], 0 }
   0x4   :  { %24 = vsyncpa [#allocation15], 0 }
   0x5   :  { %25 = vsyncpa [#allocation18], 0 }
   0x6   :  { %26 = vsyncpa [#allocation4], 0 }
   0x7   :  { %27 = vsyncpa [#allocation22], 0  ;;  %s8391_s29 = smov [#allocation5]   ;;  %s8392_s15 = smov [#allocation8]  }
   0x8   :  { %s48_s30 = sshll.u32 %s8391_s29, 4  ;;  %s67_s16 = sshll.u32 %s8392_s15, 4  ;;  %s49_s30 = int_to_ptr.vmem [resolvable:$true] %s48_s30  ;;  %s8490_s16 = int_to_ptr.vmem [resolvable:$true] %s67_s16 }
   0x9   :  { %s8089_s19 = scalar_lea.hbm %s9358_s3, 48 }
   0xa   :  { %p8090_p0 = scmp.ne.s32.totalorder %s9358_s3, %s8089_s19  ;;  %p8093_p1 = scmp.lt.u32.totalorder %s8089_s19, %s9358_s3 }
   0xc   :  { %p8095_p2 = pnand %p8093_p1, %p8090_p0 }
   0xe   :  { %8098 = shalt.err (!%p8095_p2)
}
   0xf   :  { %s8099_s24 = scalar_lea.vmem %s49_s30, 48  ;;  %s8103_s25 = scalar_lea.vmem %s49_s30, 64 }
  0x10   :  { %p8100_p3 = scmp.ne.s32.totalorder %s49_s30, %s8099_s24  ;;  %p8104_p4 = scmp.lt.s32.totalorder %s49_s30, %s49_s30 }
  0x11   :  { %p8105_p5 = scmp.lt.s32.totalorder %s8103_s25, %s8099_s24 }
  0x13   :  { %p8106_p6 = por %p8105_p5, %p8104_p4 }
  0x15   :  { %p8107_p7 = pnand %p8106_p6, %p8100_p3 }
  0x17   :  { %8110 = shalt.err (!%p8107_p7)
}
  0x18   :  { %51 = dma.hbm_to_vmem [thread:$0]  %s9358_s3, 48, %s49_s30, [#allocation6]  }
  0x19   :  { %s8111_s15 = scalar_lea.hbm %s9360_s5, 36864 }
  0x1a   :  { %p8112_p8 = scmp.ne.s32.totalorder %s9360_s5, %s8111_s15  ;;  %p8115_p9 = scmp.lt.u32.totalorder %s8111_s15, %s9360_s5 }
  0x1c   :  { %p8117_p10 = pnand %p8115_p9, %p8112_p8 }
  0x1e   :  { %8120 = shalt.err (!%p8117_p10)
}
  0x1f   :  { %s8121_s21 = scalar_lea.vmem %s8490_s16, 36864  ;;  %p8126_p12 = scmp.lt.s32.totalorder %s8490_s16, %s8490_s16 }
  0x20   :  { %p8122_p11 = scmp.ne.s32.totalorder %s8490_s16, %s8121_s21  ;;  %p8127_p13 = scmp.lt.s32.totalorder %s8121_s21, %s8121_s21 }
  0x22   :  { %p8128_p0 = por %p8127_p13, %p8126_p12 }
  0x24   :  { %p8129_p1 = pnand %p8128_p0, %p8122_p11 }
  0x26   :  { %8132 = shalt.err (!%p8129_p1)
}
  0x27   :  { %s8393_s3 = smov 768   ;;  %s8394_s30 = smov 48  }
  0x28   :  { %73 = dma.hbm_to_vmem [thread:$0]  %s9360_s5, 36864, %s8490_s16, [#allocation9], %s8393_s3, %s8393_s3, %s8394_s30  }
  0x29   :  { %s8395_s24 = smov [#allocation11]   ;;  %s8133_s28 = scalar_lea.hbm %s9362_s7, 12288 }
  0x2a   :  { %s89_s25 = sshll.u32 %s8395_s24, 4  ;;  %p8134_p2 = scmp.ne.s32.totalorder %s9362_s7, %s8133_s28  ;;  %s90_s25 = int_to_ptr.vmem [resolvable:$true] %s89_s25 }
  0x2b   :  { %p8137_p3 = scmp.lt.u32.totalorder %s8133_s28, %s9362_s7 }
  0x2d   :  { %p8139_p4 = pnand %p8137_p3, %p8134_p2 }
  0x2f   :  { %8142 = shalt.err (!%p8139_p4)
}
  0x30   :  { %s8143_s19 = scalar_lea.vmem %s90_s25, 12288  ;;  %p8148_p6 = scmp.lt.s32.totalorder %s90_s25, %s90_s25 }
  0x31   :  { %p8144_p5 = scmp.ne.s32.totalorder %s90_s25, %s8143_s19  ;;  %p8149_p7 = scmp.lt.s32.totalorder %s8143_s19, %s8143_s19 }
  0x33   :  { %p8150_p8 = por %p8149_p7, %p8148_p6 }
  0x35   :  { %p8151_p9 = pnand %p8150_p8, %p8144_p5 }
  0x37   :  { %8154 = shalt.err (!%p8151_p9)
}
  0x38   :  { %s8396_s5 = smov 192   ;;  %s8397_s16 = smov 12  }
  0x39   :  { %95 = dma.hbm_to_vmem [thread:$0]  %s9362_s7, 12288, %s90_s25, [#allocation12], %s8396_s5, %s8396_s5, %s8397_s16  }
  0x3a   :  { %s8398_s3 = smov [#allocation14]   ;;  %s8155_s24 = scalar_lea.hbm %s9364_s9, 6144 }
  0x3b   :  { %s111_s30 = sshll.u32 %s8398_s3, 4  ;;  %p8156_p10 = scmp.ne.s32.totalorder %s9364_s9, %s8155_s24  ;;  %s112_s30 = int_to_ptr.vmem [resolvable:$true] %s111_s30 }
  0x3c   :  { %p8159_p11 = scmp.lt.u32.totalorder %s8155_s24, %s9364_s9 }
  0x3e   :  { %p8161_p12 = pnand %p8159_p11, %p8156_p10 }
  0x40   :  { %8164 = shalt.err (!%p8161_p12)
}
  0x41   :  { %s8165_s15 = scalar_lea.vmem %s112_s30, 6144  ;;  %p8170_p0 = scmp.lt.s32.totalorder %s112_s30, %s112_s30 }
  0x42   :  { %p8166_p13 = scmp.ne.s32.totalorder %s112_s30, %s8165_s15  ;;  %p8171_p1 = scmp.lt.s32.totalorder %s8165_s15, %s8165_s15 }
  0x44   :  { %p8172_p2 = por %p8171_p1, %p8170_p0 }
  0x46   :  { %p8173_p3 = pnand %p8172_p2, %p8166_p13 }
  0x48   :  { %8176 = shalt.err (!%p8173_p3)
}
  0x49   :  { %s8399_s7 = smov 128   ;;  %s8400_s25 = smov 8  }
  0x4a   :  { %117 = dma.hbm_to_vmem [thread:$0]  %s9364_s9, 6144, %s112_s30, [#allocation15], %s8399_s7, %s8399_s7, %s8400_s25  }
  0x4b   :  { %s8401_s19 = smov [#allocation17]   ;;  %s8177_s21 = scalar_lea.hbm %s9366_s11, 2048 }
  0x4c   :  { %s133_s5 = sshll.u32 %s8401_s19, 4  ;;  %p8178_p4 = scmp.ne.s32.totalorder %s9366_s11, %s8177_s21  ;;  %s134_s5 = int_to_ptr.vmem [resolvable:$true] %s133_s5 }
  0x4d   :  { %p8181_p5 = scmp.lt.u32.totalorder %s8177_s21, %s9366_s11 }
  0x4f   :  { %p8183_p6 = pnand %p8181_p5, %p8178_p4 }
  0x51   :  { %8186 = shalt.err (!%p8183_p6)
}
  0x52   :  { %s8187_s26 = scalar_lea.vmem %s134_s5, 2048  ;;  %p8192_p8 = scmp.lt.s32.totalorder %s134_s5, %s134_s5 }
  0x53   :  { %p8188_p7 = scmp.ne.s32.totalorder %s134_s5, %s8187_s26  ;;  %p8193_p9 = scmp.lt.s32.totalorder %s8187_s26, %s8187_s26 }
  0x55   :  { %p8194_p10 = por %p8193_p9, %p8192_p8 }
  0x57   :  { %p8195_p11 = pnand %p8194_p10, %p8188_p7 }
  0x59   :  { %8198 = shalt.err (!%p8195_p11)
}
  0x5a   :  { %s8402_s9 = smov 64   ;;  %s8403_s30 = smov 4  }
  0x5b   :  { %139 = dma.hbm_to_vmem [thread:$0]  %s9366_s11, 2048, %s134_s5, [#allocation18], %s8402_s9, %s8402_s9, %s8403_s30  }
  0x5c   :  { %s8404_s29 = smov [#allocation2]   ;;  %s8405_s17 = smov [#allocation7]  }
  0x5d   :  { %s38_s15 = sshll.u32 %s8404_s29, 4  ;;  %s58_s18 = sshll.u32 %s8405_s17, 4  ;;  %s39_s15 = int_to_ptr.vmem [resolvable:$true] %s38_s15  ;;  %s59_s18 = int_to_ptr.vmem [resolvable:$true] %s58_s18 }
  0x5e   :  { %s8199_s20 = scalar_lea.hbm %s9357_s2, 48 }
  0x5f   :  { %p8200_p12 = scmp.ne.s32.totalorder %s9357_s2, %s8199_s20  ;;  %p8203_p13 = scmp.lt.u32.totalorder %s8199_s20, %s9357_s2 }
  0x61   :  { %p8205_p0 = pnand %p8203_p13, %p8200_p12 }
  0x63   :  { %8208 = shalt.err (!%p8205_p0)
}
  0x64   :  { %s8209_s11 = scalar_lea.vmem %s39_s15, 48  ;;  %s8213_s5 = scalar_lea.vmem %s39_s15, 64 }
  0x65   :  { %p8210_p1 = scmp.ne.s32.totalorder %s39_s15, %s8209_s11  ;;  %p8214_p2 = scmp.lt.s32.totalorder %s39_s15, %s39_s15 }
  0x66   :  { %p8215_p3 = scmp.lt.s32.totalorder %s8213_s5, %s8209_s11 }
  0x68   :  { %p8216_p4 = por %p8215_p3, %p8214_p2 }
  0x6a   :  { %p8217_p5 = pnand %p8216_p4, %p8210_p1 }
  0x6c   :  { %8220 = shalt.err (!%p8217_p5)
}
  0x6d   :  { %41 = dma.hbm_to_vmem [thread:$0]  %s9357_s2, 48, %s39_s15, [#allocation3]  }
  0x6e   :  { %s8221_s27 = scalar_lea.hbm %s9359_s4, 48 }
  0x6f   :  { %p8222_p6 = scmp.ne.s32.totalorder %s9359_s4, %s8221_s27  ;;  %p8225_p7 = scmp.lt.u32.totalorder %s8221_s27, %s9359_s4 }
  0x71   :  { %p8227_p8 = pnand %p8225_p7, %p8222_p6 }
  0x73   :  { %8230 = shalt.err (!%p8227_p8)
}
  0x74   :  { %s8231_s16 = scalar_lea.vmem %s59_s18, 48  ;;  %s8235_s20 = scalar_lea.vmem %s59_s18, 64 }
  0x75   :  { %p8232_p9 = scmp.ne.s32.totalorder %s59_s18, %s8231_s16  ;;  %p8236_p10 = scmp.lt.s32.totalorder %s59_s18, %s59_s18 }
  0x76   :  { %p8237_p11 = scmp.lt.s32.totalorder %s8235_s20, %s8231_s16 }
  0x78   :  { %p8238_p12 = por %p8237_p11, %p8236_p10 }
  0x7a   :  { %p8239_p13 = pnand %p8238_p12, %p8232_p9 }
  0x7c   :  { %8242 = shalt.err (!%p8239_p13)
}
  0x7d   :  { %61 = dma.hbm_to_vmem [thread:$0]  %s9359_s4, 48, %s59_s18, [#allocation6]  }
  0x7e   :  { %s8406_s21 = smov [#allocation10]   ;;  %s8407_s22 = smov [#allocation13]  }
  0x7f   :  { %s80_s3 = sshll.u32 %s8406_s21, 4  ;;  %s102_s23 = sshll.u32 %s8407_s22, 4  ;;  %s81_s3 = int_to_ptr.vmem [resolvable:$true] %s80_s3  ;;  %s103_s23 = int_to_ptr.vmem [resolvable:$true] %s102_s23 }
  0x80   :  { %s8243_s24 = scalar_lea.hbm %s9361_s6, 192 }
  0x81   :  { %p8244_p0 = scmp.ne.s32.totalorder %s9361_s6, %s8243_s24  ;;  %p8247_p1 = scmp.lt.u32.totalorder %s8243_s24, %s9361_s6 }
  0x83   :  { %p8249_p2 = pnand %p8247_p1, %p8244_p0 }
  0x85   :  { %8252 = shalt.err (!%p8249_p2)
}
  0x86   :  { %s8253_s4 = scalar_lea.vmem %s81_s3, 192  ;;  %p8258_p4 = scmp.lt.s32.totalorder %s81_s3, %s81_s3 }
  0x87   :  { %p8254_p3 = scmp.ne.s32.totalorder %s81_s3, %s8253_s4  ;;  %p8259_p5 = scmp.lt.s32.totalorder %s8253_s4, %s8253_s4 }
  0x89   :  { %p8260_p6 = por %p8259_p5, %p8258_p4 }
  0x8b   :  { %p8261_p7 = pnand %p8260_p6, %p8254_p3 }
  0x8d   :  { %8264 = shalt.err (!%p8261_p7)
}
  0x8e   :  { %83 = dma.hbm_to_vmem [thread:$0]  %s9361_s6, 192, %s81_s3, [#allocation9]  }
  0x8f   :  { %s8265_s19 = scalar_lea.hbm %s9363_s8, 48 }
  0x90   :  { %p8266_p8 = scmp.ne.s32.totalorder %s9363_s8, %s8265_s19  ;;  %p8269_p9 = scmp.lt.u32.totalorder %s8265_s19, %s9363_s8 }
  0x92   :  { %p8271_p10 = pnand %p8269_p9, %p8266_p8 }
  0x94   :  { %8274 = shalt.err (!%p8271_p10)
}
  0x95   :  { %s8275_s21 = scalar_lea.vmem %s103_s23, 48  ;;  %s8279_s22 = scalar_lea.vmem %s103_s23, 64 }
  0x96   :  { %p8276_p11 = scmp.ne.s32.totalorder %s103_s23, %s8275_s21  ;;  %p8280_p12 = scmp.lt.s32.totalorder %s103_s23, %s103_s23 }
  0x97   :  { %p8281_p13 = scmp.lt.s32.totalorder %s8279_s22, %s8275_s21 }
  0x99   :  { %p8282_p0 = por %p8281_p13, %p8280_p12 }
  0x9b   :  { %p8283_p1 = pnand %p8282_p0, %p8276_p11 }
  0x9d   :  { %8286 = shalt.err (!%p8283_p1)
}
  0x9e   :  { %105 = dma.hbm_to_vmem [thread:$0]  %s9363_s8, 48, %s103_s23, [#allocation12]  }
  0x9f   :  { %s8408_s11 = smov [#allocation16]   ;;  %s8409_s24 = smov [#allocation19]  }
  0xa0   :  { %s124_s5 = sshll.u32 %s8408_s11, 4  ;;  %s146_s26 = sshll.u32 %s8409_s24, 4  ;;  %s125_s5 = int_to_ptr.vmem [resolvable:$true] %s124_s5  ;;  %s147_s26 = int_to_ptr.vmem [resolvable:$true] %s146_s26 }
  0xa1   :  { %s8287_s27 = scalar_lea.hbm %s9365_s10, 32 }
  0xa2   :  { %p8288_p2 = scmp.ne.s32.totalorder %s9365_s10, %s8287_s27  ;;  %p8291_p3 = scmp.lt.u32.totalorder %s8287_s27, %s9365_s10 }
  0xa4   :  { %p8293_p4 = pnand %p8291_p3, %p8288_p2 }
  0xa6   :  { %8296 = shalt.err (!%p8293_p4)
}
  0xa7   :  { %s8297_s8 = scalar_lea.vmem %s125_s5, 32  ;;  %p8302_p6 = scmp.lt.s32.totalorder %s125_s5, %s125_s5 }
  0xa8   :  { %p8298_p5 = scmp.ne.s32.totalorder %s125_s5, %s8297_s8  ;;  %p8303_p7 = scmp.lt.s32.totalorder %s8297_s8, %s8297_s8 }
  0xaa   :  { %p8304_p8 = por %p8303_p7, %p8302_p6 }
  0xac   :  { %p8305_p9 = pnand %p8304_p8, %p8298_p5 }
  0xae   :  { %8308 = shalt.err (!%p8305_p9)
}
  0xaf   :  { %127 = dma.hbm_to_vmem [thread:$0]  %s9365_s10, 32, %s125_s5, [#allocation15]  }
  0xb0   :  { %s8309_s20 = scalar_lea.hbm %s9367_s12, 16 }
  0xb1   :  { %p8310_p10 = scmp.ne.s32.totalorder %s9367_s12, %s8309_s20  ;;  %p8313_p11 = scmp.lt.u32.totalorder %s8309_s20, %s9367_s12 }
  0xb3   :  { %p8315_p12 = pnand %p8313_p11, %p8310_p10 }
  0xb5   :  { %8318 = shalt.err (!%p8315_p12)
}
  0xb6   :  { %s8319_s6 = scalar_lea.vmem %s147_s26, 16  ;;  %s8323_s3 = scalar_lea.vmem %s147_s26, 32 }
  0xb7   :  { %p8320_p13 = scmp.ne.s32.totalorder %s147_s26, %s8319_s6  ;;  %p8324_p0 = scmp.lt.s32.totalorder %s147_s26, %s147_s26 }
  0xb8   :  { %p8325_p1 = scmp.lt.s32.totalorder %s8323_s3, %s8319_s6 }
  0xba   :  { %p8326_p2 = por %p8325_p1, %p8324_p0 }
  0xbc   :  { %p8327_p3 = pnand %p8326_p2, %p8320_p13 }
  0xbe   :  { %8330 = shalt.err (!%p8327_p3)
}
  0xbf   :  { %149 = dma.hbm_to_vmem [thread:$0]  %s9367_s12, 16, %s147_s26, [#allocation18]  }
  0xc0   :  { %8375 = dma.done.wait [#allocation3], 48  }
  0xc1   :  { %8376 = vsyncadd [#allocation3], 4294967248 }
  0xc2   :  { %8377 = dma.done.wait [#allocation6], 96  }
  0xc3   :  { %8378 = vsyncadd [#allocation6], 4294967200 }
  0xc4   :  { %8379 = dma.done.wait [#allocation9], 37056  }
  0xc5   :  { %8380 = vsyncadd [#allocation9], 4294930240 }
  0xc6   :  { %8381 = dma.done.wait [#allocation12], 12336  }
  0xc7   :  { %8382 = vsyncadd [#allocation12], 4294954960 }
  0xc8   :  { %8383 = dma.done.wait [#allocation15], 6176  }
  0xc9   :  { %8384 = vsyncadd [#allocation15], 4294961120 }
  0xca   :  { %8385 = dma.done.wait [#allocation18], 2064  }
  0xcb   :  { %8386 = vsyncadd [#allocation18], 4294965232  ;;  %v7192_v0 = vld [vmem:[%s9356_s1 + $0x4] ss:$12 sps:$4 sm:$0xff]   ;;  %v7194_v1 = vld [vmem:[%s9356_s1] ss:$12 sps:$4 sm:$0xff]  }
  0xcc   :  { %1197 = vmatprep.subr.bf16.mxu0 %v7192_v0  ;;  %v7195_v2 = vld [vmem:[%s9356_s1 + $0x1c] ss:$12 sps:$4 sm:$0xff]   ;;  %v7197_v3 = vld [vmem:[%s9356_s1 + $0x18] ss:$12 sps:$4 sm:$0xff]   ;;  %v7198_v4 = vld [vmem:[%s9356_s1 + $0x34] ss:$12 sps:$4 sm:$0xff]  }
  0xcd   :  { %1198 = vmatpush1.bf16.msra.mxu0 %v7194_v1  ;;  %v7200_v5 = vld [vmem:[%s9356_s1 + $0x30] ss:$12 sps:$4 sm:$0xff]   ;;  %v7201_v6 = vld [vmem:[%s9356_s1 + $0x4c] ss:$12 sps:$4 sm:$0xff]   ;;  %v7203_v7 = vld [vmem:[%s9356_s1 + $0x48] ss:$12 sps:$4 sm:$0xff]  }
  0xce   :  { %1199 = vmatprep.subr.bf16.mxu0 %v7195_v2  ;;  %v7204_v8 = vld [vmem:[%s9356_s1 + $0x64] ss:$12 sps:$4 sm:$0xff]   ;;  %v7219_v9 = vld [vmem:[%s9356_s1 + $0xc8] ss:$12 sps:$4 sm:$0xff]   ;;  %v7206_v11 = vld [vmem:[%s9356_s1 + $0x60] ss:$12 sps:$4 sm:$0xff]  }
  0xcf   :  { %v7220_v10 = vld [vmem:[%s9356_s1 + $0x8] ss:$12 sps:$4 sm:$0xff]   ;;  %6834 = vmatprep.subr.bf16.mxu1 %v7219_v9  ;;  %v7224_v13 = vld [vmem:[%s9356_s1 + $0xe0] ss:$12 sps:$4 sm:$0xff]   ;;  %v7209_v15 = vld [vmem:[%s9356_s1 + $0x78] ss:$12 sps:$4 sm:$0xff]  }
  0xd0   :  { %v7207_v12 = vld [vmem:[%s9356_s1 + $0x7c] ss:$12 sps:$4 sm:$0xff]   ;;  %6835 = vmatpush3.bf16.msra.mxu1 %v7220_v10  ;;  %v7225_v14 = vld [vmem:[%s9356_s1 + $0x20] ss:$12 sps:$4 sm:$0xff]   ;;  %v7229_v17 = vld [vmem:[%s9356_s1 + $0xf8] ss:$12 sps:$4 sm:$0xff]  }
  0xd1   :  { %1200 = vmatpush1.bf16.msra.mxu0 %v7197_v3  ;;  %v7210_v16 = vld [vmem:[%s9356_s1 + $0x94] ss:$12 sps:$4 sm:$0xff]   ;;  %6836 = vmatprep.subr.bf16.mxu1 %v7224_v13  ;;  %v7230_v18 = vld [vmem:[%s9356_s1 + $0x38] ss:$12 sps:$4 sm:$0xff]   ;;  %v7212_v19 = vld [vmem:[%s9356_s1 + $0x90] ss:$12 sps:$4 sm:$0xff]  }
  0xd2   :  { %1201 = vmatprep.subr.bf16.mxu0 %v7198_v4  ;;  %v7234_v20 = vld [vmem:[%s9356_s1 + $0x110] ss:$12 sps:$4 sm:$0xff]   ;;  %v7213_v22 = vld [vmem:[%s9356_s1 + $0xac] ss:$12 sps:$4 sm:$0xff]   ;;  %v7215_v23 = vld [vmem:[%s9356_s1 + $0xa8] ss:$12 sps:$4 sm:$0xff]  }
  0xd3   :  { %v7235_v21 = vld [vmem:[%s9356_s1 + $0x50] ss:$12 sps:$4 sm:$0xff]   ;;  %v7239_v24 = vld [vmem:[%s9356_s1 + $0x128] ss:$12 sps:$4 sm:$0xff]   ;;  %v7244_v27 = vld [vmem:[%s9356_s1 + $0x140] ss:$12 sps:$4 sm:$0xff]  }
  0xd4   :  { %6837 = vmatpush3.bf16.msra.mxu1 %v7225_v14  ;;  %v7240_v25 = vld [vmem:[%s9356_s1 + $0x68] ss:$12 sps:$4 sm:$0xff]   ;;  %v7216_v26 = vld [vmem:[%s9356_s1 + $0xc4] ss:$12 sps:$4 sm:$0xff]   ;;  %v7218_v28 = vld [vmem:[%s9356_s1 + $0xc0] ss:$12 sps:$4 sm:$0xff]  }
  0xd5   :  { %1202 = vmatpush1.bf16.msra.mxu0 %v7200_v5  ;;  %6838 = vmatprep.subr.bf16.mxu1 %v7229_v17  ;;  %v7221_v29 = vld [vmem:[%s9356_s1 + $0xdc] ss:$12 sps:$4 sm:$0xff]   ;;  %v7245_v30 = vld [vmem:[%s9356_s1 + $0x80] ss:$12 sps:$4 sm:$0xff]   ;;  %v7249_v31 = vld [vmem:[%s9356_s1 + $0x158] ss:$12 sps:$4 sm:$0xff]  }
  0xd6   :  { %1203 = vmatprep.subr.bf16.mxu0 %v7201_v6  ;;  %v7223_v32 = vld [vmem:[%s9356_s1 + $0xd8] ss:$12 sps:$4 sm:$0xff]   ;;  %v7226_v33 = vld [vmem:[%s9356_s1 + $0xf4] ss:$12 sps:$4 sm:$0xff]   ;;  %v7254_v35 = vld [vmem:[%s9356_s1 + $0x170] ss:$12 sps:$4 sm:$0xff]  }
  0xd7   :  { %v7250_v34 = vld [vmem:[%s9356_s1 + $0x98] ss:$12 sps:$4 sm:$0xff]   ;;  %v7228_v36 = vld [vmem:[%s9356_s1 + $0xf0] ss:$12 sps:$4 sm:$0xff]   ;;  %v7262_v40 = vld [vmem:[%s9356_s1 + $0x248] ss:$12 sps:$4 sm:$0xff]  }
  0xd8   :  { %6839 = vmatpush3.bf16.msra.mxu1 %v7230_v18  ;;  %v7258_v37 = vld [vmem:[%s9355_s0 + $0x4] ss:$24 sps:$4 sm:$0xff]   ;;  %v7231_v38 = vld [vmem:[%s9356_s1 + $0x10c] ss:$12 sps:$4 sm:$0xff]   ;;  %v7233_v41 = vld [vmem:[%s9356_s1 + $0x108] ss:$12 sps:$4 sm:$0xff]  }
  0xd9   :  { %1204 = vmatpush1.bf16.msra.mxu0 %v7203_v7  ;;  %6840 = vmatprep.subr.bf16.mxu1 %v7234_v20  ;;  %v7255_v39 = vld [vmem:[%s9356_s1 + $0xb0] ss:$12 sps:$4 sm:$0xff]   ;;  %v7256_v43 = vld [vmem:[%s9355_s0] ss:$24 sps:$4 sm:$0xff]   ;;  %v7263_v44 = vld [vmem:[%s9356_s1 + $0x188] ss:$12 sps:$4 sm:$0xff]  }
  0xda   :  { %1205 = vmatprep.subr.bf16.mxu0 %v7204_v8  ;;  %1229 = vmatprep.mubr.bf16.mxu0 %v7258_v37  ;;  %v7236_v42 = vld [vmem:[%s9356_s1 + $0x124] ss:$12 sps:$4 sm:$0xff]   ;;  %v7267_v45 = vld [vmem:[%s9356_s1 + $0x260] ss:$12 sps:$4 sm:$0xff]   ;;  %v7241_v47 = vld [vmem:[%s9356_s1 + $0x13c] ss:$12 sps:$4 sm:$0xff]  }
  0xdb   :  { %1358 = vmatprep.mubr.bf16.mxu1 %v7258_v37  ;;  %v7238_v46 = vld [vmem:[%s9356_s1 + $0x120] ss:$12 sps:$4 sm:$0xff]   ;;  %v7272_v49 = vld [vmem:[%s9356_s1 + $0x278] ss:$12 sps:$4 sm:$0xff]   ;;  %v7277_v53 = vld [vmem:[%s9356_s1 + $0x290] ss:$12 sps:$4 sm:$0xff]  }
  0xdc   :  { %6841 = vmatpush3.bf16.msra.mxu1 %v7235_v21  ;;  %v7268_v48 = vld [vmem:[%s9356_s1 + $0x1a0] ss:$12 sps:$4 sm:$0xff]   ;;  %v7243_v50 = vld [vmem:[%s9356_s1 + $0x138] ss:$12 sps:$4 sm:$0xff]   ;;  %v7248_v54 = vld [vmem:[%s9356_s1 + $0x150] ss:$12 sps:$4 sm:$0xff]  }
  0xdd   :  { %1206 = vmatpush1.bf16.msra.mxu0 %v7206_v11  ;;  %6842 = vmatprep.subr.bf16.mxu1 %v7239_v24  ;;  %v7246_v51 = vld [vmem:[%s9356_s1 + $0x154] ss:$12 sps:$4 sm:$0xff]   ;;  %v7273_v52 = vld [vmem:[%s9356_s1 + $0x1b8] ss:$12 sps:$4 sm:$0xff]   ;;  %v7278_v55 = vld [vmem:[%s9356_s1 + $0x1d0] ss:$12 sps:$4 sm:$0xff]  }
  0xde   :  { %1207 = vmatprep.subr.bf16.mxu0 %v7207_v12  ;;  %v7251_v56 = vld [vmem:[%s9356_s1 + $0x16c] ss:$12 sps:$4 sm:$0xff]   ;;  %v7282_v57 = vld [vmem:[%s9356_s1 + $0x2a8] ss:$12 sps:$4 sm:$0xff]   ;;  %v7261_v59 = vld [vmem:[%s9356_s1 + $0x184] ss:$12 sps:$4 sm:$0xff]  }
  0xdf   :  { %v7253_v58 = vld [vmem:[%s9356_s1 + $0x168] ss:$12 sps:$4 sm:$0xff]   ;;  %v7287_v61 = vld [vmem:[%s9356_s1 + $0x2c0] ss:$12 sps:$4 sm:$0xff]   ;;  %v7292_v1 = vld [vmem:[%s9356_s1 + $0x2d8] ss:$12 sps:$4 sm:$0xff]  }
  0xe0   :  { %6843 = vmatpush3.bf16.msra.mxu1 %v7240_v25  ;;  %v7283_v60 = vld [vmem:[%s9356_s1 + $0x1e8] ss:$12 sps:$4 sm:$0xff]   ;;  %v7259_v62 = vld [vmem:[%s9356_s1 + $0x180] ss:$12 sps:$4 sm:$0xff]   ;;  %v7264_v2 = vld [vmem:[%s9356_s1 + $0x198] ss:$12 sps:$4 sm:$0xff]  }
  0xe1   :  { %1208 = vmatpush1.bf16.msra.mxu0 %v7209_v15  ;;  %6844 = vmatprep.subr.bf16.mxu1 %v7244_v27  ;;  %v7266_v63 = vld [vmem:[%s9356_s1 + $0x19c] ss:$12 sps:$4 sm:$0xff]   ;;  %v7288_v0 = vld [vmem:[%s9356_s1 + $0x200] ss:$12 sps:$4 sm:$0xff]   ;;  %v7293_v4 = vld [vmem:[%s9356_s1 + $0x218] ss:$12 sps:$4 sm:$0xff]  }
  0xe2   :  { %1209 = vmatprep.subr.bf16.mxu0 %v7210_v16  ;;  %v7271_v3 = vld [vmem:[%s9356_s1 + $0x1b4] ss:$12 sps:$4 sm:$0xff]   ;;  %v7304_v5 = vld [vmem:[%s9355_s0 + $0xc] ss:$24 sps:$4 sm:$0xff]   ;;  %v7297_v6 = vld [vmem:[%s9356_s1 + $0x2f0] ss:$12 sps:$4 sm:$0xff]  }
  0xe3   :  { %v7269_v7 = vld [vmem:[%s9356_s1 + $0x1b0] ss:$12 sps:$4 sm:$0xff]   ;;  %v7276_v8 = vld [vmem:[%s9356_s1 + $0x1cc] ss:$12 sps:$4 sm:$0xff]   ;;  %v7305_v10 = vld [vmem:[%s9356_s1 + $0x3c8] ss:$12 sps:$4 sm:$0xff]  }
  0xe4   :  { %6845 = vmatpush3.bf16.msra.mxu1 %v7245_v30  ;;  %v7298_v9 = vld [vmem:[%s9356_s1 + $0x230] ss:$12 sps:$4 sm:$0xff]   ;;  %v7274_v11 = vld [vmem:[%s9356_s1 + $0x1c8] ss:$12 sps:$4 sm:$0xff]   ;;  %v7310_v15 = vld [vmem:[%s9356_s1 + $0x3e0] ss:$12 sps:$4 sm:$0xff]  }
  0xe5   :  { %1210 = vmatpush1.bf16.msra.mxu0 %v7212_v19  ;;  %6846 = vmatprep.subr.bf16.mxu1 %v7249_v31  ;;  %v7281_v12 = vld [vmem:[%s9356_s1 + $0x1e4] ss:$12 sps:$4 sm:$0xff]   ;;  %v8866_v13 = vld [vmem:[%s9355_s0 + $0x8] ss:$24 sps:$4 sm:$0xff]   ;;  %v7296_v25 = vld [vmem:[%s9356_s1 + $0x22c] ss:$12 sps:$4 sm:$0xff]  }
  0xe6   :  { %1211 = vmatprep.subr.bf16.mxu0 %v7213_v22  ;;  %v7306_v14 = vld [vmem:[%s9356_s1 + $0x308] ss:$12 sps:$4 sm:$0xff]   ;;  %v7279_v16 = vld [vmem:[%s9356_s1 + $0x1e0] ss:$12 sps:$4 sm:$0xff]   ;;  %v7315_v19 = vld [vmem:[%s9356_s1 + $0x3f8] ss:$12 sps:$4 sm:$0xff]  }
  0xe7   :  { %v7286_v17 = vld [vmem:[%s9356_s1 + $0x1fc] ss:$12 sps:$4 sm:$0xff]   ;;  %v7311_v18 = vld [vmem:[%s9356_s1 + $0x320] ss:$12 sps:$4 sm:$0xff]   ;;  %v7284_v20 = vld [vmem:[%s9356_s1 + $0x1f8] ss:$12 sps:$4 sm:$0xff]  }
  0xe8   :  { %6847 = vmatpush3.bf16.msra.mxu1 %v7250_v34  ;;  %v7316_v21 = vld [vmem:[%s9356_s1 + $0x338] ss:$12 sps:$4 sm:$0xff]   ;;  %v7291_v22 = vld [vmem:[%s9356_s1 + $0x214] ss:$12 sps:$4 sm:$0xff]   ;;  %v7289_v24 = vld [vmem:[%s9356_s1 + $0x210] ss:$12 sps:$4 sm:$0xff]  }
  0xe9   :  { %1212 = vmatpush1.bf16.msra.mxu0 %v7215_v23  ;;  %6848 = vmatprep.subr.bf16.mxu1 %v7254_v35  ;;  %v7320_v23 = vld [vmem:[%s9356_s1 + $0x410] ss:$12 sps:$4 sm:$0xff]   ;;  %v7325_v27 = vld [vmem:[%s9356_s1 + $0x428] ss:$12 sps:$4 sm:$0xff]   ;;  %v7330_v31 = vld [vmem:[%s9356_s1 + $0x440] ss:$12 sps:$4 sm:$0xff]  }
  0xea   :  { %1213 = vmatprep.subr.bf16.mxu0 %v7216_v26  ;;  %v7321_v26 = vld [vmem:[%s9356_s1 + $0x350] ss:$12 sps:$4 sm:$0xff]   ;;  %v7326_v30 = vld [vmem:[%s9356_s1 + $0x368] ss:$12 sps:$4 sm:$0xff]   ;;  %v7331_v34 = vld [vmem:[%s9356_s1 + $0x380] ss:$12 sps:$4 sm:$0xff]  }
  0xeb   :  { %v7347_v35 = vld [vmem:[%s9355_s0 + $0x14] ss:$24 sps:$4 sm:$0xff]   ;;  %v7307_v37 = vld [vmem:[%s9356_s1 + $0x258] ss:$12 sps:$4 sm:$0xff]   ;;  %vm8412_vm0 = vmmov 0   ;;  %vm4351_vm1 = vcmask 1043456  }
  0xec   :  { %6849 = vmatpush3.bf16.msra.mxu1 %v7255_v39  ;;  %v7336_v39 = vld [vmem:[%s9356_s1 + $0x398] ss:$12 sps:$4 sm:$0xff]   ;;  %vm4251_vm2 = vcmask 64512   ;;  %vm5679_vm3 = vcmask 1041409  }
  0xed   :  { %1214 = vmatpush1.bf16.msra.mxu0 %v7218_v28  ;;  %6856 = vmatprep.subr.bf16.mxu1 %v7262_v40  ;;  %v7294_v28 = vld [vmem:[%s9356_s1 + $0x228] ss:$12 sps:$4 sm:$0xff]   ;;  %v7340_v40 = vld [vmem:[%s9356_s1 + $0x470] ss:$12 sps:$4 sm:$0xff]  }
  0xee   :  { %1215 = vmatprep.subr.bf16.mxu0 %v7221_v29  ;;  %v7301_v29 = vld [vmem:[%s9356_s1 + $0x244] ss:$12 sps:$4 sm:$0xff]  }
  0xef   :  { %1359 = vmatmul.mubr.bf16.vlgmr.msra.gmra.mrb[0].mxu1 %v7256_v43 }
  0xf0   :  { %6857 = vmatpush3.bf16.msra.mxu1 %v7263_v44  ;;  %1399 = vmatprep.mubr.bf16.mxu1 %v7304_v5  ;;  %v8962_v44 = vld [vmem:[%s9355_s0 + $0x10] ss:$24 sps:$4 sm:$0xff]  }
  0xf1   :  { %1216 = vmatpush1.bf16.msra.mxu0 %v7223_v32  ;;  %6858 = vmatprep.subr.bf16.mxu1 %v7267_v45  ;;  %v7299_v32 = vld [vmem:[%s9356_s1 + $0x240] ss:$12 sps:$4 sm:$0xff]   ;;  %v7317_v45 = vld [vmem:[%s9356_s1 + $0x288] ss:$12 sps:$4 sm:$0xff]  }
  0xf2   :  { %1217 = vmatprep.subr.bf16.mxu0 %v7226_v33  ;;  %v7309_v33 = vld [vmem:[%s9356_s1 + $0x25c] ss:$12 sps:$4 sm:$0xff]  }
  0xf4   :  { %6859 = vmatpush3.bf16.msra.mxu1 %v7268_v48  ;;  %v7329_v48 = vld [vmem:[%s9356_s1 + $0x2bc] ss:$12 sps:$4 sm:$0xff]  }
  0xf5   :  { %1218 = vmatpush1.bf16.msra.mxu0 %v7228_v36  ;;  %6860 = vmatprep.subr.bf16.mxu1 %v7272_v49  ;;  %v7335_v36 = vld [vmem:[%s9356_s1 + $0x458] ss:$12 sps:$4 sm:$0xff]  }
  0xf6   :  { %1219 = vmatprep.subr.bf16.mxu0 %v7231_v38  ;;  %v7314_v38 = vld [vmem:[%s9356_s1 + $0x274] ss:$12 sps:$4 sm:$0xff]   ;;  %v7327_v49 = vld [vmem:[%s9356_s1 + $0x2b8] ss:$12 sps:$4 sm:$0xff]  }
  0xf8   :  { %6861 = vmatpush3.bf16.msra.mxu1 %v7273_v52  ;;  %v7339_v52 = vld [vmem:[%s9356_s1 + $0x2ec] ss:$12 sps:$4 sm:$0xff]  }
  0xf9   :  { %1220 = vmatpush1.bf16.msra.mxu0 %v7233_v41  ;;  %6862 = vmatprep.subr.bf16.mxu1 %v7277_v53  ;;  %v7312_v41 = vld [vmem:[%s9356_s1 + $0x270] ss:$12 sps:$4 sm:$0xff]   ;;  %v7337_v53 = vld [vmem:[%s9356_s1 + $0x2e8] ss:$12 sps:$4 sm:$0xff]  }
  0xfa   :  { %1221 = vmatprep.subr.bf16.mxu0 %v7236_v42  ;;  %v7341_v42 = vld [vmem:[%s9356_s1 + $0x3b0] ss:$12 sps:$4 sm:$0xff]  }
  0xfc   :  { %6863 = vmatpush3.bf16.msra.mxu1 %v7278_v55  ;;  %v7342_v55 = vld [vmem:[%s9356_s1 + $0x300] ss:$12 sps:$4 sm:$0xff]  }
  0xfd   :  { %1222 = vmatpush1.bf16.msra.mxu0 %v7238_v46  ;;  %6864 = vmatprep.subr.bf16.mxu1 %v7282_v57  ;;  %v7324_v46 = vld [vmem:[%s9356_s1 + $0x2a4] ss:$12 sps:$4 sm:$0xff]  }
  0xfe   :  { %1223 = vmatprep.subr.bf16.mxu0 %v7241_v47  ;;  %v7322_v47 = vld [vmem:[%s9356_s1 + $0x2a0] ss:$12 sps:$4 sm:$0xff]   ;;  %v7348_v57 = vld [vmem:[%s9356_s1 + $0x318] ss:$12 sps:$4 sm:$0xff]  }
 0x100   :  { %6865 = vmatpush3.bf16.msra.mxu1 %v7283_v60  ;;  %v7356_v60 = vld [vmem:[%s9356_s1 + $0x34c] ss:$12 sps:$4 sm:$0xff]  }
 0x101   :  { %1224 = vmatpush1.bf16.msra.mxu0 %v7243_v50  ;;  %6866 = vmatprep.subr.bf16.mxu1 %v7287_v61  ;;  %v7334_v50 = vld [vmem:[%s9356_s1 + $0x2d4] ss:$12 sps:$4 sm:$0xff]  }
 0x102   :  { %1225 = vmatprep.subr.bf16.mxu0 %v7246_v51  ;;  %v7332_v51 = vld [vmem:[%s9356_s1 + $0x2d0] ss:$12 sps:$4 sm:$0xff]   ;;  %v7354_v61 = vld [vmem:[%s9356_s1 + $0x348] ss:$12 sps:$4 sm:$0xff]  }
 0x104   :  { %6867 = vmatpush3.bf16.msra.mxu1 %v7288_v0  ;;  %v7362_v0 = vld [vmem:[%s9356_s1 + $0x37c] ss:$12 sps:$4 sm:$0xff]  }
 0x105   :  { %1226 = vmatpush1.bf16.msra.mxu0 %v7248_v54  ;;  %6868 = vmatprep.subr.bf16.mxu1 %v7292_v1  ;;  %v7344_v54 = vld [vmem:[%s9356_s1 + $0x304] ss:$12 sps:$4 sm:$0xff]  }
 0x106   :  { %1227 = vmatprep.subr.bf16.mxu0 %v7251_v56  ;;  %v7350_v56 = vld [vmem:[%s9356_s1 + $0x31c] ss:$12 sps:$4 sm:$0xff]   ;;  %v7360_v1 = vld [vmem:[%s9356_s1 + $0x378] ss:$12 sps:$4 sm:$0xff]  }
 0x108   :  { %6869 = vmatpush3.bf16.msra.mxu1 %v7293_v4  ;;  %v7368_v4 = vld [vmem:[%s9356_s1 + $0x3ac] ss:$12 sps:$4 sm:$0xff]  }
 0x109   :  { %1228 = vmatpush1.bf16.msra.mxu0 %v7253_v58  ;;  %6870 = vmatprep.subr.bf16.mxu1 %v7297_v6  ;;  %v7353_v58 = vld [vmem:[%s9356_s1 + $0x334] ss:$12 sps:$4 sm:$0xff]   ;;  %v7371_v6 = vld [vmem:[%s9356_s1 + $0x3c4] ss:$12 sps:$4 sm:$0xff]  }
 0x10a   :  { %1240 = vmatprep.subr.bf16.mxu0 %v7261_v59  ;;  %v7351_v59 = vld [vmem:[%s9356_s1 + $0x330] ss:$12 sps:$4 sm:$0xff]  }
 0x10c   :  { %1230 = vmatmul.mubr.bf16.vlgmr.msra.gmra.mrb[0].mxu0 %v7256_v43  ;;  %6871 = vmatpush3.bf16.msra.mxu1 %v7298_v9  ;;  %v7319_v43 = vld [vmem:[%s9356_s1 + $0x28c] ss:$12 sps:$4 sm:$0xff]  }
 0x10d   :  { %1241 = vmatpush1.bf16.msra.mxu0 %v7259_v62  ;;  %1272 = vmatprep.mubr.bf16.mxu0 %v7304_v5  ;;  %v7359_v62 = vld [vmem:[%s9356_s1 + $0x364] ss:$12 sps:$4 sm:$0xff]   ;;  %v7366_v5 = vld [vmem:[%s9356_s1 + $0x3a8] ss:$12 sps:$4 sm:$0xff]  }
 0x10e   :  { %1242 = vmatprep.subr.bf16.mxu0 %v7266_v63  ;;  %6878 = vmatprep.subr.bf16.mxu1 %v7305_v10  ;;  %v7357_v63 = vld [vmem:[%s9356_s1 + $0x360] ss:$12 sps:$4 sm:$0xff]   ;;  %v7372_v9 = vld [vmem:[%s9356_s1 + $0x3d8] ss:$12 sps:$4 sm:$0xff]  }
 0x10f   :  { %1400 = vmatmul.mubr.bf16.vlgmr.msra.gmra.mrb[4].mxu1 %v8866_v13  ;;  %v7377_v10 = vld [vmem:[%s9356_s1 + $0x3f4] ss:$12 sps:$4 sm:$0xff]  }
 0x110   :  { %6879 = vmatpush3.bf16.msra.mxu1 %v7306_v14  ;;  %1440 = vmatprep.mubr.bf16.mxu1 %v7347_v35  ;;  %v7383_v14 = vld [vmem:[%s9356_s1 + $0x424] ss:$12 sps:$4 sm:$0xff]  }
 0x111   :  { %1243 = vmatpush1.bf16.msra.mxu0 %v7264_v2  ;;  %6880 = vmatprep.subr.bf16.mxu1 %v7310_v15  ;;  %v7365_v2 = vld [vmem:[%s9356_s1 + $0x394] ss:$12 sps:$4 sm:$0xff]  }
 0x112   :  { %1244 = vmatprep.subr.bf16.mxu0 %v7271_v3  ;;  %v7363_v3 = vld [vmem:[%s9356_s1 + $0x390] ss:$12 sps:$4 sm:$0xff]   ;;  %v7381_v15 = vld [vmem:[%s9356_s1 + $0x420] ss:$12 sps:$4 sm:$0xff]  }
 0x114   :  { %6881 = vmatpush3.bf16.msra.mxu1 %v7311_v18  ;;  %v7389_v18 = vld [vmem:[%s9356_s1 + $0x454] ss:$12 sps:$4 sm:$0xff]  }
 0x115   :  { %1245 = vmatpush1.bf16.msra.mxu0 %v7269_v7  ;;  %6882 = vmatprep.subr.bf16.mxu1 %v7315_v19  ;;  %v7369_v7 = vld [vmem:[%s9356_s1 + $0x3c0] ss:$12 sps:$4 sm:$0xff]   ;;  %v7387_v19 = vld [vmem:[%s9356_s1 + $0x450] ss:$12 sps:$4 sm:$0xff]  }
 0x116   :  { %1246 = vmatprep.subr.bf16.mxu0 %v7276_v8  ;;  %v7374_v8 = vld [vmem:[%s9356_s1 + $0x3dc] ss:$12 sps:$4 sm:$0xff]  }
 0x118   :  { %6883 = vmatpush3.bf16.msra.mxu1 %v7316_v21  ;;  %v7390_v21 = vld [vmem:[%s9356_s1 + $0x468] ss:$12 sps:$4 sm:$0xff]  }
 0x119   :  { %1247 = vmatpush1.bf16.msra.mxu0 %v7274_v11  ;;  %6884 = vmatprep.subr.bf16.mxu1 %v7320_v23  ;;  %v7375_v11 = vld [vmem:[%s9356_s1 + $0x3f0] ss:$12 sps:$4 sm:$0xff]  }
 0x11a   :  { %1248 = vmatprep.subr.bf16.mxu0 %v7281_v12  ;;  %v7380_v12 = vld [vmem:[%s9356_s1 + $0x40c] ss:$12 sps:$4 sm:$0xff]  }
 0x11c   :  { %6885 = vmatpush3.bf16.msra.mxu1 %v7321_v26 }
 0x11d   :  { %1249 = vmatpush1.bf16.msra.mxu0 %v7279_v16  ;;  %6886 = vmatprep.subr.bf16.mxu1 %v7325_v27  ;;  %v7386_v16 = vld [vmem:[%s9356_s1 + $0x43c] ss:$12 sps:$4 sm:$0xff]  }
 0x11e   :  { %1250 = vmatprep.subr.bf16.mxu0 %v7286_v17  ;;  %v7384_v17 = vld [vmem:[%s9356_s1 + $0x438] ss:$12 sps:$4 sm:$0xff]  }
 0x120   :  { %6887 = vmatpush3.bf16.msra.mxu1 %v7326_v30 }
 0x121   :  { %1251 = vmatpush1.bf16.msra.mxu0 %v7284_v20  ;;  %6888 = vmatprep.subr.bf16.mxu1 %v7330_v31  ;;  %v7392_v20 = vld [vmem:[%s9356_s1 + $0x46c] ss:$12 sps:$4 sm:$0xff]   ;;  %v382_v31 = vld [vmem:[#allocation2] sm:$0x7] }
 0x122   :  { %1252 = vmatprep.subr.bf16.mxu0 %v7291_v22 }
 0x124   :  { %6889 = vmatpush3.bf16.msra.mxu1 %v7331_v34 }
 0x125   :  { %1253 = vmatpush1.bf16.msra.mxu0 %v7289_v24  ;;  %6890 = vmatprep.subr.bf16.mxu1 %v7335_v36 }
 0x126   :  { %1254 = vmatprep.subr.bf16.mxu0 %v7296_v25 }
 0x128   :  { %6891 = vmatpush3.bf16.msra.mxu1 %v7336_v39 }
 0x129   :  { %1255 = vmatpush1.bf16.msra.mxu0 %v7294_v28  ;;  %6892 = vmatprep.subr.bf16.mxu1 %v7340_v40  ;;  %v384_v28 = vlaneseq }
 0x12a   :  { %1256 = vmatprep.subr.bf16.mxu0 %v7301_v29 }
 0x12b   :  { %v9090_v29 = vshrl.u32 %v384_v28, 7 }
 0x12c   :  { %6893 = vmatpush3.bf16.msra.mxu1 %v7341_v42 }
 0x12d   :  { %1257 = vmatpush1.bf16.msra.mxu0 %v7299_v32  ;;  %v9093_v30 = vsub.s32 2, %v9090_v29 }
 0x12e   :  { %1258 = vmatprep.subr.bf16.mxu0 %v7309_v33 }
 0x12f   :  { %1441 = vmatmul.mubr.bf16.vlgmr.msra.gmra.mrb[8].mxu1 %v8962_v44  ;;  %v395_v32 = vrot.slane %v382_v31, %v9093_v30 }
 0x131   :  { %1259 = vmatpush1.bf16.msra.mxu0 %v7307_v37 }
 0x132   :  { %1260 = vmatprep.subr.bf16.mxu0 %v7314_v38 }
 0x135   :  { %1261 = vmatpush1.bf16.msra.mxu0 %v7312_v41 }
 0x136   :  { %1262 = vmatprep.subr.bf16.mxu0 %v7319_v43 }
 0x139   :  { %1263 = vmatpush1.bf16.msra.mxu0 %v7317_v45 }
 0x13a   :  { %1264 = vmatprep.subr.bf16.mxu0 %v7324_v46 }
 0x13d   :  { %1265 = vmatpush1.bf16.msra.mxu0 %v7322_v47 }
 0x13e   :  { %1266 = vmatprep.subr.bf16.mxu0 %v7329_v48 }
 0x141   :  { %1267 = vmatpush1.bf16.msra.mxu0 %v7327_v49 }
 0x142   :  { %1268 = vmatprep.subr.bf16.mxu0 %v7334_v50 }
 0x145   :  { %1269 = vmatpush1.bf16.msra.mxu0 %v7332_v51  ;;  %v9101_v51 = vsub.s32 0, %v9090_v29 }
 0x146   :  { %1270 = vmatprep.subr.bf16.mxu0 %v7339_v52  ;;  %v9104_v52 = vsub.s32 1, %v9090_v29 }
 0x149   :  { %1271 = vmatpush1.bf16.msra.mxu0 %v7337_v53  ;;  %v387_v53 = vrot.slane %v382_v31, %v9101_v51 }
 0x14a   :  { %1283 = vmatprep.subr.bf16.mxu0 %v7344_v54  ;;  %v391_v54 = vrot.slane %v382_v31, %v9104_v52 }
 0x14c   :  { %1273 = vmatmul.mubr.bf16.vlgmr.msra.gmra.mrb[0].mxu0 %v8866_v13  ;;  %v7378_v13 = vld [vmem:[%s9356_s1 + $0x408] ss:$12 sps:$4 sm:$0xff]   ;;  %s8413_s1 = smov [#allocation20]  }
 0x14d   :  { %1284 = vmatpush1.bf16.msra.mxu0 %v7342_v55  ;;  %1315 = vmatprep.mubr.bf16.mxu0 %v7347_v35  ;;  %s6196_s3 = sshll.u32 %s8413_s1, 4  ;;  %s6197_s3 = int_to_ptr.vmem [resolvable:$true] %s6196_s3 }
 0x14e   :  { %1285 = vmatprep.subr.bf16.mxu0 %v7350_v56  ;;  %s8331_s10 = scalar_lea.vmem %s6197_s3, 256  ;;  %p8336_p5 = scmp.lt.s32.totalorder %s6197_s3, %s6197_s3 }
 0x14f   :  { %p8332_p4 = scmp.ne.s32.totalorder %s6197_s3, %s8331_s10  ;;  %p8337_p6 = scmp.lt.s32.totalorder %s8331_s10, %s8331_s10 }
 0x151   :  { %1286 = vmatpush1.bf16.msra.mxu0 %v7348_v57  ;;  %p8338_p7 = por %p8337_p6, %p8336_p5 }
 0x152   :  { %1287 = vmatprep.subr.bf16.mxu0 %v7353_v58 }
 0x153   :  { %p8339_p8 = pnand %p8338_p7, %p8332_p4 }
 0x155   :  { %1288 = vmatpush1.bf16.msra.mxu0 %v7351_v59 }
 0x156   :  { %1289 = vmatprep.subr.bf16.mxu0 %v7356_v60 }
 0x159   :  { %1290 = vmatpush1.bf16.msra.mxu0 %v7354_v61 }
 0x15a   :  { %1291 = vmatprep.subr.bf16.mxu0 %v7359_v62 }
 0x15d   :  { %1292 = vmatpush1.bf16.msra.mxu0 %v7357_v63 }
 0x15e   :  { %1293 = vmatprep.subr.bf16.mxu0 %v7362_v0 }
 0x161   :  { %1294 = vmatpush1.bf16.msra.mxu0 %v7360_v1 }
 0x162   :  { %1295 = vmatprep.subr.bf16.mxu0 %v7365_v2 }
 0x165   :  { %1296 = vmatpush1.bf16.msra.mxu0 %v7363_v3  ;;  %v7393_v3 = vld [vmem:[#allocation8] ss:$48 sps:$4 sm:$0xff]  }
 0x166   :  { %1297 = vmatprep.subr.bf16.mxu0 %v7368_v4  ;;  %v7395_v4 = vld [vmem:[#allocation8 + $0x4] ss:$48 sps:$4 sm:$0xff]  }
 0x167   :  { %3363 = vmatprep.subr.bf16.mxu1 %v7395_v4  ;;  %v7458_v4 = vld [vmem:[#allocation8 + $0x3cc] ss:$48 sps:$4 sm:$0xff]  }
 0x168   :  { %3364 = vmatpush1.bf16.msra.mxu1 %v7393_v3  ;;  %v7455_v3 = vld [vmem:[#allocation8 + $0x3c4] ss:$48 sps:$4 sm:$0xff]  }
 0x169   :  { %1298 = vmatpush1.bf16.msra.mxu0 %v7366_v5  ;;  %v7396_v5 = vld [vmem:[#allocation8 + $0x8] ss:$48 sps:$4 sm:$0xff]  }
 0x16a   :  { %1299 = vmatprep.subr.bf16.mxu0 %v7371_v6  ;;  %v7398_v6 = vld [vmem:[#allocation8 + $0xc] ss:$48 sps:$4 sm:$0xff]  }
 0x16d   :  { %1300 = vmatpush1.bf16.msra.mxu0 %v7369_v7  ;;  %v7401_v7 = vld [vmem:[#allocation8 + $0x64] ss:$48 sps:$4 sm:$0xff]  }
 0x16e   :  { %1301 = vmatprep.subr.bf16.mxu0 %v7374_v8  ;;  %v7404_v8 = vld [vmem:[#allocation8 + $0x6c] ss:$48 sps:$4 sm:$0xff]   ;;  %3365 = vmatprep.subr.bf16.mxu1 %v7401_v7  ;;  %v7461_v7 = vld [vmem:[#allocation8 + $0x424] ss:$48 sps:$4 sm:$0xff]  }
 0x171   :  { %1302 = vmatpush1.bf16.msra.mxu0 %v7372_v9  ;;  %v7399_v9 = vld [vmem:[#allocation8 + $0x60] ss:$48 sps:$4 sm:$0xff]  }
 0x172   :  { %1303 = vmatprep.subr.bf16.mxu0 %v7377_v10  ;;  %v7402_v10 = vld [vmem:[#allocation8 + $0x68] ss:$48 sps:$4 sm:$0xff]   ;;  %3366 = vmatpush1.bf16.msra.mxu1 %v7399_v9  ;;  %v7459_v9 = vld [vmem:[#allocation8 + $0x420] ss:$48 sps:$4 sm:$0xff]  }
 0x175   :  { %1304 = vmatpush1.bf16.msra.mxu0 %v7375_v11  ;;  %v7407_v11 = vld [vmem:[#allocation8 + $0xc4] ss:$48 sps:$4 sm:$0xff]  }
 0x176   :  { %1305 = vmatprep.subr.bf16.mxu0 %v7380_v12  ;;  %v7410_v12 = vld [vmem:[#allocation8 + $0xcc] ss:$48 sps:$4 sm:$0xff]   ;;  %3367 = vmatprep.subr.bf16.mxu1 %v7407_v11  ;;  %v7467_v11 = vld [vmem:[#allocation8 + $0x484] ss:$48 sps:$4 sm:$0xff]  }
 0x179   :  { %1306 = vmatpush1.bf16.msra.mxu0 %v7378_v13  ;;  %v7405_v13 = vld [vmem:[#allocation8 + $0xc0] ss:$48 sps:$4 sm:$0xff]  }
 0x17a   :  { %1307 = vmatprep.subr.bf16.mxu0 %v7383_v14  ;;  %v7408_v14 = vld [vmem:[#allocation8 + $0xc8] ss:$48 sps:$4 sm:$0xff]   ;;  %3368 = vmatpush1.bf16.msra.mxu1 %v7405_v13  ;;  %v7465_v13 = vld [vmem:[#allocation8 + $0x480] ss:$48 sps:$4 sm:$0xff]  }
 0x17d   :  { %1308 = vmatpush1.bf16.msra.mxu0 %v7381_v15  ;;  %v7413_v15 = vld [vmem:[#allocation8 + $0x124] ss:$48 sps:$4 sm:$0xff]  }
 0x17e   :  { %1309 = vmatprep.subr.bf16.mxu0 %v7386_v16  ;;  %v7416_v16 = vld [vmem:[#allocation8 + $0x12c] ss:$48 sps:$4 sm:$0xff]   ;;  %3369 = vmatprep.subr.bf16.mxu1 %v7413_v15  ;;  %v7473_v15 = vld [vmem:[#allocation8 + $0x4e4] ss:$48 sps:$4 sm:$0xff]  }
 0x181   :  { %1310 = vmatpush1.bf16.msra.mxu0 %v7384_v17  ;;  %v7411_v17 = vld [vmem:[#allocation8 + $0x120] ss:$48 sps:$4 sm:$0xff]  }
 0x182   :  { %1311 = vmatprep.subr.bf16.mxu0 %v7389_v18  ;;  %v7414_v18 = vld [vmem:[#allocation8 + $0x128] ss:$48 sps:$4 sm:$0xff]   ;;  %3370 = vmatpush1.bf16.msra.mxu1 %v7411_v17  ;;  %v7471_v17 = vld [vmem:[#allocation8 + $0x4e0] ss:$48 sps:$4 sm:$0xff]  }
 0x185   :  { %1312 = vmatpush1.bf16.msra.mxu0 %v7387_v19  ;;  %v7419_v19 = vld [vmem:[#allocation8 + $0x184] ss:$48 sps:$4 sm:$0xff]  }
 0x186   :  { %1313 = vmatprep.subr.bf16.mxu0 %v7392_v20  ;;  %v7422_v20 = vld [vmem:[#allocation8 + $0x18c] ss:$48 sps:$4 sm:$0xff]   ;;  %3371 = vmatprep.subr.bf16.mxu1 %v7419_v19  ;;  %v7479_v19 = vld [vmem:[#allocation8 + $0x544] ss:$48 sps:$4 sm:$0xff]  }
 0x189   :  { %1314 = vmatpush1.bf16.msra.mxu0 %v7390_v21  ;;  %v7417_v21 = vld [vmem:[#allocation8 + $0x180] ss:$48 sps:$4 sm:$0xff]  }
 0x18a   :  { %3449 = vmatprep.subr.bf16.mxu0 %v7398_v6  ;;  %3372 = vmatpush1.bf16.msra.mxu1 %v7417_v21  ;;  %v7456_v6 = vld [vmem:[#allocation8 + $0x3c8] ss:$48 sps:$4 sm:$0xff]   ;;  %v7477_v21 = vld [vmem:[#allocation8 + $0x540] ss:$48 sps:$4 sm:$0xff]  }
 0x18c   :  { %1316 = vmatmul.mubr.bf16.vlgmr.msra.gmra.mrb[0].mxu0 %v8962_v44 }
 0x18d   :  { %3450 = vmatpush1.bf16.msra.mxu0 %v7396_v5  ;;  %v7453_v5 = vld [vmem:[#allocation8 + $0x3c0] ss:$48 sps:$4 sm:$0xff]  }
 0x18e   :  { %3451 = vmatprep.subr.bf16.mxu0 %v7404_v8  ;;  %v7464_v8 = vld [vmem:[#allocation8 + $0x42c] ss:$48 sps:$4 sm:$0xff]  }
 0x191   :  { %3452 = vmatpush1.bf16.msra.mxu0 %v7402_v10  ;;  %v7462_v10 = vld [vmem:[#allocation8 + $0x428] ss:$48 sps:$4 sm:$0xff]  }
 0x192   :  { %3453 = vmatprep.subr.bf16.mxu0 %v7410_v12  ;;  %v7470_v12 = vld [vmem:[#allocation8 + $0x48c] ss:$48 sps:$4 sm:$0xff]  }
 0x195   :  { %3454 = vmatpush1.bf16.msra.mxu0 %v7408_v14  ;;  %v7468_v14 = vld [vmem:[#allocation8 + $0x488] ss:$48 sps:$4 sm:$0xff]  }
 0x196   :  { %3455 = vmatprep.subr.bf16.mxu0 %v7416_v16  ;;  %v7476_v16 = vld [vmem:[#allocation8 + $0x4ec] ss:$48 sps:$4 sm:$0xff]  }
 0x199   :  { %3456 = vmatpush1.bf16.msra.mxu0 %v7414_v18  ;;  %v7474_v18 = vld [vmem:[#allocation8 + $0x4e8] ss:$48 sps:$4 sm:$0xff]  }
 0x19a   :  { %3457 = vmatprep.subr.bf16.mxu0 %v7422_v20  ;;  %v7482_v20 = vld [vmem:[#allocation8 + $0x54c] ss:$48 sps:$4 sm:$0xff]  }
 0x1c2   :  { %v6850_v22 = vpop.f32.mrb[0].mxu1 }
 0x1c3   :  { %v6851_v23 = vpop.f32.mrb[1].mxu1 }
 0x1c4   :  { %v6852_v24 = vadd.f32 %v6851_v23, %v6850_v22  ;;  %v6853_v25 = vpop.f32.mrb[2].mxu1  ;;  %v7420_v22 = vld [vmem:[#allocation8 + $0x188] ss:$48 sps:$4 sm:$0xff]  }
 0x1c5   :  { %v6854_v26 = vpop.f32.mrb[3].mxu1  ;;  %3458 = vmatpush1.bf16.msra.mxu0 %v7420_v22  ;;  %v7480_v22 = vld [vmem:[#allocation8 + $0x548] ss:$48 sps:$4 sm:$0xff]  }
 0x1c6   :  { %v6855_v27 = vadd.f32 %v6854_v26, %v6853_v25  ;;  %v1361_v33 = vadd.f32 %v6852_v24, %v395_v32 }
 0x1c8   :  { %v1364_v36 = vadd.f32 %v6855_v27, %v395_v32 }
 0x1e2   :  { %v6872_v34 = vpop.f32.mrb[4].mxu1 }
 0x1e3   :  { %v6873_v35 = vpop.f32.mrb[5].mxu1 }
 0x1e4   :  { %v6874_v37 = vadd.f32 %v6873_v35, %v6872_v34  ;;  %v6875_v38 = vpop.f32.mrb[6].mxu1 }
 0x1e5   :  { %v6876_v39 = vpop.f32.mrb[7].mxu1 }
 0x1e6   :  { %v1402_v40 = vadd.f32 %v6874_v37, %v1361_v33  ;;  %v6877_v41 = vadd.f32 %v6876_v39, %v6875_v38 }
 0x1e8   :  { %v1405_v42 = vadd.f32 %v6877_v41, %v1364_v36 }
 0x202   :  { %v6894_v43 = vpop.f32.mrb[8].mxu1 }
 0x203   :  { %v6895_v44 = vpop.f32.mrb[9].mxu1 }
 0x204   :  { %v6896_v45 = vadd.f32 %v6895_v44, %v6894_v43  ;;  %v6897_v46 = vpop.f32.mrb[10].mxu1 }
 0x205   :  { %v6898_v47 = vpop.f32.mrb[11].mxu1 }
 0x206   :  { %v6899_v48 = vadd.f32 %v6898_v47, %v6897_v46  ;;  %v9096_v49 = vadd.f32 %v6896_v45, %v1402_v40  ;;  %v7425_v45 = vld [vmem:[#allocation8 + $0x1e4] ss:$48 sps:$4 sm:$0xff]   ;;  %v7428_v46 = vld [vmem:[#allocation8 + $0x1ec] ss:$48 sps:$4 sm:$0xff]   ;;  %v7423_v47 = vld [vmem:[#allocation8 + $0x1e0] ss:$48 sps:$4 sm:$0xff]  }
 0x207   :  { %3373 = vmatprep.subr.bf16.mxu1 %v7425_v45  ;;  %3459 = vmatprep.subr.bf16.mxu0 %v7428_v46 }
 0x208   :  { %v9098_v50 = vadd.f32 %v6899_v48, %v1405_v42  ;;  %v7426_v48 = vld [vmem:[#allocation8 + $0x1e8] ss:$48 sps:$4 sm:$0xff]   ;;  %3374 = vmatpush1.bf16.msra.mxu1 %v7423_v47 }
 0x209   :  { %3460 = vmatpush1.bf16.msra.mxu0 %v7426_v48 }
 0x25f   :  { %v1317_v55 = vpop.f32.mrb[0].mxu0 }
 0x260   :  { %v7094_v56 = vadd.f32 %v1317_v55, %v387_v53  ;;  %v1319_v57 = vpop.f32.mrb[1].mxu0  ;;  %v7437_v55 = vld [vmem:[#allocation8 + $0x2a4] ss:$48 sps:$4 sm:$0xff]  }
 0x261   :  { %v7095_v58 = vadd.f32 %v1319_v57, %v391_v54  ;;  %v1321_v59 = vpop.f32.mrb[2].mxu0  ;;  %v7435_v57 = vld [vmem:[#allocation8 + $0x2a0] ss:$48 sps:$4 sm:$0xff]  }
 0x262   :  { %v7096_v60 = vadd.f32 %v1321_v59, %v387_v53  ;;  %v1323_v61 = vpop.f32.mrb[3].mxu0  ;;  %v7429_v53 = vld [vmem:[#allocation8 + $0x240] ss:$48 sps:$4 sm:$0xff]   ;;  %v7443_v59 = vld [vmem:[#allocation8 + $0x304] ss:$48 sps:$4 sm:$0xff]  }
 0x263   :  { %v7097_v62 = vadd.f32 %v1323_v61, %v391_v54  ;;  %v1449_v63 = vadd.f32 %v7095_v58, %v7094_v56  ;;  %v7432_v54 = vld [vmem:[#allocation8 + $0x248] ss:$48 sps:$4 sm:$0xff]   ;;  %v7441_v61 = vld [vmem:[#allocation8 + $0x300] ss:$48 sps:$4 sm:$0xff]  }
 0x265   :  { %v1453_v0 = vadd.f32 %v7097_v62, %v7096_v60  ;;  %v1450_v1 = vadd.f32 %v1449_v63, %v9096_v49  ;;  %v7449_v63 = vld [vmem:[#allocation8 + $0x364] ss:$48 sps:$4 sm:$0xff]  }
 0x267   :  { %1451 = vadd.xlane.f32.xlu0 %v1450_v1  ;;  %v1454_v2 = vadd.f32 %v1453_v0, %v9098_v50  ;;  %v7452_v0 = vld [vmem:[#allocation8 + $0x36c] ss:$48 sps:$4 sm:$0xff]   ;;  %v7447_v1 = vld [vmem:[#allocation8 + $0x360] ss:$48 sps:$4 sm:$0xff]  }
 0x26b   :  { %1455 = vadd.xlane.f32.xlu0 %v1454_v2  ;;  %v7450_v2 = vld [vmem:[#allocation8 + $0x368] ss:$48 sps:$4 sm:$0xff]  }
 0x2f4   :  { %v1452_v23 = vpop.xlane.xlu0 %1451 }
 0x2f5   :  { %v1458_v24 = vmul.f32 0.0026041667, %v1452_v23  ;;  %v7485_v23 = vld [vmem:[#allocation8 + $0x5a4] ss:$48 sps:$4 sm:$0xff]  }
 0x2f7   :  { %v9110_v25 = vsub.f32 %v7094_v56, %v1458_v24  ;;  %v9112_v26 = vsub.f32 %v7095_v58, %v1458_v24  ;;  %v9115_v27 = vsub.f32 %v9096_v49, %v1458_v24  ;;  %v7431_v49 = vld [vmem:[#allocation8 + $0x244] ss:$48 sps:$4 sm:$0xff]   ;;  %v7440_v56 = vld [vmem:[#allocation8 + $0x2ac] ss:$48 sps:$4 sm:$0xff]   ;;  %v7438_v58 = vld [vmem:[#allocation8 + $0x2a8] ss:$48 sps:$4 sm:$0xff]  }
 0x2f8   :  { %v1456_v28 = vpop.xlane.xlu0 %1455  ;;  %3375 = vmatprep.subr.bf16.mxu1 %v7431_v49  ;;  %v7488_v24 = vld [vmem:[#allocation8 + $0x5ac] ss:$48 sps:$4 sm:$0xff]  }
 0x2f9   :  { %v1459_v31 = vmul.f32 0.0026041667, %v1456_v28  ;;  %v1466_v32 = vmul.f32 %v9110_v25, %v9110_v25  ;;  %v1467_v33 = vmul.f32 %v9112_v26, %v9112_v26  ;;  %v1468_v34 = vmul.f32 %v9115_v27, %v9115_v27  ;;  %3376 = vmatpush1.bf16.msra.mxu1 %v7429_v53  ;;  %v7483_v28 = vld [vmem:[#allocation8 + $0x5a0] ss:$48 sps:$4 sm:$0xff]  }
 0x2fa   :  { %3377 = vmatprep.subr.bf16.mxu1 %v7437_v55 }
 0x2fb   :  { %v9123_v35 = vsub.f32 %v7096_v60, %v1459_v31  ;;  %v9125_v36 = vsub.f32 %v7097_v62, %v1459_v31  ;;  %v9128_v37 = vsub.f32 %v9098_v50, %v1459_v31  ;;  %v1472_v38 = vadd.f32 %v1467_v33, %v1466_v32  ;;  %v7434_v50 = vld [vmem:[#allocation8 + $0x24c] ss:$48 sps:$4 sm:$0xff]   ;;  %v7444_v62 = vld [vmem:[#allocation8 + $0x308] ss:$48 sps:$4 sm:$0xff]   ;;  %v7491_v32 = vld [vmem:[#allocation8 + $0x604] ss:$48 sps:$4 sm:$0xff]  }
 0x2fc   :  { %3461 = vmatprep.subr.bf16.mxu0 %v7434_v50  ;;  %v7446_v60 = vld [vmem:[#allocation8 + $0x30c] ss:$48 sps:$4 sm:$0xff]   ;;  %v7486_v31 = vld [vmem:[#allocation8 + $0x5a8] ss:$48 sps:$4 sm:$0xff]  }
 0x2fd   :  { %v1473_v39 = vadd.f32 %v1472_v38, %v1468_v34  ;;  %v1469_v40 = vmul.f32 %v9123_v35, %v9123_v35  ;;  %v1470_v41 = vmul.f32 %v9125_v36, %v9125_v36  ;;  %v1471_v42 = vmul.f32 %v9128_v37, %v9128_v37  ;;  %3462 = vmatpush1.bf16.msra.mxu0 %v7432_v54  ;;  %v7494_v33 = vld [vmem:[#allocation8 + $0x60c] ss:$48 sps:$4 sm:$0xff]  }
 0x2fe   :  { %3463 = vmatprep.subr.bf16.mxu0 %v7440_v56  ;;  %3378 = vmatpush1.bf16.msra.mxu1 %v7435_v57 }
 0x2ff   :  { %1474 = vadd.xlane.f32.xlu1 %v1473_v39  ;;  %v1476_v43 = vadd.f32 %v1470_v41, %v1469_v40  ;;  %3379 = vmatprep.subr.bf16.mxu1 %v7443_v59 }
 0x301   :  { %v1477_v44 = vadd.f32 %v1476_v43, %v1471_v42  ;;  %3464 = vmatpush1.bf16.msra.mxu0 %v7438_v58  ;;  %v1492_v43 = vld [vmem:[#allocation5] sm:$0x7] }
 0x302   :  { %3465 = vmatprep.subr.bf16.mxu0 %v7446_v60  ;;  %3380 = vmatpush1.bf16.msra.mxu1 %v7441_v61  ;;  %v1501_v45 = vrot.slane %v1492_v43, %v9104_v52  ;;  %v1497_v46 = vrot.slane %v1492_v43, %v9101_v51 }
 0x303   :  { %1478 = vadd.xlane.f32.xlu1 %v1477_v44  ;;  %3381 = vmatprep.subr.bf16.mxu1 %v7449_v63  ;;  %v1515_v44 = vld [vmem:[#allocation7] sm:$0x7] }
 0x304   :  { %v1524_v50 = vrot.slane %v1515_v44, %v9104_v52  ;;  %v1520_v53 = vrot.slane %v1515_v44, %v9101_v51 }
 0x305   :  { %3466 = vmatpush1.bf16.msra.mxu0 %v7444_v62 }
 0x306   :  { %3467 = vmatprep.subr.bf16.mxu0 %v7452_v0  ;;  %3382 = vmatpush1.bf16.msra.mxu1 %v7447_v1 }
 0x307   :  { %3383 = vmatprep.subr.bf16.mxu1 %v7455_v3 }
 0x309   :  { %3468 = vmatpush1.bf16.msra.mxu0 %v7450_v2 }
 0x30a   :  { %3469 = vmatprep.subr.bf16.mxu0 %v7458_v4  ;;  %3384 = vmatpush1.bf16.msra.mxu1 %v7453_v5 }
 0x30b   :  { %3385 = vmatprep.subr.bf16.mxu1 %v7461_v7 }
 0x30d   :  { %3470 = vmatpush1.bf16.msra.mxu0 %v7456_v6 }
 0x30e   :  { %3471 = vmatprep.subr.bf16.mxu0 %v7464_v8  ;;  %3386 = vmatpush1.bf16.msra.mxu1 %v7459_v9 }
 0x30f   :  { %3387 = vmatprep.subr.bf16.mxu1 %v7467_v11 }
 0x311   :  { %3472 = vmatpush1.bf16.msra.mxu0 %v7462_v10 }
 0x312   :  { %3473 = vmatprep.subr.bf16.mxu0 %v7470_v12  ;;  %3388 = vmatpush1.bf16.msra.mxu1 %v7465_v13 }
 0x313   :  { %3389 = vmatprep.subr.bf16.mxu1 %v7473_v15 }
 0x315   :  { %3474 = vmatpush1.bf16.msra.mxu0 %v7468_v14 }
 0x316   :  { %3475 = vmatprep.subr.bf16.mxu0 %v7476_v16  ;;  %3390 = vmatpush1.bf16.msra.mxu1 %v7471_v17  ;;  %v1505_v17 = vrot.slane %v1492_v43, %v9093_v30  ;;  %v7504_v43 = vld [vmem:[#allocation8 + $0x6c8] ss:$48 sps:$4 sm:$0xff]  }
 0x317   :  { %3391 = vmatprep.subr.bf16.mxu1 %v7479_v19 }
 0x319   :  { %3476 = vmatpush1.bf16.msra.mxu0 %v7474_v18 }
 0x31a   :  { %3477 = vmatprep.subr.bf16.mxu0 %v7482_v20  ;;  %3392 = vmatpush1.bf16.msra.mxu1 %v7477_v21  ;;  %v7489_v21 = vld [vmem:[#allocation8 + $0x600] ss:$48 sps:$4 sm:$0xff]  }
 0x31b   :  { %3393 = vmatprep.subr.bf16.mxu1 %v7485_v23 }
 0x31d   :  { %3478 = vmatpush1.bf16.msra.mxu0 %v7480_v22  ;;  %v7492_v22 = vld [vmem:[#allocation8 + $0x608] ss:$48 sps:$4 sm:$0xff]  }
 0x31e   :  { %3479 = vmatprep.subr.bf16.mxu0 %v7488_v24  ;;  %3394 = vmatpush1.bf16.msra.mxu1 %v7483_v28  ;;  %v7497_v24 = vld [vmem:[#allocation8 + $0x664] ss:$48 sps:$4 sm:$0xff]   ;;  %v7500_v28 = vld [vmem:[#allocation8 + $0x66c] ss:$48 sps:$4 sm:$0xff]  }
 0x31f   :  { %3406 = vmatprep.subr.bf16.mxu1 %v7491_v32  ;;  %v7495_v32 = vld [vmem:[#allocation8 + $0x660] ss:$48 sps:$4 sm:$0xff]  }
 0x321   :  { %3480 = vmatpush1.bf16.msra.mxu0 %v7486_v31  ;;  %v1528_v31 = vrot.slane %v1515_v44, %v9093_v30 }
 0x322   :  { %3492 = vmatprep.subr.bf16.mxu0 %v7494_v33  ;;  %v7498_v33 = vld [vmem:[#allocation8 + $0x668] ss:$48 sps:$4 sm:$0xff]  }
 0x38c   :  { %v1475_v34 = vpop.xlane.xlu1 %1474 }
 0x38d   :  { %v1480_v38 = vmul.f32 0.0026041667, %v1475_v34 }
 0x38f   :  { %v1482_v39 = vadd.f32 1e-05, %v1480_v38  ;;  %v7503_v38 = vld [vmem:[#allocation8 + $0x6c4] ss:$48 sps:$4 sm:$0xff]  }
 0x390   :  { %v1479_v40 = vpop.xlane.xlu1 %1478 }
 0x391   :  { %8041 = vrsqrt.f32 %v1482_v39  ;;  %v1481_v41 = vmul.f32 0.0026041667, %v1479_v40  ;;  %v7506_v39 = vld [vmem:[#allocation8 + $0x6cc] ss:$48 sps:$4 sm:$0xff]   ;;  %v8410_v40 = vmov 0  }
 0x393   :  { %v1483_v42 = vadd.f32 1e-05, %v1481_v41 }
 0x395   :  { %8043 = vrsqrt.f32 %v1483_v42  ;;  %v7501_v42 = vld [vmem:[#allocation8 + $0x6c0] ss:$48 sps:$4 sm:$0xff]  }
 0x39b   :  { %v8042_v47 = vpop.eup %8041 }
 0x39c   :  { %v1486_v48 = vmul.f32 %v8042_v47, %v9110_v25  ;;  %v1487_v49 = vmul.f32 %v8042_v47, %v9112_v26  ;;  %v1488_v14 = vmul.f32 %v8042_v47, %v9115_v27 }
 0x39e   :  { %v1510_v54 = vmul.f32 %v1501_v45, %v1487_v49  ;;  %v1509_v55 = vmul.f32 %v1497_v46, %v1486_v48  ;;  %v1511_v27 = vmul.f32 %v1505_v17, %v1488_v14  ;;  %v7507_v48 = vld [vmem:[#allocation8 + $0x720] ss:$48 sps:$4 sm:$0xff]   ;;  %v7510_v49 = vld [vmem:[#allocation8 + $0x728] ss:$48 sps:$4 sm:$0xff]   ;;  %v7548_v14 = vld [vmem:[#allocation8 + $0x7c] ss:$48 sps:$4 sm:$0xff]  }
 0x39f   :  { %v8044_v56 = vpop.eup %8043 }
 0x3a0   :  { %v1489_v57 = vmul.f32 %v8044_v56, %v9123_v35  ;;  %v1490_v58 = vmul.f32 %v8044_v56, %v9125_v36  ;;  %v1533_v59 = vadd.f32 %v1524_v50, %v1510_v54  ;;  %v1532_v60 = vadd.f32 %v1520_v53, %v1509_v55  ;;  %v7513_v54 = vld [vmem:[#allocation8 + $0x780] ss:$48 sps:$4 sm:$0xff]   ;;  %v7516_v55 = vld [vmem:[#allocation8 + $0x788] ss:$48 sps:$4 sm:$0xff]  }
 0x3a1   :  { %v1491_v7 = vmul.f32 %v8044_v56, %v9128_v37  ;;  %v1534_v41 = vadd.f32 %v1528_v31, %v1511_v27  ;;  %v7521_v56 = vld [vmem:[#allocation8 + $0x7e4] ss:$48 sps:$4 sm:$0xff]  }
 0x3a2   :  { %v1513_v61 = vmul.f32 %v1501_v45, %v1490_v58  ;;  %v1545_v62 = vmul.f32 0.70710677, %v1533_v59  ;;  %v1512_v63 = vmul.f32 %v1497_v46, %v1489_v57  ;;  %v1544_v0 = vmul.f32 0.70710677, %v1532_v60  ;;  %v7509_v45 = vld [vmem:[#allocation8 + $0x724] ss:$48 sps:$4 sm:$0xff]  }
 0x3a3   :  { %v1539_v8 = vmul.f32 0.5, %v1533_v59  ;;  %v1538_v11 = vmul.f32 0.5, %v1532_v60  ;;  %v1514_v23 = vmul.f32 %v1505_v17, %v1491_v7  ;;  %v7512_v46 = vld [vmem:[#allocation8 + $0x72c] ss:$48 sps:$4 sm:$0xff]   ;;  %v1546_v47 = vmul.f32 0.70710677, %v1534_v41 }
 0x3a4   :  { %v1536_v25 = vadd.f32 %v1524_v50, %v1513_v61  ;;  %8045 = verf.f32 %v1545_v62  ;;  %v1535_v26 = vadd.f32 %v1520_v53, %v1512_v63  ;;  %v7515_v50 = vld [vmem:[#allocation8 + $0x784] ss:$48 sps:$4 sm:$0xff]   ;;  %v7518_v53 = vld [vmem:[#allocation8 + $0x78c] ss:$48 sps:$4 sm:$0xff]   ;;  %v7519_v58 = vld [vmem:[#allocation8 + $0x7e0] ss:$48 sps:$4 sm:$0xff]  }
 0x3a5   :  { %8047 = verf.f32 %v1544_v0  ;;  %v1537_v34 = vadd.f32 %v1528_v31, %v1514_v23  ;;  %v7524_v57 = vld [vmem:[#allocation8 + $0x7ec] ss:$48 sps:$4 sm:$0xff]   ;;  %v7522_v59 = vld [vmem:[#allocation8 + $0x7e8] ss:$48 sps:$4 sm:$0xff]   ;;  %v7527_v60 = vld [vmem:[#allocation8 + $0x844] ss:$48 sps:$4 sm:$0xff]  }
 0x3a6   :  { %v1548_v1 = vmul.f32 0.70710677, %v1536_v25  ;;  %v1547_v2 = vmul.f32 0.70710677, %v1535_v26  ;;  %v1542_v9 = vmul.f32 0.5, %v1536_v25  ;;  %v1541_v12 = vmul.f32 0.5, %v1535_v26 }
 0x3a7   :  { %v1549_v44 = vmul.f32 0.70710677, %v1537_v34  ;;  %v7530_v61 = vld [vmem:[#allocation8 + $0x84c] ss:$48 sps:$4 sm:$0xff]   ;;  %v7525_v0 = vld [vmem:[#allocation8 + $0x840] ss:$48 sps:$4 sm:$0xff]  }
 0x3a8   :  { %8049 = verf.f32 %v1548_v1  ;;  %v7528_v25 = vld [vmem:[#allocation8 + $0x848] ss:$48 sps:$4 sm:$0xff]   ;;  %v7533_v26 = vld [vmem:[#allocation8 + $0x8a4] ss:$48 sps:$4 sm:$0xff]   ;;  %v7536_v1 = vld [vmem:[#allocation8 + $0x8ac] ss:$48 sps:$4 sm:$0xff]  }
 0x3a9   :  { %8051 = verf.f32 %v1547_v2  ;;  %v7539_v7 = vld [vmem:[#allocation8 + $0x14] ss:$48 sps:$4 sm:$0xff]   ;;  %v7560_v23 = vld [vmem:[#allocation8 + $0x13c] ss:$48 sps:$4 sm:$0xff]  }
 0x3aa   :  { %8053 = verf.f32 %v1549_v44  ;;  %v7551_v17 = vld [vmem:[#allocation8 + $0xd4] ss:$48 sps:$4 sm:$0xff]   ;;  %v7566_v31 = vld [vmem:[#allocation8 + $0x19c] ss:$48 sps:$4 sm:$0xff]   ;;  %v7573_v44 = vld [vmem:[#allocation8 + $0x250] ss:$48 sps:$4 sm:$0xff]  }
 0x3ab   :  { %8055 = verf.f32 %v1546_v47  ;;  %v7563_v27 = vld [vmem:[#allocation8 + $0x194] ss:$48 sps:$4 sm:$0xff]   ;;  %v7584_v47 = vld [vmem:[#allocation8 + $0x2bc] ss:$48 sps:$4 sm:$0xff]  }
 0x3ae   :  { %v8046_v3 = vpop.eup %8045 }
 0x3af   :  { %v8048_v4 = vpop.eup %8047  ;;  %v1557_v5 = vadd.f32 1.0, %v8046_v3  ;;  %v1543_v3 = vmul.f32 0.5, %v1537_v34  ;;  %v7569_v34 = vld [vmem:[#allocation8 + $0x1f4] ss:$48 sps:$4 sm:$0xff]  }
 0x3b0   :  { %v1556_v6 = vadd.f32 1.0, %v8048_v4 }
 0x3b1   :  { %v1563_v15 = vmul.f32 %v1557_v5, %v1539_v8  ;;  %v7531_v5 = vld [vmem:[#allocation8 + $0x8a0] ss:$48 sps:$4 sm:$0xff]   ;;  %v7542_v8 = vld [vmem:[#allocation8 + $0x1c] ss:$48 sps:$4 sm:$0xff]  }
 0x3b2   :  { %v8050_v35 = vpop.eup %8049  ;;  %v1562_v18 = vmul.f32 %v1556_v6, %v1538_v11  ;;  %v1540_v6 = vmul.f32 0.5, %v1534_v41  ;;  %v7570_v41 = vld [vmem:[#allocation8 + $0x1f8] ss:$48 sps:$4 sm:$0xff]  }
 0x3b3   :  { %v8052_v36 = vpop.eup %8051  ;;  %v1560_v10 = vadd.f32 1.0, %v8050_v35  ;;  %v7534_v35 = vld [vmem:[#allocation8 + $0x8a8] ss:$48 sps:$4 sm:$0xff]  }
 0x3b4   :  { %v1559_v13 = vadd.f32 1.0, %v8052_v36  ;;  %v8054_v62 = vpop.eup %8053 }
 0x3b5   :  { %v1566_v16 = vmul.f32 %v1560_v10, %v1542_v9  ;;  %v8056_v63 = vpop.eup %8055  ;;  %v1561_v2 = vadd.f32 1.0, %v8054_v62  ;;  %v7537_v10 = vld [vmem:[#allocation8 + $0x10] ss:$48 sps:$4 sm:$0xff]  }
 0x3b6   :  { %v1565_v19 = vmul.f32 %v1559_v13, %v1541_v12  ;;  %v1558_v4 = vadd.f32 1.0, %v8056_v63  ;;  %v7540_v12 = vld [vmem:[#allocation8 + $0x18] ss:$48 sps:$4 sm:$0xff]   ;;  %v7545_v13 = vld [vmem:[#allocation8 + $0x74] ss:$48 sps:$4 sm:$0xff]  }
 0x3b7   :  { %v9147_v20 = vpack.c.bf16 %v1566_v16, %v1563_v15  ;;  %v1567_v36 = vmul.f32 %v1561_v2, %v1543_v3  ;;  %v7543_v15 = vld [vmem:[#allocation8 + $0x70] ss:$48 sps:$4 sm:$0xff]   ;;  %v7546_v16 = vld [vmem:[#allocation8 + $0x78] ss:$48 sps:$4 sm:$0xff]   ;;  %v7611_v2 = vld [vmem:[#allocation8 + $0x494] ss:$48 sps:$4 sm:$0xff]  }
 0x3b8   :  { %v9149_v37 = vpack.c.bf16 %v1565_v19, %v1562_v18  ;;  %v1564_v9 = vmul.f32 %v1558_v4, %v1540_v6  ;;  %v7554_v18 = vld [vmem:[#allocation8 + $0xdc] ss:$48 sps:$4 sm:$0xff]   ;;  %v7549_v19 = vld [vmem:[#allocation8 + $0xd0] ss:$48 sps:$4 sm:$0xff]   ;;  %v7600_v63 = vld [vmem:[#allocation8 + $0x3d8] ss:$48 sps:$4 sm:$0xff]  }
 0x3b9   :  { %3395 = vmatprep.mubr.bf16.mxu1 %v9147_v20  ;;  %3481 = vmatprep.mubr.bf16.mxu0 %v9147_v20  ;;  %v7597_v62 = vld [vmem:[#allocation8 + $0x3d0] ss:$48 sps:$4 sm:$0xff]   ;;  %v7614_v3 = vld [vmem:[#allocation8 + $0x49c] ss:$48 sps:$4 sm:$0xff]  }
 0x3ba   :  { %3396 = vmatmul.mubr.bf16.vlgmr.msra.gmra.mrb[12].mxu1 %v9149_v37  ;;  %3482 = vmatmul.mubr.bf16.vlgmr.msra.gmra.mrb[4].mxu0 %v9149_v37  ;;  %v9158_v11 = vpack.c.bf16 %v1567_v36, %v1564_v9  ;;  %v7609_v4 = vld [vmem:[#allocation8 + $0x490] ss:$48 sps:$4 sm:$0xff]   ;;  %v7620_v6 = vld [vmem:[#allocation8 + $0x4fc] ss:$48 sps:$4 sm:$0xff]  }
 0x3bb   :  { %3407 = vmatpush1.bf16.msra.mxu1 %v7489_v21  ;;  %3493 = vmatpush1.bf16.msra.mxu0 %v7492_v22  ;;  %v7552_v21 = vld [vmem:[#allocation8 + $0xd8] ss:$48 sps:$4 sm:$0xff]   ;;  %v7557_v22 = vld [vmem:[#allocation8 + $0x134] ss:$48 sps:$4 sm:$0xff]   ;;  %v7615_v36 = vld [vmem:[#allocation8 + $0x4f0] ss:$48 sps:$4 sm:$0xff]  }
 0x3bc   :  { %3408 = vmatprep.subr.bf16.mxu1 %v7497_v24  ;;  %3494 = vmatprep.subr.bf16.mxu0 %v7500_v28  ;;  %v7555_v24 = vld [vmem:[#allocation8 + $0x130] ss:$48 sps:$4 sm:$0xff]   ;;  %v7558_v28 = vld [vmem:[#allocation8 + $0x138] ss:$48 sps:$4 sm:$0xff]   ;;  %v7626_v9 = vld [vmem:[#allocation8 + $0x55c] ss:$48 sps:$4 sm:$0xff]  }
 0x3bd   :  { %3438 = vmatprep.mubr.bf16.mxu1 %v8410_v40  ;;  %3524 = vmatprep.mubr.bf16.mxu0 %v8410_v40 }
 0x3bf   :  { %3409 = vmatpush1.bf16.msra.mxu1 %v7495_v32  ;;  %3495 = vmatpush1.bf16.msra.mxu0 %v7498_v33  ;;  %v7561_v32 = vld [vmem:[#allocation8 + $0x190] ss:$48 sps:$4 sm:$0xff]   ;;  %v7564_v33 = vld [vmem:[#allocation8 + $0x198] ss:$48 sps:$4 sm:$0xff]  }
 0x3c0   :  { %3410 = vmatprep.subr.bf16.mxu1 %v7503_v38  ;;  %3496 = vmatprep.subr.bf16.mxu0 %v7506_v39  ;;  %v7572_v38 = vld [vmem:[#allocation8 + $0x1fc] ss:$48 sps:$4 sm:$0xff]   ;;  %v7567_v39 = vld [vmem:[#allocation8 + $0x1f0] ss:$48 sps:$4 sm:$0xff]  }
 0x3c3   :  { %3411 = vmatpush1.bf16.msra.mxu1 %v7501_v42  ;;  %3497 = vmatpush1.bf16.msra.mxu0 %v7504_v43  ;;  %v7575_v42 = vld [vmem:[#allocation8 + $0x254] ss:$48 sps:$4 sm:$0xff]   ;;  %v7578_v43 = vld [vmem:[#allocation8 + $0x25c] ss:$48 sps:$4 sm:$0xff]  }
 0x3c4   :  { %3412 = vmatprep.subr.bf16.mxu1 %v7509_v45  ;;  %3498 = vmatprep.subr.bf16.mxu0 %v7512_v46  ;;  %v7576_v45 = vld [vmem:[#allocation8 + $0x258] ss:$48 sps:$4 sm:$0xff]   ;;  %v7581_v46 = vld [vmem:[#allocation8 + $0x2b4] ss:$48 sps:$4 sm:$0xff]  }
 0x3c7   :  { %3413 = vmatpush1.bf16.msra.mxu1 %v7507_v48  ;;  %3499 = vmatpush1.bf16.msra.mxu0 %v7510_v49  ;;  %v7579_v48 = vld [vmem:[#allocation8 + $0x2b0] ss:$48 sps:$4 sm:$0xff]   ;;  %v7582_v49 = vld [vmem:[#allocation8 + $0x2b8] ss:$48 sps:$4 sm:$0xff]  }
 0x3c8   :  { %3414 = vmatprep.subr.bf16.mxu1 %v7515_v50  ;;  %3500 = vmatprep.subr.bf16.mxu0 %v7518_v53  ;;  %v7587_v50 = vld [vmem:[#allocation8 + $0x314] ss:$48 sps:$4 sm:$0xff]   ;;  %v7590_v53 = vld [vmem:[#allocation8 + $0x31c] ss:$48 sps:$4 sm:$0xff]  }
 0x3cb   :  { %3415 = vmatpush1.bf16.msra.mxu1 %v7513_v54  ;;  %3501 = vmatpush1.bf16.msra.mxu0 %v7516_v55  ;;  %v7585_v54 = vld [vmem:[#allocation8 + $0x310] ss:$48 sps:$4 sm:$0xff]   ;;  %v7588_v55 = vld [vmem:[#allocation8 + $0x318] ss:$48 sps:$4 sm:$0xff]  }
 0x3cc   :  { %3416 = vmatprep.subr.bf16.mxu1 %v7521_v56  ;;  %3502 = vmatprep.subr.bf16.mxu0 %v7524_v57  ;;  %v7593_v56 = vld [vmem:[#allocation8 + $0x374] ss:$48 sps:$4 sm:$0xff]   ;;  %v7596_v57 = vld [vmem:[#allocation8 + $0x37c] ss:$48 sps:$4 sm:$0xff]  }
 0x3cf   :  { %3417 = vmatpush1.bf16.msra.mxu1 %v7519_v58  ;;  %3503 = vmatpush1.bf16.msra.mxu0 %v7522_v59  ;;  %v7591_v58 = vld [vmem:[#allocation8 + $0x370] ss:$48 sps:$4 sm:$0xff]   ;;  %v7594_v59 = vld [vmem:[#allocation8 + $0x378] ss:$48 sps:$4 sm:$0xff]  }
 0x3d0   :  { %3418 = vmatprep.subr.bf16.mxu1 %v7527_v60  ;;  %3504 = vmatprep.subr.bf16.mxu0 %v7530_v61  ;;  %v7599_v60 = vld [vmem:[#allocation8 + $0x3d4] ss:$48 sps:$4 sm:$0xff]   ;;  %v7602_v61 = vld [vmem:[#allocation8 + $0x3dc] ss:$48 sps:$4 sm:$0xff]  }
 0x3d3   :  { %3419 = vmatpush1.bf16.msra.mxu1 %v7525_v0  ;;  %3505 = vmatpush1.bf16.msra.mxu0 %v7528_v25  ;;  %v7605_v0 = vld [vmem:[#allocation8 + $0x434] ss:$48 sps:$4 sm:$0xff]   ;;  %v7608_v25 = vld [vmem:[#allocation8 + $0x43c] ss:$48 sps:$4 sm:$0xff]  }
 0x3d4   :  { %3420 = vmatprep.subr.bf16.mxu1 %v7533_v26  ;;  %3506 = vmatprep.subr.bf16.mxu0 %v7536_v1  ;;  %v7603_v26 = vld [vmem:[#allocation8 + $0x430] ss:$48 sps:$4 sm:$0xff]   ;;  %v7606_v1 = vld [vmem:[#allocation8 + $0x438] ss:$48 sps:$4 sm:$0xff]  }
 0x3d7   :  { %3421 = vmatpush1.bf16.msra.mxu1 %v7531_v5  ;;  %3507 = vmatpush1.bf16.msra.mxu0 %v7534_v35  ;;  %v7612_v5 = vld [vmem:[#allocation8 + $0x498] ss:$48 sps:$4 sm:$0xff]   ;;  %v7617_v35 = vld [vmem:[#allocation8 + $0x4f4] ss:$48 sps:$4 sm:$0xff]  }
 0x3d8   :  { %3535 = vmatprep.subr.bf16.mxu1 %v7539_v7  ;;  %3621 = vmatprep.subr.bf16.mxu0 %v7542_v8  ;;  %v7618_v7 = vld [vmem:[#allocation8 + $0x4f8] ss:$48 sps:$4 sm:$0xff]   ;;  %v7623_v8 = vld [vmem:[#allocation8 + $0x554] ss:$48 sps:$4 sm:$0xff]  }
 0x3da   :  { %3439 = vmatmul.mubr.bf16.vlgmr.msra.gmra.mrb[12].mxu1 %v9158_v11  ;;  %3525 = vmatmul.mubr.bf16.vlgmr.msra.gmra.mrb[4].mxu0 %v9158_v11 }
 0x3db   :  { %3536 = vmatpush1.bf16.msra.mxu1 %v7537_v10  ;;  %3567 = vmatprep.mubr.bf16.mxu1 %v9147_v20  ;;  %v7621_v10 = vld [vmem:[#allocation8 + $0x550] ss:$48 sps:$4 sm:$0xff]  }
 0x3dc   :  { %3622 = vmatpush1.bf16.msra.mxu0 %v7540_v12  ;;  %3653 = vmatprep.mubr.bf16.mxu0 %v9147_v20  ;;  %v7624_v12 = vld [vmem:[#allocation8 + $0x558] ss:$48 sps:$4 sm:$0xff]  }
 0x3dd   :  { %3537 = vmatprep.subr.bf16.mxu1 %v7545_v13  ;;  %3623 = vmatprep.subr.bf16.mxu0 %v7548_v14  ;;  %v7629_v13 = vld [vmem:[#allocation8 + $0x5b4] ss:$48 sps:$4 sm:$0xff]   ;;  %v7632_v14 = vld [vmem:[#allocation8 + $0x5bc] ss:$48 sps:$4 sm:$0xff]  }
 0x3df   :  { %3538 = vmatpush1.bf16.msra.mxu1 %v7543_v15  ;;  %v7627_v15 = vld [vmem:[#allocation8 + $0x5b0] ss:$48 sps:$4 sm:$0xff]  }
 0x3e0   :  { %3624 = vmatpush1.bf16.msra.mxu0 %v7546_v16  ;;  %3539 = vmatprep.subr.bf16.mxu1 %v7551_v17  ;;  %v7630_v16 = vld [vmem:[#allocation8 + $0x5b8] ss:$48 sps:$4 sm:$0xff]   ;;  %v7635_v17 = vld [vmem:[#allocation8 + $0x614] ss:$48 sps:$4 sm:$0xff]  }
 0x3e1   :  { %3625 = vmatprep.subr.bf16.mxu0 %v7554_v18  ;;  %v7638_v18 = vld [vmem:[#allocation8 + $0x61c] ss:$48 sps:$4 sm:$0xff]  }
 0x3e3   :  { %3540 = vmatpush1.bf16.msra.mxu1 %v7549_v19  ;;  %v7633_v19 = vld [vmem:[#allocation8 + $0x610] ss:$48 sps:$4 sm:$0xff]  }
 0x3e4   :  { %3626 = vmatpush1.bf16.msra.mxu0 %v7552_v21  ;;  %3541 = vmatprep.subr.bf16.mxu1 %v7557_v22  ;;  %v7636_v21 = vld [vmem:[#allocation8 + $0x618] ss:$48 sps:$4 sm:$0xff]   ;;  %v7641_v22 = vld [vmem:[#allocation8 + $0x674] ss:$48 sps:$4 sm:$0xff]  }
 0x3e5   :  { %3627 = vmatprep.subr.bf16.mxu0 %v7560_v23  ;;  %v7644_v23 = vld [vmem:[#allocation8 + $0x67c] ss:$48 sps:$4 sm:$0xff]  }
 0x3e7   :  { %3542 = vmatpush1.bf16.msra.mxu1 %v7555_v24  ;;  %v7639_v24 = vld [vmem:[#allocation8 + $0x670] ss:$48 sps:$4 sm:$0xff]  }
 0x3e8   :  { %3628 = vmatpush1.bf16.msra.mxu0 %v7558_v28  ;;  %3543 = vmatprep.subr.bf16.mxu1 %v7563_v27  ;;  %v7642_v28 = vld [vmem:[#allocation8 + $0x678] ss:$48 sps:$4 sm:$0xff]   ;;  %v7647_v27 = vld [vmem:[#allocation8 + $0x6d4] ss:$48 sps:$4 sm:$0xff]  }
 0x3e9   :  { %3629 = vmatprep.subr.bf16.mxu0 %v7566_v31  ;;  %v7650_v31 = vld [vmem:[#allocation8 + $0x6dc] ss:$48 sps:$4 sm:$0xff]  }
 0x3eb   :  { %3544 = vmatpush1.bf16.msra.mxu1 %v7561_v32  ;;  %v7645_v32 = vld [vmem:[#allocation8 + $0x6d0] ss:$48 sps:$4 sm:$0xff]  }
 0x3ec   :  { %3630 = vmatpush1.bf16.msra.mxu0 %v7564_v33  ;;  %3545 = vmatprep.subr.bf16.mxu1 %v7569_v34  ;;  %v7648_v33 = vld [vmem:[#allocation8 + $0x6d8] ss:$48 sps:$4 sm:$0xff]   ;;  %v7653_v34 = vld [vmem:[#allocation8 + $0x734] ss:$48 sps:$4 sm:$0xff]  }
 0x3ed   :  { %3631 = vmatprep.subr.bf16.mxu0 %v7572_v38  ;;  %v7656_v38 = vld [vmem:[#allocation8 + $0x73c] ss:$48 sps:$4 sm:$0xff]  }
 0x3ef   :  { %3546 = vmatpush1.bf16.msra.mxu1 %v7567_v39  ;;  %v7651_v39 = vld [vmem:[#allocation8 + $0x730] ss:$48 sps:$4 sm:$0xff]  }
 0x3f0   :  { %3632 = vmatpush1.bf16.msra.mxu0 %v7570_v41  ;;  %3547 = vmatprep.subr.bf16.mxu1 %v7575_v42  ;;  %v7654_v41 = vld [vmem:[#allocation8 + $0x738] ss:$48 sps:$4 sm:$0xff]   ;;  %v7659_v42 = vld [vmem:[#allocation8 + $0x794] ss:$48 sps:$4 sm:$0xff]  }
 0x3f1   :  { %3633 = vmatprep.subr.bf16.mxu0 %v7578_v43  ;;  %v7662_v43 = vld [vmem:[#allocation8 + $0x79c] ss:$48 sps:$4 sm:$0xff]  }
 0x3f3   :  { %3548 = vmatpush1.bf16.msra.mxu1 %v7573_v44  ;;  %v7657_v44 = vld [vmem:[#allocation8 + $0x790] ss:$48 sps:$4 sm:$0xff]  }
 0x3f4   :  { %3634 = vmatpush1.bf16.msra.mxu0 %v7576_v45  ;;  %3549 = vmatprep.subr.bf16.mxu1 %v7581_v46  ;;  %v7660_v45 = vld [vmem:[#allocation8 + $0x798] ss:$48 sps:$4 sm:$0xff]   ;;  %v7665_v46 = vld [vmem:[#allocation8 + $0x7f4] ss:$48 sps:$4 sm:$0xff]  }
 0x3f5   :  { %3635 = vmatprep.subr.bf16.mxu0 %v7584_v47  ;;  %v7668_v47 = vld [vmem:[#allocation8 + $0x7fc] ss:$48 sps:$4 sm:$0xff]  }
 0x3f7   :  { %3550 = vmatpush1.bf16.msra.mxu1 %v7579_v48  ;;  %v7663_v48 = vld [vmem:[#allocation8 + $0x7f0] ss:$48 sps:$4 sm:$0xff]  }
 0x3f8   :  { %3636 = vmatpush1.bf16.msra.mxu0 %v7582_v49  ;;  %3551 = vmatprep.subr.bf16.mxu1 %v7587_v50  ;;  %v7666_v49 = vld [vmem:[#allocation8 + $0x7f8] ss:$48 sps:$4 sm:$0xff]   ;;  %v7671_v50 = vld [vmem:[#allocation8 + $0x854] ss:$48 sps:$4 sm:$0xff]  }
 0x3f9   :  { %3637 = vmatprep.subr.bf16.mxu0 %v7590_v53  ;;  %v7674_v53 = vld [vmem:[#allocation8 + $0x85c] ss:$48 sps:$4 sm:$0xff]  }
 0x3fb   :  { %3552 = vmatpush1.bf16.msra.mxu1 %v7585_v54  ;;  %v7669_v54 = vld [vmem:[#allocation8 + $0x850] ss:$48 sps:$4 sm:$0xff]  }
 0x3fc   :  { %3638 = vmatpush1.bf16.msra.mxu0 %v7588_v55  ;;  %3553 = vmatprep.subr.bf16.mxu1 %v7593_v56  ;;  %v7672_v55 = vld [vmem:[#allocation8 + $0x858] ss:$48 sps:$4 sm:$0xff]   ;;  %v7677_v56 = vld [vmem:[#allocation8 + $0x8b4] ss:$48 sps:$4 sm:$0xff]  }
 0x3fd   :  { %3639 = vmatprep.subr.bf16.mxu0 %v7596_v57  ;;  %v7680_v57 = vld [vmem:[#allocation8 + $0x8bc] ss:$48 sps:$4 sm:$0xff]  }
 0x3ff   :  { %3554 = vmatpush1.bf16.msra.mxu1 %v7591_v58  ;;  %v7675_v58 = vld [vmem:[#allocation8 + $0x8b0] ss:$48 sps:$4 sm:$0xff]  }
 0x400   :  { %3640 = vmatpush1.bf16.msra.mxu0 %v7594_v59  ;;  %3555 = vmatprep.subr.bf16.mxu1 %v7599_v60  ;;  %v7678_v59 = vld [vmem:[#allocation8 + $0x8b8] ss:$48 sps:$4 sm:$0xff]   ;;  %v7683_v60 = vld [vmem:[#allocation8 + $0x24] ss:$48 sps:$4 sm:$0xff]  }
 0x401   :  { %3641 = vmatprep.subr.bf16.mxu0 %v7602_v61  ;;  %v7686_v61 = vld [vmem:[#allocation8 + $0x2c] ss:$48 sps:$4 sm:$0xff]  }
 0x403   :  { %3556 = vmatpush1.bf16.msra.mxu1 %v7597_v62  ;;  %v7681_v62 = vld [vmem:[#allocation8 + $0x20] ss:$48 sps:$4 sm:$0xff]  }
 0x404   :  { %3642 = vmatpush1.bf16.msra.mxu0 %v7600_v63  ;;  %3557 = vmatprep.subr.bf16.mxu1 %v7605_v0  ;;  %v7684_v63 = vld [vmem:[#allocation8 + $0x28] ss:$48 sps:$4 sm:$0xff]   ;;  %v7689_v0 = vld [vmem:[#allocation8 + $0x84] ss:$48 sps:$4 sm:$0xff]  }
 0x405   :  { %3643 = vmatprep.subr.bf16.mxu0 %v7608_v25  ;;  %v7692_v25 = vld [vmem:[#allocation8 + $0x8c] ss:$48 sps:$4 sm:$0xff]  }
 0x407   :  { %3558 = vmatpush1.bf16.msra.mxu1 %v7603_v26  ;;  %v7687_v26 = vld [vmem:[#allocation8 + $0x80] ss:$48 sps:$4 sm:$0xff]  }
 0x408   :  { %3644 = vmatpush1.bf16.msra.mxu0 %v7606_v1  ;;  %3559 = vmatprep.subr.bf16.mxu1 %v7611_v2  ;;  %v7690_v1 = vld [vmem:[#allocation8 + $0x88] ss:$48 sps:$4 sm:$0xff]   ;;  %v7695_v2 = vld [vmem:[#allocation8 + $0xe4] ss:$48 sps:$4 sm:$0xff]  }
 0x409   :  { %3645 = vmatprep.subr.bf16.mxu0 %v7614_v3  ;;  %v7698_v3 = vld [vmem:[#allocation8 + $0xec] ss:$48 sps:$4 sm:$0xff]  }
 0x40b   :  { %3560 = vmatpush1.bf16.msra.mxu1 %v7609_v4  ;;  %v7693_v4 = vld [vmem:[#allocation8 + $0xe0] ss:$48 sps:$4 sm:$0xff]  }
 0x40c   :  { %3646 = vmatpush1.bf16.msra.mxu0 %v7612_v5  ;;  %3561 = vmatprep.subr.bf16.mxu1 %v7617_v35  ;;  %v7696_v5 = vld [vmem:[#allocation8 + $0xe8] ss:$48 sps:$4 sm:$0xff]   ;;  %v7701_v35 = vld [vmem:[#allocation8 + $0x144] ss:$48 sps:$4 sm:$0xff]  }
 0x40d   :  { %3647 = vmatprep.subr.bf16.mxu0 %v7620_v6  ;;  %v7704_v6 = vld [vmem:[#allocation8 + $0x14c] ss:$48 sps:$4 sm:$0xff]  }
 0x40f   :  { %3562 = vmatpush1.bf16.msra.mxu1 %v7615_v36  ;;  %v7699_v36 = vld [vmem:[#allocation8 + $0x140] ss:$48 sps:$4 sm:$0xff]  }
 0x410   :  { %3648 = vmatpush1.bf16.msra.mxu0 %v7618_v7  ;;  %3563 = vmatprep.subr.bf16.mxu1 %v7623_v8  ;;  %v7702_v7 = vld [vmem:[#allocation8 + $0x148] ss:$48 sps:$4 sm:$0xff]   ;;  %v7707_v8 = vld [vmem:[#allocation8 + $0x1a4] ss:$48 sps:$4 sm:$0xff]  }
 0x411   :  { %3649 = vmatprep.subr.bf16.mxu0 %v7626_v9  ;;  %v7710_v9 = vld [vmem:[#allocation8 + $0x1ac] ss:$48 sps:$4 sm:$0xff]  }
 0x413   :  { %3564 = vmatpush1.bf16.msra.mxu1 %v7621_v10  ;;  %v7708_v10 = vld [vmem:[#allocation8 + $0x1a8] ss:$48 sps:$4 sm:$0xff]  }
 0x414   :  { %3650 = vmatpush1.bf16.msra.mxu0 %v7624_v12  ;;  %3565 = vmatprep.subr.bf16.mxu1 %v7629_v13  ;;  %v7713_v12 = vld [vmem:[#allocation8 + $0x204] ss:$48 sps:$4 sm:$0xff]   ;;  %v7716_v13 = vld [vmem:[#allocation8 + $0x20c] ss:$48 sps:$4 sm:$0xff]  }
 0x415   :  { %3651 = vmatprep.subr.bf16.mxu0 %v7632_v14  ;;  %v7711_v14 = vld [vmem:[#allocation8 + $0x200] ss:$48 sps:$4 sm:$0xff]  }
 0x417   :  { %3566 = vmatpush1.bf16.msra.mxu1 %v7627_v15  ;;  %v7714_v15 = vld [vmem:[#allocation8 + $0x208] ss:$48 sps:$4 sm:$0xff]  }
 0x418   :  { %3652 = vmatpush1.bf16.msra.mxu0 %v7630_v16  ;;  %3578 = vmatprep.subr.bf16.mxu1 %v7635_v17  ;;  %v7719_v16 = vld [vmem:[#allocation8 + $0x264] ss:$48 sps:$4 sm:$0xff]   ;;  %v7722_v17 = vld [vmem:[#allocation8 + $0x26c] ss:$48 sps:$4 sm:$0xff]  }
 0x419   :  { %3664 = vmatprep.subr.bf16.mxu0 %v7638_v18  ;;  %v7717_v18 = vld [vmem:[#allocation8 + $0x260] ss:$48 sps:$4 sm:$0xff]  }
 0x41a   :  { %3568 = vmatmul.mubr.bf16.vlgmr.msra.gmra.mrb[16].mxu1 %v9149_v37 }
 0x41b   :  { %3654 = vmatmul.mubr.bf16.vlgmr.msra.gmra.mrb[8].mxu0 %v9149_v37  ;;  %3579 = vmatpush1.bf16.msra.mxu1 %v7633_v19  ;;  %v7720_v19 = vld [vmem:[#allocation8 + $0x268] ss:$48 sps:$4 sm:$0xff]  }
 0x41c   :  { %3665 = vmatpush1.bf16.msra.mxu0 %v7636_v21  ;;  %3580 = vmatprep.subr.bf16.mxu1 %v7641_v22  ;;  %v7725_v21 = vld [vmem:[#allocation8 + $0x2c4] ss:$48 sps:$4 sm:$0xff]   ;;  %v7728_v22 = vld [vmem:[#allocation8 + $0x2cc] ss:$48 sps:$4 sm:$0xff]  }
 0x41d   :  { %3666 = vmatprep.subr.bf16.mxu0 %v7644_v23  ;;  %3610 = vmatprep.mubr.bf16.mxu1 %v8410_v40  ;;  %v7723_v23 = vld [vmem:[#allocation8 + $0x2c0] ss:$48 sps:$4 sm:$0xff]  }
 0x41e   :  { %3696 = vmatprep.mubr.bf16.mxu0 %v8410_v40 }
 0x41f   :  { %3581 = vmatpush1.bf16.msra.mxu1 %v7639_v24  ;;  %v7726_v24 = vld [vmem:[#allocation8 + $0x2c8] ss:$48 sps:$4 sm:$0xff]  }
 0x420   :  { %3667 = vmatpush1.bf16.msra.mxu0 %v7642_v28  ;;  %3582 = vmatprep.subr.bf16.mxu1 %v7647_v27  ;;  %v7731_v28 = vld [vmem:[#allocation8 + $0x324] ss:$48 sps:$4 sm:$0xff]   ;;  %v7734_v27 = vld [vmem:[#allocation8 + $0x32c] ss:$48 sps:$4 sm:$0xff]  }
 0x421   :  { %3668 = vmatprep.subr.bf16.mxu0 %v7650_v31  ;;  %v7729_v31 = vld [vmem:[#allocation8 + $0x320] ss:$48 sps:$4 sm:$0xff]  }
 0x423   :  { %3583 = vmatpush1.bf16.msra.mxu1 %v7645_v32  ;;  %v7732_v32 = vld [vmem:[#allocation8 + $0x328] ss:$48 sps:$4 sm:$0xff]  }
 0x424   :  { %3669 = vmatpush1.bf16.msra.mxu0 %v7648_v33  ;;  %3584 = vmatprep.subr.bf16.mxu1 %v7653_v34  ;;  %v7737_v33 = vld [vmem:[#allocation8 + $0x384] ss:$48 sps:$4 sm:$0xff]   ;;  %v7740_v34 = vld [vmem:[#allocation8 + $0x38c] ss:$48 sps:$4 sm:$0xff]  }
 0x425   :  { %3670 = vmatprep.subr.bf16.mxu0 %v7656_v38  ;;  %v7735_v38 = vld [vmem:[#allocation8 + $0x380] ss:$48 sps:$4 sm:$0xff]  }
 0x427   :  { %3585 = vmatpush1.bf16.msra.mxu1 %v7651_v39  ;;  %v7738_v39 = vld [vmem:[#allocation8 + $0x388] ss:$48 sps:$4 sm:$0xff]  }
 0x428   :  { %3671 = vmatpush1.bf16.msra.mxu0 %v7654_v41  ;;  %3586 = vmatprep.subr.bf16.mxu1 %v7659_v42  ;;  %v7743_v41 = vld [vmem:[#allocation8 + $0x3e4] ss:$48 sps:$4 sm:$0xff]   ;;  %v7746_v42 = vld [vmem:[#allocation8 + $0x3ec] ss:$48 sps:$4 sm:$0xff]  }
 0x429   :  { %3672 = vmatprep.subr.bf16.mxu0 %v7662_v43  ;;  %v7741_v43 = vld [vmem:[#allocation8 + $0x3e0] ss:$48 sps:$4 sm:$0xff]  }
 0x42b   :  { %3587 = vmatpush1.bf16.msra.mxu1 %v7657_v44  ;;  %v7744_v44 = vld [vmem:[#allocation8 + $0x3e8] ss:$48 sps:$4 sm:$0xff]  }
 0x42c   :  { %3673 = vmatpush1.bf16.msra.mxu0 %v7660_v45  ;;  %3588 = vmatprep.subr.bf16.mxu1 %v7665_v46  ;;  %v7749_v45 = vld [vmem:[#allocation8 + $0x444] ss:$48 sps:$4 sm:$0xff]   ;;  %v7752_v46 = vld [vmem:[#allocation8 + $0x44c] ss:$48 sps:$4 sm:$0xff]  }
 0x42d   :  { %3674 = vmatprep.subr.bf16.mxu0 %v7668_v47  ;;  %v7747_v47 = vld [vmem:[#allocation8 + $0x440] ss:$48 sps:$4 sm:$0xff]  }
 0x42f   :  { %3589 = vmatpush1.bf16.msra.mxu1 %v7663_v48  ;;  %v7750_v48 = vld [vmem:[#allocation8 + $0x448] ss:$48 sps:$4 sm:$0xff]  }
 0x430   :  { %3675 = vmatpush1.bf16.msra.mxu0 %v7666_v49  ;;  %3590 = vmatprep.subr.bf16.mxu1 %v7671_v50  ;;  %v7755_v49 = vld [vmem:[#allocation8 + $0x4a4] ss:$48 sps:$4 sm:$0xff]   ;;  %v7758_v50 = vld [vmem:[#allocation8 + $0x4ac] ss:$48 sps:$4 sm:$0xff]  }
 0x431   :  { %3676 = vmatprep.subr.bf16.mxu0 %v7674_v53  ;;  %v7753_v53 = vld [vmem:[#allocation8 + $0x4a0] ss:$48 sps:$4 sm:$0xff]  }
 0x433   :  { %3591 = vmatpush1.bf16.msra.mxu1 %v7669_v54  ;;  %v7756_v54 = vld [vmem:[#allocation8 + $0x4a8] ss:$48 sps:$4 sm:$0xff]  }
 0x434   :  { %3677 = vmatpush1.bf16.msra.mxu0 %v7672_v55  ;;  %3592 = vmatprep.subr.bf16.mxu1 %v7677_v56  ;;  %v7761_v55 = vld [vmem:[#allocation8 + $0x504] ss:$48 sps:$4 sm:$0xff]   ;;  %v7764_v56 = vld [vmem:[#allocation8 + $0x50c] ss:$48 sps:$4 sm:$0xff]  }
 0x435   :  { %3678 = vmatprep.subr.bf16.mxu0 %v7680_v57  ;;  %v7759_v57 = vld [vmem:[#allocation8 + $0x500] ss:$48 sps:$4 sm:$0xff]  }
 0x437   :  { %3593 = vmatpush1.bf16.msra.mxu1 %v7675_v58  ;;  %v7762_v58 = vld [vmem:[#allocation8 + $0x508] ss:$48 sps:$4 sm:$0xff]  }
 0x438   :  { %3679 = vmatpush1.bf16.msra.mxu0 %v7678_v59  ;;  %3707 = vmatprep.subr.bf16.mxu1 %v7683_v60  ;;  %v7767_v59 = vld [vmem:[#allocation8 + $0x564] ss:$48 sps:$4 sm:$0xff]   ;;  %v7770_v60 = vld [vmem:[#allocation8 + $0x56c] ss:$48 sps:$4 sm:$0xff]  }
 0x439   :  { %3793 = vmatprep.subr.bf16.mxu0 %v7686_v61  ;;  %v7765_v61 = vld [vmem:[#allocation8 + $0x560] ss:$48 sps:$4 sm:$0xff]  }
 0x43a   :  { %3611 = vmatmul.mubr.bf16.vlgmr.msra.gmra.mrb[16].mxu1 %v9158_v11 }
 0x43b   :  { %3697 = vmatmul.mubr.bf16.vlgmr.msra.gmra.mrb[8].mxu0 %v9158_v11  ;;  %3708 = vmatpush1.bf16.msra.mxu1 %v7681_v62  ;;  %v7768_v62 = vld [vmem:[#allocation8 + $0x568] ss:$48 sps:$4 sm:$0xff]  }
 0x43c   :  { %3739 = vmatprep.mubr.bf16.mxu1 %v9147_v20  ;;  %3794 = vmatpush1.bf16.msra.mxu0 %v7684_v63  ;;  %v7773_v63 = vld [vmem:[#allocation8 + $0x5c4] ss:$48 sps:$4 sm:$0xff]  }
 0x43d   :  { %3825 = vmatprep.mubr.bf16.mxu0 %v9147_v20  ;;  %3709 = vmatprep.subr.bf16.mxu1 %v7689_v0  ;;  %v7705_v20 = vld [vmem:[#allocation8 + $0x1a0] ss:$48 sps:$4 sm:$0xff]   ;;  %v7776_v0 = vld [vmem:[#allocation8 + $0x5cc] ss:$48 sps:$4 sm:$0xff]  }
 0x43e   :  { %3795 = vmatprep.subr.bf16.mxu0 %v7692_v25  ;;  %v7771_v25 = vld [vmem:[#allocation8 + $0x5c0] ss:$48 sps:$4 sm:$0xff]  }
 0x43f   :  { %3710 = vmatpush1.bf16.msra.mxu1 %v7687_v26  ;;  %v7774_v26 = vld [vmem:[#allocation8 + $0x5c8] ss:$48 sps:$4 sm:$0xff]  }
 0x440   :  { %3796 = vmatpush1.bf16.msra.mxu0 %v7690_v1  ;;  %3711 = vmatprep.subr.bf16.mxu1 %v7695_v2  ;;  %v7779_v1 = vld [vmem:[#allocation8 + $0x624] ss:$48 sps:$4 sm:$0xff]   ;;  %v7782_v2 = vld [vmem:[#allocation8 + $0x62c] ss:$48 sps:$4 sm:$0xff]  }
 0x441   :  { %3797 = vmatprep.subr.bf16.mxu0 %v7698_v3  ;;  %v7777_v3 = vld [vmem:[#allocation8 + $0x620] ss:$48 sps:$4 sm:$0xff]  }
 0x443   :  { %3712 = vmatpush1.bf16.msra.mxu1 %v7693_v4  ;;  %v7780_v4 = vld [vmem:[#allocation8 + $0x628] ss:$48 sps:$4 sm:$0xff]  }
 0x444   :  { %3798 = vmatpush1.bf16.msra.mxu0 %v7696_v5  ;;  %3713 = vmatprep.subr.bf16.mxu1 %v7701_v35  ;;  %v7785_v5 = vld [vmem:[#allocation8 + $0x684] ss:$48 sps:$4 sm:$0xff]   ;;  %v7788_v35 = vld [vmem:[#allocation8 + $0x68c] ss:$48 sps:$4 sm:$0xff]  }
 0x445   :  { %3799 = vmatprep.subr.bf16.mxu0 %v7704_v6  ;;  %v7783_v6 = vld [vmem:[#allocation8 + $0x680] ss:$48 sps:$4 sm:$0xff]  }
 0x447   :  { %3714 = vmatpush1.bf16.msra.mxu1 %v7699_v36  ;;  %v7786_v36 = vld [vmem:[#allocation8 + $0x688] ss:$48 sps:$4 sm:$0xff]  }
 0x448   :  { %3800 = vmatpush1.bf16.msra.mxu0 %v7702_v7  ;;  %3715 = vmatprep.subr.bf16.mxu1 %v7707_v8  ;;  %v7791_v7 = vld [vmem:[#allocation8 + $0x6e4] ss:$48 sps:$4 sm:$0xff]   ;;  %v7794_v8 = vld [vmem:[#allocation8 + $0x6ec] ss:$48 sps:$4 sm:$0xff]  }
 0x449   :  { %3801 = vmatprep.subr.bf16.mxu0 %v7710_v9  ;;  %v7789_v9 = vld [vmem:[#allocation8 + $0x6e0] ss:$48 sps:$4 sm:$0xff]  }
 0x44b   :  { %3716 = vmatpush1.bf16.msra.mxu1 %v7705_v20  ;;  %v7792_v20 = vld [vmem:[#allocation8 + $0x6e8] ss:$48 sps:$4 sm:$0xff]  }
 0x44c   :  { %3802 = vmatpush1.bf16.msra.mxu0 %v7708_v10  ;;  %3717 = vmatprep.subr.bf16.mxu1 %v7713_v12  ;;  %v7797_v10 = vld [vmem:[#allocation8 + $0x744] ss:$48 sps:$4 sm:$0xff]   ;;  %v7795_v12 = vld [vmem:[#allocation8 + $0x740] ss:$48 sps:$4 sm:$0xff]  }
 0x44d   :  { %3803 = vmatprep.subr.bf16.mxu0 %v7716_v13  ;;  %v7798_v13 = vld [vmem:[#allocation8 + $0x748] ss:$48 sps:$4 sm:$0xff]  }
 0x44f   :  { %3718 = vmatpush1.bf16.msra.mxu1 %v7711_v14  ;;  %v7803_v14 = vld [vmem:[#allocation8 + $0x7a4] ss:$48 sps:$4 sm:$0xff]  }
 0x450   :  { %3804 = vmatpush1.bf16.msra.mxu0 %v7714_v15  ;;  %3719 = vmatprep.subr.bf16.mxu1 %v7719_v16  ;;  %v7806_v15 = vld [vmem:[#allocation8 + $0x7ac] ss:$48 sps:$4 sm:$0xff]   ;;  %v7801_v16 = vld [vmem:[#allocation8 + $0x7a0] ss:$48 sps:$4 sm:$0xff]  }
 0x451   :  { %3805 = vmatprep.subr.bf16.mxu0 %v7722_v17  ;;  %v7804_v17 = vld [vmem:[#allocation8 + $0x7a8] ss:$48 sps:$4 sm:$0xff]  }
 0x453   :  { %3720 = vmatpush1.bf16.msra.mxu1 %v7717_v18  ;;  %v7809_v18 = vld [vmem:[#allocation8 + $0x804] ss:$48 sps:$4 sm:$0xff]  }
 0x454   :  { %3806 = vmatpush1.bf16.msra.mxu0 %v7720_v19  ;;  %3721 = vmatprep.subr.bf16.mxu1 %v7725_v21  ;;  %v7812_v19 = vld [vmem:[#allocation8 + $0x80c] ss:$48 sps:$4 sm:$0xff]   ;;  %v7807_v21 = vld [vmem:[#allocation8 + $0x800] ss:$48 sps:$4 sm:$0xff]  }
 0x455   :  { %3807 = vmatprep.subr.bf16.mxu0 %v7728_v22  ;;  %v7810_v22 = vld [vmem:[#allocation8 + $0x808] ss:$48 sps:$4 sm:$0xff]  }
 0x457   :  { %3722 = vmatpush1.bf16.msra.mxu1 %v7723_v23  ;;  %v7815_v23 = vld [vmem:[#allocation8 + $0x864] ss:$48 sps:$4 sm:$0xff]  }
 0x458   :  { %3808 = vmatpush1.bf16.msra.mxu0 %v7726_v24  ;;  %3723 = vmatprep.subr.bf16.mxu1 %v7731_v28  ;;  %v7818_v24 = vld [vmem:[#allocation8 + $0x86c] ss:$48 sps:$4 sm:$0xff]   ;;  %v7813_v28 = vld [vmem:[#allocation8 + $0x860] ss:$48 sps:$4 sm:$0xff]  }
 0x459   :  { %3809 = vmatprep.subr.bf16.mxu0 %v7734_v27  ;;  %v7816_v27 = vld [vmem:[#allocation8 + $0x868] ss:$48 sps:$4 sm:$0xff]  }
 0x45b   :  { %3724 = vmatpush1.bf16.msra.mxu1 %v7729_v31  ;;  %v7821_v31 = vld [vmem:[#allocation8 + $0x8c4] ss:$48 sps:$4 sm:$0xff]  }
 0x45c   :  { %3810 = vmatpush1.bf16.msra.mxu0 %v7732_v32  ;;  %3725 = vmatprep.subr.bf16.mxu1 %v7737_v33  ;;  %v7824_v32 = vld [vmem:[#allocation8 + $0x8cc] ss:$48 sps:$4 sm:$0xff]   ;;  %v7819_v33 = vld [vmem:[#allocation8 + $0x8c0] ss:$48 sps:$4 sm:$0xff]  }
 0x45d   :  { %3811 = vmatprep.subr.bf16.mxu0 %v7740_v34  ;;  %v7822_v34 = vld [vmem:[#allocation8 + $0x8c8] ss:$48 sps:$4 sm:$0xff]  }
 0x45f   :  { %3726 = vmatpush1.bf16.msra.mxu1 %v7735_v38  ;;  %v8411_v38 = vmov 0.0  }
 0x460   :  { %3812 = vmatpush1.bf16.msra.mxu0 %v7738_v39  ;;  %3727 = vmatprep.subr.bf16.mxu1 %v7743_v41  ;;  %4725 = vst [vmem:[#allocation20] sm:$0xff] %v8411_v38  ;;  %4726 = vst [vmem:[#allocation20 + $0x8] sm:$0xff] %v8411_v38  ;;  %v1859_v39 = vld [vmem:[#allocation10] sm:$0xff]  ;;  %v1877_v41 = vsub.s32 3, %v9090_v29 }
 0x461   :  { %3813 = vmatprep.subr.bf16.mxu0 %v7746_v42  ;;  %v1866_v42 = vrot.slane %v1859_v39, %v9101_v51 }
 0x463   :  { %3728 = vmatpush1.bf16.msra.mxu1 %v7741_v43  ;;  %v1874_v43 = vrot.slane %v1859_v39, %v9093_v30 }
 0x464   :  { %3814 = vmatpush1.bf16.msra.mxu0 %v7744_v44  ;;  %3729 = vmatprep.subr.bf16.mxu1 %v7749_v45 }
 0x465   :  { %3815 = vmatprep.subr.bf16.mxu0 %v7752_v46  ;;  %v1870_v46 = vrot.slane %v1859_v39, %v9104_v52 }
 0x467   :  { %3730 = vmatpush1.bf16.msra.mxu1 %v7747_v47 }
 0x468   :  { %3816 = vmatpush1.bf16.msra.mxu0 %v7750_v48  ;;  %3731 = vmatprep.subr.bf16.mxu1 %v7755_v49 }
 0x469   :  { %3817 = vmatprep.subr.bf16.mxu0 %v7758_v50 }
 0x46b   :  { %3732 = vmatpush1.bf16.msra.mxu1 %v7753_v53 }
 0x46c   :  { %3818 = vmatpush1.bf16.msra.mxu0 %v7756_v54  ;;  %3733 = vmatprep.subr.bf16.mxu1 %v7761_v55 }
 0x46d   :  { %3819 = vmatprep.subr.bf16.mxu0 %v7764_v56 }
 0x46f   :  { %3734 = vmatpush1.bf16.msra.mxu1 %v7759_v57 }
 0x470   :  { %3820 = vmatpush1.bf16.msra.mxu0 %v7762_v58  ;;  %3735 = vmatprep.subr.bf16.mxu1 %v7767_v59 }
 0x471   :  { %3821 = vmatprep.subr.bf16.mxu0 %v7770_v60 }
 0x473   :  { %3736 = vmatpush1.bf16.msra.mxu1 %v7765_v61 }
 0x474   :  { %3822 = vmatpush1.bf16.msra.mxu0 %v7768_v62  ;;  %3737 = vmatprep.subr.bf16.mxu1 %v7773_v63 }
 0x475   :  { %3823 = vmatprep.subr.bf16.mxu0 %v7776_v0 }
 0x477   :  { %3738 = vmatpush1.bf16.msra.mxu1 %v7771_v25 }
 0x478   :  { %3824 = vmatpush1.bf16.msra.mxu0 %v7774_v26  ;;  %3750 = vmatprep.subr.bf16.mxu1 %v7779_v1  ;;  %v1881_v1 = vsub.s32 4, %v9090_v29 }
 0x479   :  { %3836 = vmatprep.subr.bf16.mxu0 %v7782_v2  ;;  %v1889_v2 = vsub.s32 6, %v9090_v29 }
 0x47a   :  { %3740 = vmatmul.mubr.bf16.vlgmr.msra.gmra.mrb[20].mxu1 %v9149_v37 }
 0x47b   :  { %3826 = vmatmul.mubr.bf16.vlgmr.msra.gmra.mrb[12].mxu0 %v9149_v37  ;;  %3751 = vmatpush1.bf16.msra.mxu1 %v7777_v3  ;;  %v7800_v37 = vld [vmem:[#allocation8 + $0x74c] ss:$48 sps:$4 sm:$0xff]   ;;  %v1885_v3 = vsub.s32 5, %v9090_v29 }
 0x47c   :  { %3837 = vmatpush1.bf16.msra.mxu0 %v7780_v4  ;;  %3752 = vmatprep.subr.bf16.mxu1 %v7785_v5  ;;  %v1893_v4 = vsub.s32 7, %v9090_v29  ;;  %v1882_v5 = vrot.slane %v1859_v39, %v1881_v1 }
 0x47d   :  { %3838 = vmatprep.subr.bf16.mxu0 %v7788_v35  ;;  %3782 = vmatprep.mubr.bf16.mxu1 %v8410_v40 }
 0x47e   :  { %3868 = vmatprep.mubr.bf16.mxu0 %v8410_v40 }
 0x47f   :  { %3753 = vmatpush1.bf16.msra.mxu1 %v7783_v6  ;;  %v1890_v6 = vrot.slane %v1859_v39, %v1889_v2 }
 0x480   :  { %3839 = vmatpush1.bf16.msra.mxu0 %v7786_v36  ;;  %3754 = vmatprep.subr.bf16.mxu1 %v7791_v7  ;;  %v1886_v36 = vrot.slane %v1859_v39, %v1885_v3 }
 0x481   :  { %3840 = vmatprep.subr.bf16.mxu0 %v7794_v8 }
 0x483   :  { %3755 = vmatpush1.bf16.msra.mxu1 %v7789_v9  ;;  %v1894_v9 = vrot.slane %v1859_v39, %v1893_v4 }
 0x484   :  { %3841 = vmatpush1.bf16.msra.mxu0 %v7792_v20  ;;  %3756 = vmatprep.subr.bf16.mxu1 %v7797_v10 }
 0x485   :  { %3842 = vmatprep.subr.bf16.mxu0 %v7800_v37 }
 0x487   :  { %3757 = vmatpush1.bf16.msra.mxu1 %v7795_v12 }
 0x488   :  { %3843 = vmatpush1.bf16.msra.mxu0 %v7798_v13  ;;  %3758 = vmatprep.subr.bf16.mxu1 %v7803_v14 }
 0x489   :  { %3844 = vmatprep.subr.bf16.mxu0 %v7806_v15 }
 0x48b   :  { %3759 = vmatpush1.bf16.msra.mxu1 %v7801_v16 }
 0x48c   :  { %3845 = vmatpush1.bf16.msra.mxu0 %v7804_v17  ;;  %3760 = vmatprep.subr.bf16.mxu1 %v7809_v18 }
 0x48d   :  { %3846 = vmatprep.subr.bf16.mxu0 %v7812_v19 }
 0x48f   :  { %3761 = vmatpush1.bf16.msra.mxu1 %v7807_v21 }
 0x490   :  { %3847 = vmatpush1.bf16.msra.mxu0 %v7810_v22  ;;  %3762 = vmatprep.subr.bf16.mxu1 %v7815_v23 }
 0x491   :  { %3848 = vmatprep.subr.bf16.mxu0 %v7818_v24 }
 0x493   :  { %3763 = vmatpush1.bf16.msra.mxu1 %v7813_v28 }
 0x494   :  { %3849 = vmatpush1.bf16.msra.mxu0 %v7816_v27  ;;  %3764 = vmatprep.subr.bf16.mxu1 %v7821_v31 }
 0x495   :  { %3850 = vmatprep.subr.bf16.mxu0 %v7824_v32 }
 0x497   :  { %3765 = vmatpush1.bf16.msra.mxu1 %v7819_v33 }
 0x498   :  { %3851 = vmatpush1.bf16.msra.mxu0 %v7822_v34  ;;  %6998 = vmatprep.subr.bf16.mxu1 %v8411_v38 }
 0x499   :  { %7070 = vmatprep.subr.bf16.mxu0 %v8411_v38 }
 0x49a   :  { %3783 = vmatmul.mubr.bf16.vlgmr.msra.gmra.mrb[20].mxu1 %v9158_v11 }
 0x49b   :  { %3869 = vmatmul.mubr.bf16.vlgmr.msra.gmra.mrb[12].mxu0 %v9158_v11  ;;  %7000 = vmatprep.mubr.msk.bf16.mxu1 %vm8412_vm0, %v8411_v38  ;;  %v1878_v11 = vrot.slane %v1859_v39, %v1877_v41 }
 0x49c   :  { %7072 = vmatprep.mubr.msk.bf16.mxu0 %vm8412_vm0, %v8411_v38 }
 0x4ad   :  { %v3440_v44 = vpop.f32.mrb[12].mxu1  ;;  %v3526_v45 = vpop.f32.mrb[4].mxu0 }
 0x4ae   :  { %v3442_v47 = vpop.f32.mrb[13].mxu1  ;;  %v3528_v48 = vpop.f32.mrb[5].mxu0  ;;  %v7098_v53 = vadd.f32 %v3440_v44, %v1866_v42  ;;  %v7102_v54 = vadd.f32 %v3526_v45, %v1874_v43  ;;  %v1860_v45 = vld [vmem:[#allocation10 + $0x8] sm:$0xf] }
 0x4af   :  { %v3444_v49 = vpop.f32.mrb[14].mxu1  ;;  %v3530_v50 = vpop.f32.mrb[6].mxu0  ;;  %v7099_v59 = vadd.f32 %v3442_v47, %v1870_v46  ;;  %v7103_v60 = vadd.f32 %v3528_v48, %v1878_v11  ;;  %v1898_v47 = vrot.slane %v1860_v45, %v9101_v51  ;;  %v1910_v48 = vrot.slane %v1860_v45, %v1877_v41 }
 0x4b0   :  { %v7100_v55 = vadd.f32 %v3444_v49, %v1866_v42  ;;  %v7104_v56 = vadd.f32 %v3530_v50, %v1874_v43  ;;  %v3446_v57 = vpop.f32.mrb[15].mxu1  ;;  %v3532_v58 = vpop.f32.mrb[7].mxu0 }
 0x4b1   :  { %v7101_v61 = vadd.f32 %v3446_v57, %v1870_v46  ;;  %v7105_v62 = vadd.f32 %v3532_v58, %v1878_v11  ;;  %v1906_v46 = vrot.slane %v1860_v45, %v9093_v30  ;;  %v1902_v11 = vrot.slane %v1860_v45, %v9104_v52 }
 0x4b2   :  { %v3879_v63 = vpack.c.bf16 %v7100_v55, %v7098_v53  ;;  %v9192_v0 = vpack.c.bf16 %v7104_v56, %v7102_v54 }
 0x4b3   :  { %v3880_v25 = vpack.c.bf16 %v7101_v61, %v7099_v59  ;;  %v9194_v26 = vpack.c.bf16 %v7105_v62, %v7103_v60 }
 0x4b4   :  { %v3892_v32 = vrot.slane %v3879_v63, 4  ;;  %v3898_v42 = vrot.slane %v9192_v0, 4 }
 0x4b5   :  { %v3895_v34 = vrot.slane %v3880_v25, 4  ;;  %v3901_v44 = vrot.slane %v9194_v26, 4 }
 0x50d   :  { %v3612_v35 = vpop.f32.mrb[16].mxu1 }
 0x50e   :  { %v3698_v7 = vpop.f32.mrb[8].mxu0  ;;  %v3614_v8 = vpop.f32.mrb[17].mxu1  ;;  %v7106_v37 = vadd.f32 %v3612_v35, %v1882_v5 }
 0x50f   :  { %v3700_v20 = vpop.f32.mrb[9].mxu0  ;;  %v3616_v10 = vpop.f32.mrb[18].mxu1  ;;  %v7110_v15 = vadd.f32 %v3698_v7, %v1890_v6  ;;  %v7107_v16 = vadd.f32 %v3614_v8, %v1886_v36 }
 0x510   :  { %v7108_v12 = vadd.f32 %v3616_v10, %v1882_v5  ;;  %v3702_v13 = vpop.f32.mrb[10].mxu0  ;;  %v3618_v14 = vpop.f32.mrb[19].mxu1  ;;  %v7111_v21 = vadd.f32 %v3700_v20, %v1894_v9 }
 0x511   :  { %v7112_v17 = vadd.f32 %v3702_v13, %v1890_v6  ;;  %v7109_v18 = vadd.f32 %v3618_v14, %v1886_v36  ;;  %v3704_v19 = vpop.f32.mrb[11].mxu0 }
 0x512   :  { %v3883_v22 = vpack.c.bf16 %v7108_v12, %v7106_v37  ;;  %v7113_v23 = vadd.f32 %v3704_v19, %v1894_v9 }
 0x513   :  { %v3885_v24 = vpack.c.bf16 %v7112_v17, %v7110_v15  ;;  %v3884_v28 = vpack.c.bf16 %v7109_v18, %v7107_v16 }
 0x514   :  { %v3886_v27 = vpack.c.bf16 %v7113_v23, %v7111_v21  ;;  %6999 = vmatpush3.bf16.xpose.msra.mxu1 %v3883_v22  ;;  %v3904_v31 = vrot.slane %v3883_v22, 4 }
 0x515   :  { %7004 = vmatprep.subr.bf16.mxu1 %v8411_v38  ;;  %v3907_v33 = vrot.slane %v3884_v28, 4  ;;  %v3910_v39 = vrot.slane %v3885_v24, 4 }
 0x516   :  { %v3913_v43 = vrot.slane %v3886_v27, 4 }
 0x51b   :  { %7001 = vmatmul.mubr.bf16.vlgmr.msra.gmra.mrb[24].mxu1 %v3879_v63 }
 0x51c   :  { %7005 = vmatpush3.bf16.xpose.msra.mxu1 %v3884_v28  ;;  %7006 = vmatprep.mubr.msk.bf16.mxu1 %vm8412_vm0, %v8411_v38 }
 0x51d   :  { %7010 = vmatprep.subr.bf16.mxu1 %v8411_v38 }
 0x523   :  { %7007 = vmatmul.mubr.bf16.vlgmr.msra.gmra.mrb[28].mxu1 %v3880_v25 }
 0x524   :  { %7011 = vmatpush3.bf16.xpose.msra.mxu1 %v3885_v24  ;;  %7012 = vmatprep.mubr.msk.bf16.mxu1 %vm8412_vm0, %v8411_v38 }
 0x525   :  { %7016 = vmatprep.subr.bf16.mxu1 %v8411_v38 }
 0x52b   :  { %7013 = vmatmul.mubr.bf16.vlgmr.msra.gmra.mrb[32].mxu1 %v9192_v0 }
 0x52c   :  { %7017 = vmatpush3.bf16.xpose.msra.mxu1 %v3886_v27  ;;  %7018 = vmatprep.mubr.msk.bf16.mxu1 %vm8412_vm0, %v8411_v38 }
 0x52d   :  { %7022 = vmatprep.subr.bf16.mxu1 %v8411_v38 }
 0x533   :  { %7019 = vmatmul.mubr.bf16.vlgmr.msra.gmra.mrb[36].mxu1 %v9194_v26 }
 0x534   :  { %7023 = vmatpush3.bf16.xpose.msra.mxu1 %v3904_v31  ;;  %7024 = vmatprep.mubr.msk.bf16.mxu1 %vm8412_vm0, %v8411_v38 }
 0x535   :  { %7028 = vmatprep.subr.bf16.mxu1 %v8411_v38 }
 0x53b   :  { %7025 = vmatmul.mubr.bf16.vlgmr.msra.gmra.mrb[40].mxu1 %v3892_v32 }
 0x53c   :  { %7029 = vmatpush3.bf16.xpose.msra.mxu1 %v3907_v33  ;;  %7030 = vmatprep.mubr.msk.bf16.mxu1 %vm8412_vm0, %v8411_v38 }
 0x53d   :  { %7034 = vmatprep.subr.bf16.mxu1 %v8411_v38 }
 0x543   :  { %7031 = vmatmul.mubr.bf16.vlgmr.msra.gmra.mrb[44].mxu1 %v3895_v34 }
 0x544   :  { %7035 = vmatpush3.bf16.xpose.msra.mxu1 %v3910_v39  ;;  %7036 = vmatprep.mubr.msk.bf16.mxu1 %vm8412_vm0, %v8411_v38 }
 0x545   :  { %7040 = vmatprep.subr.bf16.mxu1 %v8411_v38 }
 0x54b   :  { %7037 = vmatmul.mubr.bf16.vlgmr.msra.gmra.mrb[48].mxu1 %v3898_v42 }
 0x54c   :  { %7041 = vmatpush3.bf16.xpose.msra.mxu1 %v3913_v43  ;;  %7042 = vmatprep.mubr.msk.bf16.mxu1 %vm8412_vm0, %v8411_v38 }
 0x54d   :  { %7046 = vmatprep.subr.bf16.mxu1 %v8411_v38 }
 0x553   :  { %7043 = vmatmul.mubr.bf16.vlgmr.msra.gmra.mrb[52].mxu1 %v3901_v44 }
 0x554   :  { %7048 = vmatprep.mubr.msk.bf16.mxu1 %vm8412_vm0, %v8411_v38 }
 0x56d   :  { %v3784_v49 = vpop.f32.mrb[20].mxu1 }
 0x56e   :  { %v3870_v50 = vpop.f32.mrb[12].mxu0  ;;  %v3786_v53 = vpop.f32.mrb[21].mxu1  ;;  %v7114_v58 = vadd.f32 %v3784_v49, %v1898_v47 }
 0x56f   :  { %v7118_v54 = vadd.f32 %v3870_v50, %v1906_v46  ;;  %v7115_v55 = vadd.f32 %v3786_v53, %v1902_v11  ;;  %v3872_v56 = vpop.f32.mrb[13].mxu0  ;;  %v3788_v57 = vpop.f32.mrb[22].mxu1 }
 0x570   :  { %v7119_v59 = vadd.f32 %v3872_v56, %v1910_v48  ;;  %v7116_v60 = vadd.f32 %v3788_v57, %v1898_v47  ;;  %v3874_v61 = vpop.f32.mrb[14].mxu0  ;;  %v3790_v62 = vpop.f32.mrb[23].mxu1 }
 0x571   :  { %v7120_v63 = vadd.f32 %v3874_v61, %v1906_v46  ;;  %v7117_v0 = vadd.f32 %v3790_v62, %v1902_v11  ;;  %v3876_v25 = vpop.f32.mrb[15].mxu0 }
 0x572   :  { %v3887_v26 = vpack.c.bf16 %v7116_v60, %v7114_v58  ;;  %v7121_v1 = vadd.f32 %v3876_v25, %v1910_v48 }
 0x573   :  { %v3889_v29 = vpack.c.bf16 %v7120_v63, %v7118_v54  ;;  %v3888_v41 = vpack.c.bf16 %v7117_v0, %v7115_v55 }
 0x574   :  { %v3916_v2 = vrot.slane %v3887_v26, 4  ;;  %v3890_v3 = vpack.c.bf16 %v7121_v1, %v7119_v59  ;;  %v4353_v4 = vsel %vm4351_vm1, %v3887_v26, 0 }
 0x575   :  { %v3920_v5 = vrot.slane %v3889_v29, 4  ;;  %v3918_v35 = vrot.slane %v3888_v41, 4  ;;  %7047 = vmatpush3.bf16.msra.mxu1 %v4353_v4  ;;  %v9235_v6 = vsel %vm4351_vm1, %v3888_v41, 0  ;;  %v9238_v36 = vsel %vm4351_vm1, %v3889_v29, 0 }
 0x576   :  { %v3922_v7 = vrot.slane %v3890_v3, 4  ;;  %v4537_v8 = vsel %vm4351_vm1, %v3916_v2, 0  ;;  %7052 = vmatprep.subr.bf16.mxu1 %v8411_v38  ;;  %v9243_v9 = vsel %vm4351_vm1, %v3890_v3, 0 }
 0x577   :  { %7071 = vmatpush3.bf16.msra.mxu0 %v4537_v8  ;;  %v9246_v20 = vsel %vm4351_vm1, %v3918_v35, 0  ;;  %v9249_v10 = vsel %vm4351_vm1, %v3920_v5, 0 }
 0x578   :  { %7082 = vmatprep.subr.bf16.mxu0 %v8411_v38  ;;  %v9253_v37 = vsel %vm4351_vm1, %v3922_v7, 0 }
 0x5ee   :  { %v3957_v12 = vpop.f32.mrb[24].mxu1 }
 0x5ef   :  { %v4243_v13 = vmul.f32 0.10206208, %v3957_v12  ;;  %v7002_v14 = vpop.f32.mrb[25].mxu1 }
 0x5f0   :  { %v3960_v15 = vpop.f32.mrb[26].mxu1 }
 0x5f1   :  { %v7003_v16 = vpop.f32.mrb[27].mxu1  ;;  %v4252_v17 = vsel %vm4251_vm2, %v4243_v13, -inf }
 0x5f2   :  { %4253 = vmax.xlane.f32.xlu0 %v4252_v17 }
 0x5f6   :  { %v3997_v18 = vpop.f32.mrb[28].mxu1 }
 0x5f7   :  { %v4244_v19 = vmul.f32 0.10206208, %v3997_v18  ;;  %v7008_v21 = vpop.f32.mrb[29].mxu1 }
 0x5f8   :  { %v4000_v22 = vpop.f32.mrb[30].mxu1 }
 0x5f9   :  { %v7009_v23 = vpop.f32.mrb[31].mxu1  ;;  %v4255_v24 = vsel %vm4251_vm2, %v4244_v19, -inf }
 0x5fa   :  { %4256 = vmax.xlane.f32.xlu1 %v4255_v24 }
 0x5fe   :  { %v4037_v28 = vpop.f32.mrb[32].mxu1 }
 0x5ff   :  { %v4245_v27 = vmul.f32 0.10206208, %v4037_v28  ;;  %v7014_v31 = vpop.f32.mrb[33].mxu1 }
 0x600   :  { %v4040_v32 = vpop.f32.mrb[34].mxu1 }
 0x601   :  { %v7015_v33 = vpop.f32.mrb[35].mxu1  ;;  %v4258_v34 = vsel %vm4251_vm2, %v4245_v27, -inf }
 0x602   :  { %4259 = vmax.xlane.f32.xlu0 %v4258_v34 }
 0x606   :  { %v4077_v39 = vpop.f32.mrb[36].mxu1 }
 0x607   :  { %v4246_v42 = vmul.f32 0.10206208, %v4077_v39  ;;  %v7020_v43 = vpop.f32.mrb[37].mxu1 }
 0x608   :  { %v4080_v44 = vpop.f32.mrb[38].mxu1 }
 0x609   :  { %v7021_v45 = vpop.f32.mrb[39].mxu1  ;;  %v4261_v46 = vsel %vm4251_vm2, %v4246_v42, -inf }
 0x60a   :  { %4262 = vmax.xlane.f32.xlu1 %v4261_v46 }
 0x60e   :  { %v4117_v11 = vpop.f32.mrb[40].mxu1 }
 0x60f   :  { %v4247_v47 = vmul.f32 0.10206208, %v4117_v11  ;;  %v7026_v48 = vpop.f32.mrb[41].mxu1 }
 0x610   :  { %v4120_v49 = vpop.f32.mrb[42].mxu1 }
 0x611   :  { %v7027_v50 = vpop.f32.mrb[43].mxu1  ;;  %v4264_v53 = vsel %vm4251_vm2, %v4247_v47, -inf }
 0x612   :  { %4265 = vmax.xlane.f32.xlu1 %v4264_v53 }
 0x616   :  { %v4157_v54 = vpop.f32.mrb[44].mxu1 }
 0x617   :  { %v4248_v55 = vmul.f32 0.10206208, %v4157_v54  ;;  %v7032_v56 = vpop.f32.mrb[45].mxu1 }
 0x618   :  { %v4160_v57 = vpop.f32.mrb[46].mxu1 }
 0x619   :  { %v7033_v58 = vpop.f32.mrb[47].mxu1  ;;  %v4267_v59 = vsel %vm4251_vm2, %v4248_v55, -inf }
 0x61a   :  { %4268 = vmax.xlane.f32.xlu0 %v4267_v59 }
 0x61e   :  { %v4197_v60 = vpop.f32.mrb[48].mxu1 }
 0x61f   :  { %v7038_v61 = vpop.f32.mrb[49].mxu1  ;;  %v4249_v12 = vmul.f32 0.10206208, %v4197_v60 }
 0x620   :  { %v4200_v62 = vpop.f32.mrb[50].mxu1 }
 0x621   :  { %v7039_v63 = vpop.f32.mrb[51].mxu1  ;;  %v4270_v18 = vsel %vm4251_vm2, %v4249_v12, -inf }
 0x626   :  { %v4237_v0 = vpop.f32.mrb[52].mxu1 }
 0x627   :  { %v4250_v25 = vmul.f32 0.10206208, %v4237_v0  ;;  %v7044_v26 = vpop.f32.mrb[53].mxu1 }
 0x628   :  { %v4240_v1 = vpop.f32.mrb[54].mxu1 }
 0x629   :  { %v7045_v29 = vpop.f32.mrb[55].mxu1  ;;  %v4273_v41 = vsel %vm4251_vm2, %v4250_v25, -inf }
 0x62a   :  { %4274 = vmax.xlane.f32.xlu1 %v4273_v41 }
 0x67f   :  { %v4254_v2 = vpop.xlane.xlu0 %4253 }
 0x680   :  { %v4276_v3 = vsub.f32 %v4243_v13, %v4254_v2 }
 0x682   :  { %v4284_v4 = vmul.f32 1.442695, %v4276_v3 }
 0x684   :  { %8057 = vpow2.f32 %v4284_v4 }
 0x687   :  { %v4257_v5 = vpop.xlane.xlu1 %4256 }
 0x688   :  { %v4277_v35 = vsub.f32 %v4244_v19, %v4257_v5 }
 0x68a   :  { %v4286_v7 = vmul.f32 1.442695, %v4277_v35 }
 0x68c   :  { %8059 = vpow2.f32 %v4286_v7 }
 0x68e   :  { %v8058_v8 = vpop.eup %8057 }
 0x68f   :  { %v4260_v14 = vpop.xlane.xlu0 %4259  ;;  %v4300_v15 = vsel %vm4251_vm2, %v8058_v8, 0.0 }
 0x690   :  { %v4278_v16 = vsub.f32 %v4245_v27, %v4260_v14  ;;  %4301 = vadd.xlane.f32.xlu0 %v4300_v15 }
 0x692   :  { %v4288_v17 = vmul.f32 1.442695, %v4278_v16 }
 0x694   :  { %8061 = vpow2.f32 %v4288_v17  ;;  %4271 = vmax.xlane.f32.xlu0 %v4270_v18  ;;  %v7827_v17 = vld [vmem:[#allocation11 + $0x4] ss:$12 sps:$4 sm:$0xff]  }
 0x696   :  { %v8060_v21 = vpop.eup %8059 }
 0x697   :  { %v4263_v13 = vpop.xlane.xlu1 %4262  ;;  %v4303_v22 = vsel %vm4251_vm2, %v8060_v21, 0.0 }
 0x698   :  { %v4279_v23 = vsub.f32 %v4246_v42, %v4263_v13  ;;  %4304 = vadd.xlane.f32.xlu1 %v4303_v22 }
 0x69a   :  { %v4290_v19 = vmul.f32 1.442695, %v4279_v23 }
 0x69c   :  { %8063 = vpow2.f32 %v4290_v19 }
 0x69e   :  { %v8062_v24 = vpop.eup %8061 }
 0x69f   :  { %v4266_v28 = vpop.xlane.xlu1 %4265  ;;  %v4306_v31 = vsel %vm4251_vm2, %v8062_v24, 0.0 }
 0x6a0   :  { %v4280_v32 = vsub.f32 %v4247_v47, %v4266_v28  ;;  %4307 = vadd.xlane.f32.xlu0 %v4306_v31  ;;  %v7853_v28 = vld [vmem:[#allocation11 + $0x8] ss:$12 sps:$4 sm:$0xff]   ;;  %v7857_v31 = vld [vmem:[#allocation11 + $0xe0] ss:$12 sps:$4 sm:$0xff]  }
 0x6a2   :  { %v4292_v27 = vmul.f32 1.442695, %v4280_v32  ;;  %v7858_v32 = vld [vmem:[#allocation11 + $0x20] ss:$12 sps:$4 sm:$0xff]  }
 0x6a4   :  { %8065 = vpow2.f32 %v4292_v27  ;;  %v7862_v27 = vld [vmem:[#allocation11 + $0xf8] ss:$12 sps:$4 sm:$0xff]  }
 0x6a6   :  { %v8064_v33 = vpop.eup %8063 }
 0x6a7   :  { %v4269_v34 = vpop.xlane.xlu0 %4268  ;;  %v4309_v39 = vsel %vm4251_vm2, %v8064_v33, 0.0 }
 0x6a8   :  { %v4281_v43 = vsub.f32 %v4248_v55, %v4269_v34  ;;  %4310 = vadd.xlane.f32.xlu1 %v4309_v39  ;;  %v7872_v34 = vld [vmem:[#allocation11 + $0x128] ss:$12 sps:$4 sm:$0xff]  }
 0x6a9   :  { %v7873_v39 = vld [vmem:[#allocation11 + $0x68] ss:$12 sps:$4 sm:$0xff]  }
 0x6aa   :  { %v4294_v44 = vmul.f32 1.442695, %v4281_v43  ;;  %v7877_v43 = vld [vmem:[#allocation11 + $0x140] ss:$12 sps:$4 sm:$0xff]  }
 0x6ac   :  { %8067 = vpow2.f32 %v4294_v44  ;;  %v7878_v44 = vld [vmem:[#allocation11 + $0x80] ss:$12 sps:$4 sm:$0xff]  }
 0x6ae   :  { %v9267_v42 = vpop.eup %8065 }
 0x6af   :  { %v4312_v45 = vsel %vm4251_vm2, %v9267_v42, 0.0 }
 0x6b0   :  { %4313 = vadd.xlane.f32.xlu1 %v4312_v45  ;;  %v7883_v45 = vld [vmem:[#allocation11 + $0x98] ss:$12 sps:$4 sm:$0xff]  }
 0x6b6   :  { %v9271_v46 = vpop.eup %8067 }
 0x6b7   :  { %v4275_v11 = vpop.xlane.xlu1 %4274  ;;  %v4315_v47 = vsel %vm4251_vm2, %v9271_v46, 0.0 }
 0x6b8   :  { %v4283_v48 = vsub.f32 %v4250_v25, %v4275_v11  ;;  %4316 = vadd.xlane.f32.xlu0 %v4315_v47  ;;  %v7888_v11 = vld [vmem:[#allocation11 + $0xb0] ss:$12 sps:$4 sm:$0xff]  }
 0x6ba   :  { %v4298_v49 = vmul.f32 1.442695, %v4283_v48 }
 0x6bc   :  { %8069 = vpow2.f32 %v4298_v49  ;;  %v7916_v49 = vld [vmem:[#allocation11 + $0x248] ss:$12 sps:$4 sm:$0xff]  }
 0x6c6   :  { %v9275_v50 = vpop.eup %8069 }
 0x6c7   :  { %v4321_v53 = vsel %vm4251_vm2, %v9275_v50, 0.0 }
 0x6c8   :  { %4322 = vadd.xlane.f32.xlu0 %v4321_v53  ;;  %v7825_v53 = vld [vmem:[#allocation11] ss:$12 sps:$4 sm:$0xff]  }
 0x71d   :  { %v4302_v54 = vpop.xlane.xlu0 %4301 }
 0x71e   :  { %8071 = vrcp.f32 %v4302_v54 }
 0x721   :  { %v4272_v55 = vpop.xlane.xlu0 %4271 }
 0x722   :  { %v4282_v56 = vsub.f32 %v4249_v12, %v4272_v55 }
 0x724   :  { %v4296_v57 = vmul.f32 1.442695, %v4282_v56  ;;  %v7830_v56 = vld [vmem:[#allocation11 + $0x1c] ss:$12 sps:$4 sm:$0xff]  }
 0x725   :  { %v4305_v58 = vpop.xlane.xlu1 %4304 }
 0x726   :  { %8073 = vpow2.f32 %v4296_v57 }
 0x727   :  { %8075 = vrcp.f32 %v4305_v58  ;;  %v7828_v58 = vld [vmem:[#allocation11 + $0x18] ss:$12 sps:$4 sm:$0xff]  }
 0x728   :  { %v8072_v59 = vpop.eup %8071 }
 0x729   :  { %v4325_v60 = vmul.f32 %v8072_v59, %v8058_v8  ;;  %v7833_v59 = vld [vmem:[#allocation11 + $0x34] ss:$12 sps:$4 sm:$0xff]  }
 0x72b   :  { %v4340_v61 = vpack.c.bf16 %v4325_v60, %v4325_v60 }
 0x72d   :  { %7049 = vmatmul.mubr.msk.bf16.vlgmr.msra.gmra.mrb[56].mxu1 %vm4251_vm2, %v4340_v61  ;;  %v4308_v62 = vpop.xlane.xlu0 %4307  ;;  %v7831_v61 = vld [vmem:[#allocation11 + $0x30] ss:$12 sps:$4 sm:$0xff]  }
 0x72e   :  { %7053 = vmatpush3.bf16.msra.mxu1 %v9235_v6  ;;  %8077 = vrcp.f32 %v4308_v62  ;;  %7054 = vmatprep.mubr.msk.bf16.mxu1 %vm8412_vm0, %v8411_v38  ;;  %v7836_v62 = vld [vmem:[#allocation11 + $0x4c] ss:$12 sps:$4 sm:$0xff]  }
 0x72f   :  { %7058 = vmatprep.subr.bf16.mxu1 %v8411_v38 }
 0x730   :  { %v9284_v63 = vpop.eup %8073 }
 0x731   :  { %v8076_v0 = vpop.eup %8075  ;;  %v4318_v25 = vsel %vm4251_vm2, %v9284_v63, 0.0 }
 0x732   :  { %v4327_v26 = vmul.f32 %v8076_v0, %v8060_v21  ;;  %4319 = vadd.xlane.f32.xlu1 %v4318_v25  ;;  %v7839_v0 = vld [vmem:[#allocation11 + $0x64] ss:$12 sps:$4 sm:$0xff]   ;;  %v7837_v25 = vld [vmem:[#allocation11 + $0x60] ss:$12 sps:$4 sm:$0xff]  }
 0x734   :  { %v4341_v1 = vpack.c.bf16 %v4327_v26, %v4327_v26  ;;  %v4717_v4 = vadd.f32 %v4327_v26, %v4325_v60  ;;  %v7842_v26 = vld [vmem:[#allocation11 + $0x7c] ss:$12 sps:$4 sm:$0xff]  }
 0x735   :  { %v4311_v29 = vpop.xlane.xlu1 %4310 }
 0x736   :  { %7055 = vmatmul.mubr.msk.bf16.vlgmr.msra.gmra.mrb[60].mxu1 %vm4251_vm2, %v4341_v1  ;;  %8079 = vrcp.f32 %v4311_v29  ;;  %v7840_v1 = vld [vmem:[#allocation11 + $0x78] ss:$12 sps:$4 sm:$0xff]   ;;  %v7845_v29 = vld [vmem:[#allocation11 + $0x94] ss:$12 sps:$4 sm:$0xff]  }
 0x737   :  { %7059 = vmatpush3.bf16.msra.mxu1 %v9238_v36  ;;  %7060 = vmatprep.mubr.msk.bf16.mxu1 %vm8412_vm0, %v8411_v38 }
 0x738   :  { %v8078_v6 = vpop.eup %8077  ;;  %7064 = vmatprep.subr.bf16.mxu1 %v8411_v38 }
 0x739   :  { %v4329_v41 = vmul.f32 %v8078_v6, %v8062_v24  ;;  %v7852_v24 = vld [vmem:[#allocation11 + $0xc8] ss:$12 sps:$4 sm:$0xff]   ;;  %v7843_v6 = vld [vmem:[#allocation11 + $0x90] ss:$12 sps:$4 sm:$0xff]  }
 0x73b   :  { %v4342_v2 = vpack.c.bf16 %v4329_v41, %v4329_v41  ;;  %v4718_v36 = vadd.f32 %v4717_v4, %v4329_v41  ;;  %v7848_v41 = vld [vmem:[#allocation11 + $0xac] ss:$12 sps:$4 sm:$0xff]  }
 0x73c   :  { %v7849_v4 = vld [vmem:[#allocation11 + $0xc0] ss:$12 sps:$4 sm:$0xff]  }
 0x73d   :  { %v4314_v3 = vpop.xlane.xlu1 %4313 }
 0x73e   :  { %7061 = vmatmul.mubr.msk.bf16.vlgmr.msra.gmra.mrb[64].mxu1 %vm4251_vm2, %v4342_v2  ;;  %8081 = vrcp.f32 %v4314_v3  ;;  %v7846_v2 = vld [vmem:[#allocation11 + $0xa8] ss:$12 sps:$4 sm:$0xff]   ;;  %v7851_v3 = vld [vmem:[#allocation11 + $0xc4] ss:$12 sps:$4 sm:$0xff]  }
 0x73f   :  { %7065 = vmatpush3.bf16.msra.mxu1 %v9243_v9  ;;  %7066 = vmatprep.mubr.msk.bf16.mxu1 %vm8412_vm0, %v8411_v38 }
 0x740   :  { %v8080_v5 = vpop.eup %8079  ;;  %7076 = vmatprep.subr.bf16.mxu1 %v8411_v38 }
 0x741   :  { %v4331_v35 = vmul.f32 %v8080_v5, %v8064_v33  ;;  %v7863_v33 = vld [vmem:[#allocation11 + $0x38] ss:$12 sps:$4 sm:$0xff]   ;;  %v7856_v5 = vld [vmem:[#allocation11 + $0xdc] ss:$12 sps:$4 sm:$0xff]  }
 0x743   :  { %v4343_v7 = vpack.c.bf16 %v4331_v35, %v4331_v35  ;;  %v4719_v8 = vadd.f32 %v4718_v36, %v4331_v35  ;;  %v7854_v36 = vld [vmem:[#allocation11 + $0xd8] ss:$12 sps:$4 sm:$0xff]   ;;  %v7861_v35 = vld [vmem:[#allocation11 + $0xf4] ss:$12 sps:$4 sm:$0xff]  }
 0x745   :  { %v4317_v12 = vpop.xlane.xlu0 %4316  ;;  %v4720_v14 = vmul.f32 0.25, %v4719_v8  ;;  %v7866_v8 = vld [vmem:[#allocation11 + $0x10c] ss:$12 sps:$4 sm:$0xff]  }
 0x746   :  { %8083 = vrcp.f32 %v4317_v12  ;;  %7067 = vmatmul.mubr.msk.bf16.vlgmr.msra.gmra.mrb[68].mxu1 %vm4251_vm2, %v4343_v7  ;;  %v7859_v7 = vld [vmem:[#allocation11 + $0xf0] ss:$12 sps:$4 sm:$0xff]   ;;  %v7864_v12 = vld [vmem:[#allocation11 + $0x108] ss:$12 sps:$4 sm:$0xff]  }
 0x747   :  { %7077 = vmatpush3.bf16.msra.mxu1 %v9246_v20  ;;  %7078 = vmatprep.mubr.msk.bf16.mxu1 %vm8412_vm0, %v8411_v38  ;;  %4727 = vst.msk [vmem:[#allocation20] sm:$0xff] %vm4251_vm2, %v4720_v14  ;;  %v7871_v14 = vld [vmem:[#allocation11 + $0x124] ss:$12 sps:$4 sm:$0xff]  }
 0x748   :  { %v8082_v9 = vpop.eup %8081  ;;  %7088 = vmatprep.subr.bf16.mxu1 %v8411_v38 }
 0x749   :  { %v4333_v15 = vmul.f32 %v8082_v9, %v9267_v42  ;;  %v7882_v42 = vld [vmem:[#allocation11 + $0x158] ss:$12 sps:$4 sm:$0xff]   ;;  %v7869_v9 = vld [vmem:[#allocation11 + $0x120] ss:$12 sps:$4 sm:$0xff]  }
 0x74b   :  { %v4344_v16 = vpack.c.bf16 %v4333_v15, %v4333_v15 }
 0x74d   :  { %7073 = vmatmul.mubr.msk.bf16.vlgmr.msra.gmra.mrb[16].mxu0 %vm4251_vm2, %v4344_v16 }
 0x74e   :  { %7083 = vmatpush3.bf16.msra.mxu0 %v9249_v10  ;;  %7084 = vmatprep.mubr.msk.bf16.mxu0 %vm8412_vm0, %v8411_v38 }
 0x74f   :  { %5390 = vmatprep.subr.bf16.mxu0 %v7827_v17  ;;  %v7874_v17 = vld [vmem:[#allocation11 + $0x138] ss:$12 sps:$4 sm:$0xff]  }
 0x750   :  { %v8084_v20 = vpop.eup %8083 }
 0x751   :  { %v4335_v18 = vmul.f32 %v8084_v20, %v9271_v46  ;;  %v7887_v46 = vld [vmem:[#allocation11 + $0x170] ss:$12 sps:$4 sm:$0xff]  }
 0x753   :  { %v4721_v21 = vadd.f32 %v4335_v18, %v4333_v15  ;;  %v4345_v13 = vpack.c.bf16 %v4335_v18, %v4335_v18  ;;  %v7876_v15 = vld [vmem:[#allocation11 + $0x13c] ss:$12 sps:$4 sm:$0xff]   ;;  %v7881_v18 = vld [vmem:[#allocation11 + $0x154] ss:$12 sps:$4 sm:$0xff]  }
 0x755   :  { %v4323_v22 = vpop.xlane.xlu0 %4322  ;;  %7079 = vmatmul.mubr.msk.bf16.vlgmr.msra.gmra.mrb[72].mxu1 %vm4251_vm2, %v4345_v13 }
 0x756   :  { %8085 = vrcp.f32 %v4323_v22  ;;  %7089 = vmatpush3.bf16.msra.mxu1 %v9253_v37  ;;  %7090 = vmatprep.mubr.msk.bf16.mxu1 %vm8412_vm0, %v8411_v38  ;;  %v7867_v37 = vld [vmem:[#allocation11 + $0x110] ss:$12 sps:$4 sm:$0xff]  }
 0x757   :  { %6932 = vmatprep.subr.bf16.mxu1 %v7852_v24  ;;  %v7868_v38 = vld [vmem:[#allocation11 + $0x50] ss:$12 sps:$4 sm:$0xff]  }
 0x758   :  { %v7879_v22 = vld [vmem:[#allocation11 + $0x150] ss:$12 sps:$4 sm:$0xff]  }
 0x759   :  { %v7891_v24 = vld [vmem:[#allocation11 + $0x184] ss:$12 sps:$4 sm:$0xff]  }
 0x760   :  { %v8086_v10 = vpop.eup %8085 }
 0x761   :  { %v4339_v23 = vmul.f32 %v8086_v10, %v9275_v50  ;;  %v7886_v10 = vld [vmem:[#allocation11 + $0x16c] ss:$12 sps:$4 sm:$0xff]  }
 0x763   :  { %v4347_v19 = vpack.c.bf16 %v4339_v23, %v4339_v23 }
 0x765   :  { %7091 = vmatmul.mubr.msk.bf16.vlgmr.msra.gmra.mrb[76].mxu1 %vm4251_vm2, %v4347_v19 }
 0x766   :  { %6933 = vmatpush3.bf16.msra.mxu1 %v7853_v28 }
 0x767   :  { %6934 = vmatprep.subr.bf16.mxu1 %v7857_v31 }
 0x76a   :  { %6935 = vmatpush3.bf16.msra.mxu1 %v7858_v32 }
 0x76b   :  { %6936 = vmatprep.subr.bf16.mxu1 %v7862_v27 }
 0x76e   :  { %6937 = vmatpush3.bf16.msra.mxu1 %v7863_v33 }
 0x76f   :  { %6938 = vmatprep.subr.bf16.mxu1 %v7867_v37 }
 0x772   :  { %6939 = vmatpush3.bf16.msra.mxu1 %v7868_v38 }
 0x773   :  { %6940 = vmatprep.subr.bf16.mxu1 %v7872_v34 }
 0x776   :  { %6941 = vmatpush3.bf16.msra.mxu1 %v7873_v39 }
 0x777   :  { %6942 = vmatprep.subr.bf16.mxu1 %v7877_v43 }
 0x77a   :  { %6943 = vmatpush3.bf16.msra.mxu1 %v7878_v44 }
 0x77b   :  { %6944 = vmatprep.subr.bf16.mxu1 %v7882_v42 }
 0x77e   :  { %6945 = vmatpush3.bf16.msra.mxu1 %v7883_v45 }
 0x77f   :  { %6946 = vmatprep.subr.bf16.mxu1 %v7887_v46 }
 0x782   :  { %6947 = vmatpush3.bf16.msra.mxu1 %v7888_v11 }
 0x783   :  { %6954 = vmatprep.subr.bf16.mxu1 %v7916_v49 }
 0x7bf   :  { %v4320_v47 = vpop.xlane.xlu1 %4319 }
 0x7c0   :  { %8087 = vrcp.f32 %v4320_v47 }
 0x7ca   :  { %v8088_v48 = vpop.eup %8087 }
 0x7cb   :  { %v4337_v50 = vmul.f32 %v8088_v48, %v9284_v63  ;;  %v7834_v63 = vld [vmem:[#allocation11 + $0x48] ss:$12 sps:$4 sm:$0xff]  }
 0x7cd   :  { %v4722_v54 = vadd.f32 %v4721_v21, %v4337_v50  ;;  %v4346_v55 = vpack.c.bf16 %v4337_v50, %v4337_v50 }
 0x7cf   :  { %7085 = vmatmul.mubr.msk.bf16.vlgmr.msra.gmra.mrb[20].mxu0 %vm4251_vm2, %v4346_v55  ;;  %v4723_v57 = vadd.f32 %v4722_v54, %v4339_v23  ;;  %v7884_v23 = vld [vmem:[#allocation11 + $0x168] ss:$12 sps:$4 sm:$0xff]  }
 0x7d0   :  { %5391 = vmatpush1.bf16.msra.mxu0 %v7825_v53  ;;  %v7889_v53 = vld [vmem:[#allocation11 + $0x180] ss:$12 sps:$4 sm:$0xff]   ;;  %v7917_v54 = vld [vmem:[#allocation11 + $0x188] ss:$12 sps:$4 sm:$0xff]  }
 0x7d1   :  { %5392 = vmatprep.subr.bf16.mxu0 %v7830_v56  ;;  %v4724_v60 = vmul.f32 0.25, %v4723_v57  ;;  %v7894_v56 = vld [vmem:[#allocation11 + $0x19c] ss:$12 sps:$4 sm:$0xff]   ;;  %v7921_v57 = vld [vmem:[#allocation11 + $0x260] ss:$12 sps:$4 sm:$0xff]  }
 0x7d3   :  { %4728 = vst.msk [vmem:[#allocation20 + $0x8] sm:$0xff] %vm4251_vm2, %v4724_v60  ;;  %v7922_v60 = vld [vmem:[#allocation11 + $0x1a0] ss:$12 sps:$4 sm:$0xff]  }
 0x7d4   :  { %5393 = vmatpush1.bf16.msra.mxu0 %v7828_v58 }
 0x7d5   :  { %5394 = vmatprep.subr.bf16.mxu0 %v7833_v59  ;;  %v7892_v59 = vld [vmem:[#allocation11 + $0x198] ss:$12 sps:$4 sm:$0xff]  }
 0x7d8   :  { %5395 = vmatpush1.bf16.msra.mxu0 %v7831_v61  ;;  %v7897_v61 = vld [vmem:[#allocation11 + $0x1b4] ss:$12 sps:$4 sm:$0xff]  }
 0x7d9   :  { %5396 = vmatprep.subr.bf16.mxu0 %v7836_v62  ;;  %v7926_v62 = vld [vmem:[#allocation11 + $0x278] ss:$12 sps:$4 sm:$0xff]  }
 0x7dc   :  { %5397 = vmatpush1.bf16.msra.mxu0 %v7834_v63  ;;  %v7895_v63 = vld [vmem:[#allocation11 + $0x1b0] ss:$12 sps:$4 sm:$0xff]  }
 0x7dd   :  { %5398 = vmatprep.subr.bf16.mxu0 %v7839_v0  ;;  %v7927_v0 = vld [vmem:[#allocation11 + $0x1b8] ss:$12 sps:$4 sm:$0xff]  }
 0x7e0   :  { %5399 = vmatpush1.bf16.msra.mxu0 %v7837_v25  ;;  %v7900_v25 = vld [vmem:[#allocation11 + $0x1cc] ss:$12 sps:$4 sm:$0xff]  }
 0x7e1   :  { %5400 = vmatprep.subr.bf16.mxu0 %v7842_v26  ;;  %v7931_v26 = vld [vmem:[#allocation11 + $0x290] ss:$12 sps:$4 sm:$0xff]  }
 0x7e4   :  { %5401 = vmatpush1.bf16.msra.mxu0 %v7840_v1  ;;  %v7898_v1 = vld [vmem:[#allocation11 + $0x1c8] ss:$12 sps:$4 sm:$0xff]  }
 0x7e5   :  { %5402 = vmatprep.subr.bf16.mxu0 %v7845_v29  ;;  %v7932_v29 = vld [vmem:[#allocation11 + $0x1d0] ss:$12 sps:$4 sm:$0xff]  }
 0x7e8   :  { %5403 = vmatpush1.bf16.msra.mxu0 %v7843_v6  ;;  %v7903_v6 = vld [vmem:[#allocation11 + $0x1e4] ss:$12 sps:$4 sm:$0xff]  }
 0x7e9   :  { %5404 = vmatprep.subr.bf16.mxu0 %v7848_v41  ;;  %v7936_v41 = vld [vmem:[#allocation11 + $0x2a8] ss:$12 sps:$4 sm:$0xff]  }
 0x7ec   :  { %5405 = vmatpush1.bf16.msra.mxu0 %v7846_v2 }
 0x7ed   :  { %5406 = vmatprep.subr.bf16.mxu0 %v7851_v3 }
 0x7f0   :  { %5407 = vmatpush1.bf16.msra.mxu0 %v7849_v4 }
 0x7f1   :  { %5408 = vmatprep.subr.bf16.mxu0 %v7856_v5  ;;  %v7901_v5 = vld [vmem:[#allocation11 + $0x1e0] ss:$12 sps:$4 sm:$0xff]  }
 0x7f4   :  { %5409 = vmatpush1.bf16.msra.mxu0 %v7854_v36  ;;  %v7937_v36 = vld [vmem:[#allocation11 + $0x1e8] ss:$12 sps:$4 sm:$0xff]  }
 0x7f5   :  { %5410 = vmatprep.subr.bf16.mxu0 %v7861_v35 }
 0x7f8   :  { %5411 = vmatpush1.bf16.msra.mxu0 %v7859_v7  ;;  %v7906_v7 = vld [vmem:[#allocation11 + $0x1fc] ss:$12 sps:$4 sm:$0xff]  }
 0x7f9   :  { %5412 = vmatprep.subr.bf16.mxu0 %v7866_v8  ;;  %v7941_v8 = vld [vmem:[#allocation11 + $0x2c0] ss:$12 sps:$4 sm:$0xff]  }
 0x7fc   :  { %5413 = vmatpush1.bf16.msra.mxu0 %v7864_v12 }
 0x7fd   :  { %5414 = vmatprep.subr.bf16.mxu0 %v7871_v14  ;;  %v7904_v14 = vld [vmem:[#allocation11 + $0x1f8] ss:$12 sps:$4 sm:$0xff]  }
 0x800   :  { %v4389_v16 = vpop.f32.mrb[56].mxu1  ;;  %5415 = vmatpush1.bf16.msra.mxu0 %v7869_v9  ;;  %v7942_v9 = vld [vmem:[#allocation11 + $0x200] ss:$12 sps:$4 sm:$0xff]  }
 0x801   :  { %v7050_v20 = vpop.f32.mrb[57].mxu1  ;;  %5416 = vmatprep.subr.bf16.mxu0 %v7876_v15  ;;  %v7909_v15 = vld [vmem:[#allocation11 + $0x214] ss:$12 sps:$4 sm:$0xff]  }
 0x802   :  { %v4392_v21 = vpop.f32.mrb[58].mxu1  ;;  %v7947_v20 = vld [vmem:[#allocation11 + $0x218] ss:$12 sps:$4 sm:$0xff]  }
 0x803   :  { %v7051_v13 = vpop.f32.mrb[59].mxu1  ;;  %v7951_v21 = vld [vmem:[#allocation11 + $0x2f0] ss:$12 sps:$4 sm:$0xff]  }
 0x804   :  { %5417 = vmatpush1.bf16.msra.mxu0 %v7874_v17  ;;  %v7907_v17 = vld [vmem:[#allocation11 + $0x210] ss:$12 sps:$4 sm:$0xff]   ;;  %v7910_v13 = vld [vmem:[#allocation11 + $0x228] ss:$12 sps:$4 sm:$0xff]  }
 0x805   :  { %5418 = vmatprep.subr.bf16.mxu0 %v7881_v18  ;;  %v7912_v18 = vld [vmem:[#allocation11 + $0x22c] ss:$12 sps:$4 sm:$0xff]  }
 0x808   :  { %5419 = vmatpush1.bf16.msra.mxu0 %v7879_v22  ;;  %v7952_v22 = vld [vmem:[#allocation11 + $0x230] ss:$12 sps:$4 sm:$0xff]  }
 0x809   :  { %v4435_v19 = vpop.f32.mrb[60].mxu1  ;;  %5420 = vmatprep.subr.bf16.mxu0 %v7886_v10  ;;  %v7915_v10 = vld [vmem:[#allocation11 + $0x244] ss:$12 sps:$4 sm:$0xff]  }
 0x80a   :  { %v7056_v28 = vpop.f32.mrb[61].mxu1 }
 0x80b   :  { %v4438_v31 = vpop.f32.mrb[62].mxu1  ;;  %v7925_v28 = vld [vmem:[#allocation11 + $0x274] ss:$12 sps:$4 sm:$0xff]  }
 0x80c   :  { %v7057_v32 = vpop.f32.mrb[63].mxu1  ;;  %5421 = vmatpush1.bf16.msra.mxu0 %v7884_v23  ;;  %v7913_v23 = vld [vmem:[#allocation11 + $0x240] ss:$12 sps:$4 sm:$0xff]   ;;  %v7923_v31 = vld [vmem:[#allocation11 + $0x270] ss:$12 sps:$4 sm:$0xff]  }
 0x80d   :  { %5433 = vmatprep.subr.bf16.mxu0 %v7891_v24  ;;  %v7918_v24 = vld [vmem:[#allocation11 + $0x258] ss:$12 sps:$4 sm:$0xff]  }
 0x80e   :  { %v7930_v32 = vld [vmem:[#allocation11 + $0x28c] ss:$12 sps:$4 sm:$0xff]  }
 0x811   :  { %v9319_v27 = vpop.f32.mrb[64].mxu1 }
 0x812   :  { %v7062_v33 = vpop.f32.mrb[65].mxu1 }
 0x813   :  { %v4484_v37 = vpop.f32.mrb[66].mxu1  ;;  %v7928_v33 = vld [vmem:[#allocation11 + $0x288] ss:$12 sps:$4 sm:$0xff]  }
 0x814   :  { %v7063_v38 = vpop.f32.mrb[67].mxu1  ;;  %v7935_v37 = vld [vmem:[#allocation11 + $0x2a4] ss:$12 sps:$4 sm:$0xff]  }
 0x815   :  { %v7933_v38 = vld [vmem:[#allocation11 + $0x2a0] ss:$12 sps:$4 sm:$0xff]  }
 0x819   :  { %v4527_v34 = vpop.f32.mrb[68].mxu1 }
 0x81a   :  { %v7068_v39 = vpop.f32.mrb[69].mxu1 }
 0x81b   :  { %v4530_v43 = vpop.f32.mrb[70].mxu1  ;;  %v7938_v39 = vld [vmem:[#allocation11 + $0x2b8] ss:$12 sps:$4 sm:$0xff]  }
 0x81c   :  { %v7069_v44 = vpop.f32.mrb[71].mxu1  ;;  %v7945_v43 = vld [vmem:[#allocation11 + $0x2d4] ss:$12 sps:$4 sm:$0xff]  }
 0x81d   :  { %v7943_v44 = vld [vmem:[#allocation11 + $0x2d0] ss:$12 sps:$4 sm:$0xff]  }
 0x820   :  { %v4573_v42 = vpop.f32.mrb[16].mxu0 }
 0x821   :  { %v4729_v45 = vpack.c.bf16 %v4573_v42, %v4389_v16  ;;  %v7074_v46 = vpop.f32.mrb[17].mxu0  ;;  %v7946_v16 = vld [vmem:[#allocation11 + $0x2d8] ss:$12 sps:$4 sm:$0xff]  }
 0x822   :  { %v4576_v11 = vpop.f32.mrb[18].mxu0  ;;  %v7950_v42 = vld [vmem:[#allocation11 + $0x2ec] ss:$12 sps:$4 sm:$0xff]   ;;  %v7955_v46 = vld [vmem:[#allocation14 + $0x4] ss:$8 sps:$4 sm:$0xff]  }
 0x823   :  { %v7075_v47 = vpop.f32.mrb[19].mxu0 }
 0x824   :  { %v7953_v47 = vld [vmem:[#allocation14] ss:$8 sps:$4 sm:$0xff]  }
 0x828   :  { %v4619_v48 = vpop.f32.mrb[72].mxu1 }
 0x829   :  { %v4730_v49 = vpack.c.bf16 %v4619_v48, %v4435_v19  ;;  %v7080_v50 = vpop.f32.mrb[73].mxu1  ;;  %v7920_v19 = vld [vmem:[#allocation11 + $0x25c] ss:$12 sps:$4 sm:$0xff]  }
 0x82a   :  { %v4622_v55 = vpop.f32.mrb[74].mxu1  ;;  %v7958_v50 = vld [vmem:[#allocation14 + $0x14] ss:$8 sps:$4 sm:$0xff]  }
 0x82b   :  { %v7081_v58 = vpop.f32.mrb[75].mxu1  ;;  %5422 = vmatprep.mubr.bf16.mxu0 %v4730_v49  ;;  %5508 = vmatprep.mubr.bf16.mxu1 %v4730_v49  ;;  %v7956_v55 = vld [vmem:[#allocation14 + $0x10] ss:$8 sps:$4 sm:$0xff]  }
 0x82c   :  { %5423 = vmatmul.mubr.bf16.vlgmr.msra.gmra.mrb[24].mxu0 %v4729_v45  ;;  %5509 = vmatmul.mubr.bf16.vlgmr.msra.gmra.mrb[80].mxu1 %v4729_v45  ;;  %v7948_v45 = vld [vmem:[#allocation11 + $0x2e8] ss:$12 sps:$4 sm:$0xff]   ;;  %v7964_v58 = vld [vmem:[#allocation14 + $0x34] ss:$8 sps:$4 sm:$0xff]  }
 0x82d   :  { %5434 = vmatpush1.bf16.msra.mxu0 %v7889_v53  ;;  %6955 = vmatpush3.bf16.msra.mxu1 %v7917_v54 }
 0x82e   :  { %5435 = vmatprep.subr.bf16.mxu0 %v7894_v56  ;;  %6956 = vmatprep.subr.bf16.mxu1 %v7921_v57  ;;  %v7961_v56 = vld [vmem:[#allocation14 + $0x24] ss:$8 sps:$4 sm:$0xff]   ;;  %v7959_v57 = vld [vmem:[#allocation14 + $0x20] ss:$8 sps:$4 sm:$0xff]  }
 0x831   :  { %5436 = vmatpush1.bf16.msra.mxu0 %v7892_v59  ;;  %6957 = vmatpush3.bf16.msra.mxu1 %v7922_v60  ;;  %v7962_v59 = vld [vmem:[#allocation14 + $0x30] ss:$8 sps:$4 sm:$0xff]   ;;  %v7967_v60 = vld [vmem:[#allocation14 + $0x44] ss:$8 sps:$4 sm:$0xff]  }
 0x832   :  { %5437 = vmatprep.subr.bf16.mxu0 %v7897_v61  ;;  %6958 = vmatprep.subr.bf16.mxu1 %v7926_v62  ;;  %v7970_v61 = vld [vmem:[#allocation14 + $0x54] ss:$8 sps:$4 sm:$0xff]   ;;  %v7968_v62 = vld [vmem:[#allocation14 + $0x50] ss:$8 sps:$4 sm:$0xff]  }
 0x835   :  { %5438 = vmatpush1.bf16.msra.mxu0 %v7895_v63  ;;  %6959 = vmatpush3.bf16.msra.mxu1 %v7927_v0  ;;  %v7973_v63 = vld [vmem:[#allocation14 + $0x64] ss:$8 sps:$4 sm:$0xff]   ;;  %v7971_v0 = vld [vmem:[#allocation14 + $0x60] ss:$8 sps:$4 sm:$0xff]  }
 0x836   :  { %5439 = vmatprep.subr.bf16.mxu0 %v7900_v25  ;;  %6960 = vmatprep.subr.bf16.mxu1 %v7931_v26  ;;  %v7976_v25 = vld [vmem:[#allocation14 + $0x74] ss:$8 sps:$4 sm:$0xff]   ;;  %v7974_v26 = vld [vmem:[#allocation14 + $0x70] ss:$8 sps:$4 sm:$0xff]  }
 0x838   :  { %v4711_v2 = vpop.f32.mrb[76].mxu1 }
 0x839   :  { %v4732_v3 = vpack.c.bf16 %v4711_v2, %v4527_v34  ;;  %v7092_v4 = vpop.f32.mrb[77].mxu1  ;;  %5440 = vmatpush1.bf16.msra.mxu0 %v7898_v1  ;;  %6961 = vmatpush3.bf16.msra.mxu1 %v7932_v29  ;;  %v7940_v34 = vld [vmem:[#allocation11 + $0x2bc] ss:$12 sps:$4 sm:$0xff]   ;;  %v7977_v29 = vld [vmem:[#allocation14 + $0x80] ss:$8 sps:$4 sm:$0xff]  }
 0x83a   :  { %v4714_v35 = vpop.f32.mrb[78].mxu1  ;;  %5441 = vmatprep.subr.bf16.mxu0 %v7903_v6  ;;  %6962 = vmatprep.subr.bf16.mxu1 %v7936_v41  ;;  %v7979_v1 = vld [vmem:[#allocation14 + $0x84] ss:$8 sps:$4 sm:$0xff]   ;;  %v7982_v6 = vld [vmem:[#allocation14 + $0x94] ss:$8 sps:$4 sm:$0xff]  }
 0x83b   :  { %v7093_v12 = vpop.f32.mrb[79].mxu1  ;;  %5465 = vmatprep.mubr.bf16.mxu0 %v4732_v3  ;;  %5549 = vmatprep.mubr.bf16.mxu1 %v4732_v3  ;;  %v7980_v41 = vld [vmem:[#allocation14 + $0x90] ss:$8 sps:$4 sm:$0xff]   ;;  %v7985_v2 = vld [vmem:[#allocation14 + $0xa4] ss:$8 sps:$4 sm:$0xff]  }
 0x83c   :  { %v7983_v3 = vld [vmem:[#allocation14 + $0xa0] ss:$8 sps:$4 sm:$0xff]   ;;  %v7986_v35 = vld [vmem:[#allocation14 + $0xb0] ss:$8 sps:$4 sm:$0xff]  }
 0x83d   :  { %5442 = vmatpush1.bf16.msra.mxu0 %v7901_v5  ;;  %6963 = vmatpush3.bf16.msra.mxu1 %v7937_v36  ;;  %v7988_v5 = vld [vmem:[#allocation14 + $0xb4] ss:$8 sps:$4 sm:$0xff]  }
 0x83e   :  { %5443 = vmatprep.subr.bf16.mxu0 %v7906_v7  ;;  %6964 = vmatprep.subr.bf16.mxu1 %v7941_v8 }
 0x841   :  { %5444 = vmatpush1.bf16.msra.mxu0 %v7904_v14  ;;  %6965 = vmatpush3.bf16.msra.mxu1 %v7942_v9  ;;  %v7991_v9 = vld [vmem:[#allocation14 + $0xc4] ss:$8 sps:$4 sm:$0xff]  }
 0x842   :  { %5445 = vmatprep.subr.bf16.mxu0 %v7909_v15  ;;  %6966 = vmatprep.subr.bf16.mxu1 %v7946_v16  ;;  %v7989_v15 = vld [vmem:[#allocation14 + $0xc0] ss:$8 sps:$4 sm:$0xff]   ;;  %v7994_v16 = vld [vmem:[#allocation14 + $0xd4] ss:$8 sps:$4 sm:$0xff]  }
 0x845   :  { %5446 = vmatpush1.bf16.msra.mxu0 %v7907_v17  ;;  %6967 = vmatpush3.bf16.msra.mxu1 %v7947_v20  ;;  %v7992_v17 = vld [vmem:[#allocation14 + $0xd0] ss:$8 sps:$4 sm:$0xff]   ;;  %v7997_v20 = vld [vmem:[#allocation14 + $0xe4] ss:$8 sps:$4 sm:$0xff]  }
 0x846   :  { %5447 = vmatprep.subr.bf16.mxu0 %v7912_v18  ;;  %6968 = vmatprep.subr.bf16.mxu1 %v7951_v21  ;;  %v7995_v18 = vld [vmem:[#allocation14 + $0xe0] ss:$8 sps:$4 sm:$0xff]   ;;  %v8000_v21 = vld [vmem:[#allocation14 + $0xf4] ss:$8 sps:$4 sm:$0xff]  }
 0x849   :  { %5448 = vmatpush1.bf16.msra.mxu0 %v7910_v13  ;;  %6969 = vmatpush3.bf16.msra.mxu1 %v7952_v22  ;;  %v7998_v13 = vld [vmem:[#allocation14 + $0xf0] ss:$8 sps:$4 sm:$0xff]   ;;  %v8003_v22 = vld [vmem:[#allocation14 + $0x104] ss:$8 sps:$4 sm:$0xff]  }
 0x84a   :  { %5449 = vmatprep.subr.bf16.mxu0 %v7915_v10  ;;  %5929 = vmatprep.subr.bf16.mxu1 %v7955_v46  ;;  %v8025_v10 = vld [vmem:[#allocation17 + $0x40] sm:$0xff]  }
 0x84d   :  { %5450 = vmatpush1.bf16.msra.mxu0 %v7913_v23  ;;  %v8026_v23 = vld [vmem:[#allocation17] sm:$0xff]  }
 0x84e   :  { %5451 = vmatprep.subr.bf16.mxu0 %v7920_v19  ;;  %v8027_v19 = vld [vmem:[#allocation17 + $0x48] sm:$0xff]  }
 0x851   :  { %5452 = vmatpush1.bf16.msra.mxu0 %v7918_v24  ;;  %v8028_v24 = vld [vmem:[#allocation17 + $0x8] sm:$0xff]  }
 0x852   :  { %5453 = vmatprep.subr.bf16.mxu0 %v7925_v28  ;;  %v8029_v28 = vld [vmem:[#allocation17 + $0x50] sm:$0xff]  }
 0x855   :  { %5454 = vmatpush1.bf16.msra.mxu0 %v7923_v31  ;;  %v8030_v31 = vld [vmem:[#allocation17 + $0x10] sm:$0xff]  }
 0x856   :  { %5455 = vmatprep.subr.bf16.mxu0 %v7930_v32  ;;  %v8031_v32 = vld [vmem:[#allocation17 + $0x58] sm:$0xff]  }
 0x859   :  { %5456 = vmatpush1.bf16.msra.mxu0 %v7928_v33  ;;  %v8032_v33 = vld [vmem:[#allocation17 + $0x18] sm:$0xff]  }
 0x85a   :  { %5457 = vmatprep.subr.bf16.mxu0 %v7935_v37  ;;  %v8033_v37 = vld [vmem:[#allocation17 + $0x60] sm:$0xff]  }
 0x85d   :  { %5458 = vmatpush1.bf16.msra.mxu0 %v7933_v38  ;;  %v8034_v38 = vld [vmem:[#allocation17 + $0x20] sm:$0xff]  }
 0x85e   :  { %5459 = vmatprep.subr.bf16.mxu0 %v7940_v34  ;;  %v8035_v34 = vld [vmem:[#allocation17 + $0x68] sm:$0xff]  }
 0x861   :  { %5460 = vmatpush1.bf16.msra.mxu0 %v7938_v39  ;;  %v8036_v39 = vld [vmem:[#allocation17 + $0x28] sm:$0xff]  }
 0x862   :  { %5461 = vmatprep.subr.bf16.mxu0 %v7945_v43  ;;  %v4861_v43 = vld [vmem:[#allocation13] sm:$0x7] }
 0x865   :  { %5462 = vmatpush1.bf16.msra.mxu0 %v7943_v44  ;;  %v4866_v44 = vrot.slane %v4861_v43, %v9101_v51 }
 0x866   :  { %5463 = vmatprep.subr.bf16.mxu0 %v7950_v42  ;;  %v4874_v42 = vrot.slane %v4861_v43, %v9093_v30 }
 0x869   :  { %5464 = vmatpush1.bf16.msra.mxu0 %v7948_v45  ;;  %v4870_v45 = vrot.slane %v4861_v43, %v9104_v52 }
 0x86a   :  { %6976 = vmatprep.subr.bf16.mxu0 %v8025_v10 }
 0x8a2   :  { %v4665_v11 = vpop.f32.mrb[20].mxu0 }
 0x8a3   :  { %v4731_v48 = vpack.c.bf16 %v4665_v11, %v9319_v27  ;;  %v7086_v49 = vpop.f32.mrb[21].mxu0  ;;  %v7965_v27 = vld [vmem:[#allocation14 + $0x40] ss:$8 sps:$4 sm:$0xff]  }
 0x8a4   :  { %v4668_v53 = vpop.f32.mrb[22].mxu0 }
 0x8a5   :  { %v7087_v54 = vpop.f32.mrb[23].mxu0  ;;  %5466 = vmatmul.mubr.bf16.vlgmr.msra.gmra.mrb[24].mxu0 %v4731_v48  ;;  %5550 = vmatmul.mubr.bf16.vlgmr.msra.gmra.mrb[84].mxu1 %v4731_v48 }
 0x8a6   :  { %5930 = vmatpush1.bf16.msra.mxu1 %v7953_v47  ;;  %6977 = vmatpush3.bf16.msra.mxu0 %v8026_v23 }
 0x8a7   :  { %5931 = vmatprep.subr.bf16.mxu1 %v7958_v50  ;;  %6978 = vmatprep.subr.bf16.mxu0 %v8027_v19 }
 0x8aa   :  { %5932 = vmatpush1.bf16.msra.mxu1 %v7956_v55  ;;  %6979 = vmatpush3.bf16.msra.mxu0 %v8028_v24 }
 0x8ab   :  { %5933 = vmatprep.subr.bf16.mxu1 %v7961_v56  ;;  %6980 = vmatprep.subr.bf16.mxu0 %v8029_v28 }
 0x8ae   :  { %5934 = vmatpush1.bf16.msra.mxu1 %v7959_v57  ;;  %6981 = vmatpush3.bf16.msra.mxu0 %v8030_v31 }
 0x8af   :  { %5935 = vmatprep.subr.bf16.mxu1 %v7964_v58  ;;  %6982 = vmatprep.subr.bf16.mxu0 %v8031_v32 }
 0x8b2   :  { %5936 = vmatpush1.bf16.msra.mxu1 %v7962_v59  ;;  %6983 = vmatpush3.bf16.msra.mxu0 %v8032_v33 }
 0x8b3   :  { %5937 = vmatprep.subr.bf16.mxu1 %v7967_v60  ;;  %6984 = vmatprep.subr.bf16.mxu0 %v8033_v37 }
 0x8b6   :  { %5938 = vmatpush1.bf16.msra.mxu1 %v7965_v27  ;;  %6985 = vmatpush3.bf16.msra.mxu0 %v8034_v38 }
 0x8b7   :  { %5939 = vmatprep.subr.bf16.mxu1 %v7970_v61  ;;  %6986 = vmatprep.subr.bf16.mxu0 %v8035_v34 }
 0x8ba   :  { %5940 = vmatpush1.bf16.msra.mxu1 %v7968_v62  ;;  %6987 = vmatpush3.bf16.msra.mxu0 %v8036_v39 }
 0x8bb   :  { %5941 = vmatprep.subr.bf16.mxu1 %v7973_v63 }
 0x8be   :  { %5942 = vmatpush1.bf16.msra.mxu1 %v7971_v0 }
 0x8bf   :  { %5943 = vmatprep.subr.bf16.mxu1 %v7976_v25 }
 0x8c2   :  { %5944 = vmatpush1.bf16.msra.mxu1 %v7974_v26 }
 0x8c3   :  { %5945 = vmatprep.subr.bf16.mxu1 %v7979_v1 }
 0x8c6   :  { %5946 = vmatpush1.bf16.msra.mxu1 %v7977_v29 }
 0x8c7   :  { %5947 = vmatprep.subr.bf16.mxu1 %v7982_v6 }
 0x8ca   :  { %5948 = vmatpush1.bf16.msra.mxu1 %v7980_v41 }
 0x8cb   :  { %5949 = vmatprep.subr.bf16.mxu1 %v7985_v2 }
 0x8ce   :  { %5950 = vmatpush1.bf16.msra.mxu1 %v7983_v3 }
 0x8cf   :  { %5951 = vmatprep.subr.bf16.mxu1 %v7988_v5 }
 0x8d2   :  { %5952 = vmatpush1.bf16.msra.mxu1 %v7986_v35 }
 0x8d3   :  { %5953 = vmatprep.subr.bf16.mxu1 %v7991_v9 }
 0x8d6   :  { %5954 = vmatpush1.bf16.msra.mxu1 %v7989_v15 }
 0x8d7   :  { %5955 = vmatprep.subr.bf16.mxu1 %v7994_v16 }
 0x8da   :  { %5956 = vmatpush1.bf16.msra.mxu1 %v7992_v17 }
 0x8db   :  { %5957 = vmatprep.subr.bf16.mxu1 %v7997_v20 }
 0x8de   :  { %5958 = vmatpush1.bf16.msra.mxu1 %v7995_v18 }
 0x8df   :  { %5959 = vmatprep.subr.bf16.mxu1 %v8000_v21 }
 0x8e2   :  { %5960 = vmatpush1.bf16.msra.mxu1 %v7998_v13 }
 0x8e3   :  { %5970 = vmatprep.subr.bf16.mxu1 %v8003_v22 }
 0x8ff   :  { %v6948_v4 = vpop.f32.mrb[80].mxu1 }
 0x900   :  { %v6949_v36 = vpop.f32.mrb[81].mxu1 }
 0x901   :  { %v6950_v7 = vadd.f32 %v6949_v36, %v6948_v4  ;;  %v6951_v8 = vpop.f32.mrb[82].mxu1 }
 0x902   :  { %v6952_v12 = vpop.f32.mrb[83].mxu1 }
 0x903   :  { %v6953_v14 = vadd.f32 %v6952_v12, %v6951_v8  ;;  %v5511_v50 = vadd.f32 %v6950_v7, %v4874_v42 }
 0x905   :  { %v5514_v57 = vadd.f32 %v6953_v14, %v4874_v42 }
 0x978   :  { %v5467_v46 = vpop.f32.mrb[24].mxu0  ;;  %v6970_v11 = vpop.f32.mrb[84].mxu1 }
 0x979   :  { %v7122_v47 = vadd.f32 %v5467_v46, %v4866_v44  ;;  %v5469_v48 = vpop.f32.mrb[25].mxu0  ;;  %v6971_v49 = vpop.f32.mrb[85].mxu1 }
 0x97a   :  { %v7123_v53 = vadd.f32 %v5469_v48, %v4870_v45  ;;  %v6972_v54 = vadd.f32 %v6971_v49, %v6970_v11  ;;  %v5471_v55 = vpop.f32.mrb[26].mxu0  ;;  %v6973_v56 = vpop.f32.mrb[86].mxu1 }
 0x97b   :  { %v5558_v58 = vrot.slane %v7122_v47, 4  ;;  %v7124_v59 = vadd.f32 %v5471_v55, %v4866_v44  ;;  %v5473_v60 = vpop.f32.mrb[27].mxu0  ;;  %v6974_v27 = vpop.f32.mrb[87].mxu1 }
 0x97c   :  { %v5564_v61 = vrot.slane %v7123_v53, 4  ;;  %v5552_v62 = vadd.f32 %v6972_v54, %v5511_v50  ;;  %v7125_v30 = vadd.f32 %v5473_v60, %v4870_v45  ;;  %v6975_v63 = vadd.f32 %v6974_v27, %v6973_v56  ;;  %v8001_v27 = vld [vmem:[#allocation14 + $0x100] ss:$8 sps:$4 sm:$0xff]  }
 0x97d   :  { %v5559_v0 = vadd.f32 %v7122_v47, %v5558_v58  ;;  %v5576_v25 = vrot.slane %v7124_v59, 4 }
 0x97e   :  { %v5565_v26 = vadd.f32 %v7123_v53, %v5564_v61  ;;  %v5570_v1 = vrot.slane %v5552_v62, 4  ;;  %v5582_v29 = vrot.slane %v7125_v30, 4  ;;  %v5555_v6 = vadd.f32 %v6975_v63, %v5514_v57  ;;  %v8004_v63 = vld [vmem:[#allocation14 + $0x110] ss:$8 sps:$4 sm:$0xff]  }
 0x97f   :  { %v5560_v41 = vrot.slane %v5559_v0, 2  ;;  %v5577_v2 = vadd.f32 %v7124_v59, %v5576_v25  ;;  %v8007_v25 = vld [vmem:[#allocation14 + $0x120] ss:$8 sps:$4 sm:$0xff]  }
 0x980   :  { %v5566_v3 = vrot.slane %v5565_v26, 2  ;;  %v5571_v4 = vadd.f32 %v5570_v1, %v5552_v62  ;;  %v5583_v5 = vadd.f32 %v7125_v30, %v5582_v29  ;;  %v5588_v36 = vrot.slane %v5555_v6, 4  ;;  %v8006_v62 = vld [vmem:[#allocation14 + $0x114] ss:$8 sps:$4 sm:$0xff]   ;;  %v8010_v1 = vld [vmem:[#allocation14 + $0x130] ss:$8 sps:$4 sm:$0xff]  }
 0x981   :  { %v5561_v35 = vadd.f32 %v5560_v41, %v5559_v0  ;;  %v5578_v7 = vrot.slane %v5577_v2, 2  ;;  %v8009_v0 = vld [vmem:[#allocation14 + $0x124] ss:$8 sps:$4 sm:$0xff]   ;;  %v8018_v41 = vld [vmem:[#allocation14 + $0x154] ss:$8 sps:$4 sm:$0xff]  }
 0x982   :  { %v5567_v8 = vadd.f32 %v5566_v3, %v5565_v26  ;;  %v5572_v12 = vrot.slane %v5571_v4, 2  ;;  %v5584_v14 = vrot.slane %v5583_v5, 2  ;;  %v5589_v9 = vadd.f32 %v5588_v36, %v5555_v6  ;;  %v8012_v26 = vld [vmem:[#allocation14 + $0x134] ss:$8 sps:$4 sm:$0xff]   ;;  %v8015_v29 = vld [vmem:[#allocation14 + $0x144] ss:$8 sps:$4 sm:$0xff]  }
 0x983   :  { %v5562_v15 = vrot.slane %v5561_v35, 1  ;;  %v5579_v16 = vadd.f32 %v5578_v7, %v5577_v2  ;;  %v8013_v6 = vld [vmem:[#allocation14 + $0x140] ss:$8 sps:$4 sm:$0xff]   ;;  %v8016_v2 = vld [vmem:[#allocation14 + $0x150] ss:$8 sps:$4 sm:$0xff]  }
 0x984   :  { %v5568_v17 = vrot.slane %v5567_v8, 1  ;;  %v5573_v20 = vadd.f32 %v5572_v12, %v5571_v4  ;;  %v5585_v18 = vadd.f32 %v5584_v14, %v5583_v5  ;;  %v5590_v21 = vrot.slane %v5589_v9, 2  ;;  %v8021_v3 = vld [vmem:[#allocation14 + $0x164] ss:$8 sps:$4 sm:$0xff]   ;;  %v8024_v4 = vld [vmem:[#allocation14 + $0x174] ss:$8 sps:$4 sm:$0xff]  }
 0x985   :  { %v5563_v13 = vadd.f32 %v5562_v15, %v5561_v35  ;;  %v5580_v22 = vrot.slane %v5579_v16, 1  ;;  %v8022_v5 = vld [vmem:[#allocation14 + $0x170] ss:$8 sps:$4 sm:$0xff]   ;;  %v5655_v14 = vld [vmem:[#allocation16] sm:$0x3] }
 0x986   :  { %v5569_v10 = vadd.f32 %v5568_v17, %v5567_v8  ;;  %v5574_v23 = vrot.slane %v5573_v20, 1  ;;  %v5586_v19 = vrot.slane %v5585_v18, 1  ;;  %v5591_v24 = vadd.f32 %v5590_v21, %v5589_v9  ;;  %v8037_v35 = vld [vmem:[#allocation17 + $0x70] sm:$0xff]   ;;  %v8039_v8 = vld [vmem:[#allocation17 + $0x78] sm:$0xff]  }
 0x987   :  { %v5595_v28 = vmul.f32 0.125, %v5563_v13  ;;  %v5581_v31 = vadd.f32 %v5580_v22, %v5579_v16  ;;  %v8038_v7 = vld [vmem:[#allocation17 + $0x30] sm:$0xff]   ;;  %6988 = vmatprep.subr.bf16.mxu0 %v8037_v35  ;;  %v8040_v12 = vld [vmem:[#allocation17 + $0x38] sm:$0xff]   ;;  %v5660_v9 = vrot.slane %v5655_v14, %v9101_v51  ;;  %v5664_v15 = vrot.slane %v5655_v14, %v9104_v52 }
 0x988   :  { %v5596_v32 = vmul.f32 0.125, %v5569_v10  ;;  %v5575_v33 = vadd.f32 %v5574_v23, %v5573_v20  ;;  %v5587_v37 = vadd.f32 %v5586_v19, %v5585_v18  ;;  %v5592_v38 = vrot.slane %v5591_v24, 1  ;;  %6989 = vmatpush3.bf16.msra.mxu0 %v8038_v7 }
 0x989   :  { %v5601_v34 = vpack.c.bf16 %v5595_v28, %v5595_v28  ;;  %v5598_v39 = vmul.f32 0.125, %v5581_v31  ;;  %6990 = vmatprep.subr.bf16.mxu0 %v8039_v8 }
 0x98a   :  { %v5602_v43 = vpack.c.bf16 %v5596_v32, %v5596_v32  ;;  %v5597_v44 = vmul.f32 0.125, %v5575_v33  ;;  %v5599_v42 = vmul.f32 0.125, %v5587_v37  ;;  %v5593_v45 = vadd.f32 %v5592_v38, %v5591_v24 }
 0x98b   :  { %v5604_v46 = vpack.c.bf16 %v5598_v39, %v5598_v39  ;;  %v5673_v49 = vunpack.c.l.b16 %v5601_v34 }
 0x98c   :  { %v5603_v11 = vpack.c.bf16 %v5597_v44, %v5597_v44  ;;  %v5605_v47 = vpack.c.bf16 %v5599_v42, %v5599_v42  ;;  %v5600_v48 = vmul.f32 0.125, %v5593_v45  ;;  %v5674_v53 = vunpack.c.l.b16 %v5602_v43  ;;  %6991 = vmatpush3.bf16.msra.mxu0 %v8040_v12 }
 0x98d   :  { %v5676_v50 = vunpack.c.l.b16 %v5604_v46 }
 0x98e   :  { %v5677_v54 = vunpack.c.l.b16 %v5605_v47  ;;  %v5606_v55 = vpack.c.bf16 %v5600_v48, %v5600_v48  ;;  %v5675_v57 = vunpack.c.l.b16 %v5603_v11 }
 0x98f   :  { %v5680_v56 = vsel %vm5679_vm3, %v5676_v50, %v5673_v49 }
 0x990   :  { %v5678_v58 = vunpack.c.l.b16 %v5606_v55  ;;  %v5681_v59 = vsel %vm5679_vm3, %v5677_v54, %v5674_v53  ;;  %v5683_v61 = vpack.c.b16 %v5680_v56, %v5680_v56 }
 0x991   :  { %v5684_v60 = vpack.c.b16 %v5681_v59, %v5681_v59 }
 0x992   :  { %v5682_v30 = vsel %vm5679_vm3, %v5678_v58, %v5675_v57 }
 0x993   :  { %5961 = vmatprep.mubr.bf16.mxu1 %v5684_v60  ;;  %v5685_v36 = vpack.c.b16 %v5682_v30, %v5682_v30 }
 0x994   :  { %5962 = vmatmul.mubr.bf16.vlgmr.msra.gmra.mrb[88].mxu1 %v5683_v61 }
 0x995   :  { %5971 = vmatpush1.bf16.msra.mxu1 %v8001_v27  ;;  %6002 = vmatprep.mubr.bf16.mxu1 %v8410_v40  ;;  %v8019_v40 = vld [vmem:[#allocation14 + $0x160] ss:$8 sps:$4 sm:$0xff]  }
 0x996   :  { %5972 = vmatprep.subr.bf16.mxu1 %v8006_v62 }
 0x999   :  { %5973 = vmatpush1.bf16.msra.mxu1 %v8004_v63 }
 0x99a   :  { %5974 = vmatprep.subr.bf16.mxu1 %v8009_v0 }
 0x99d   :  { %5975 = vmatpush1.bf16.msra.mxu1 %v8007_v25 }
 0x99e   :  { %5976 = vmatprep.subr.bf16.mxu1 %v8012_v26 }
 0x9a1   :  { %5977 = vmatpush1.bf16.msra.mxu1 %v8010_v1 }
 0x9a2   :  { %5978 = vmatprep.subr.bf16.mxu1 %v8015_v29 }
 0x9a5   :  { %5979 = vmatpush1.bf16.msra.mxu1 %v8013_v6 }
 0x9a6   :  { %5980 = vmatprep.subr.bf16.mxu1 %v8018_v41 }
 0x9a9   :  { %5981 = vmatpush1.bf16.msra.mxu1 %v8016_v2 }
 0x9aa   :  { %5982 = vmatprep.subr.bf16.mxu1 %v8021_v3 }
 0x9ad   :  { %5983 = vmatpush1.bf16.msra.mxu1 %v8019_v40 }
 0x9ae   :  { %5984 = vmatprep.subr.bf16.mxu1 %v8024_v4 }
 0x9b1   :  { %5985 = vmatpush1.bf16.msra.mxu1 %v8022_v5 }
 0x9b4   :  { %6003 = vmatmul.mubr.bf16.vlgmr.msra.gmra.mrb[88].mxu1 %v5685_v36 }
 0xa87   :  { %v6004_v16 = vpop.f32.mrb[88].mxu1 }
 0xa88   :  { %v7126_v17 = vadd.f32 %v6004_v16, %v5660_v9  ;;  %v6006_v20 = vpop.f32.mrb[89].mxu1 }
 0xa89   :  { %v7127_v18 = vadd.f32 %v6006_v20, %v5664_v15  ;;  %v6008_v21 = vpop.f32.mrb[90].mxu1 }
 0xa8a   :  { %v6011_v13 = vmax.f32 %v7126_v17, 0.0  ;;  %v6009_v22 = vpop.f32.mrb[91].mxu1 }
 0xa8b   :  { %v6012_v10 = vmax.f32 %v7127_v18, 0.0 }
 0xa8c   :  { %v6013_v19 = vpack.c.bf16 %v6011_v13, %v6011_v13 }
 0xa8d   :  { %v6014_v23 = vpack.c.bf16 %v6012_v10, %v6012_v10 }
 0xa8f   :  { %6182 = vmatprep.mubr.bf16.mxu0 %v6014_v23 }
 0xa90   :  { %6183 = vmatmul.mubr.bf16.vlgmr.msra.gmra.mrb[28].mxu0 %v6013_v19 }
 0xa91   :  { %8342 = shalt.err (!%p8339_p8)
}
 0xa92   :  { %s8343_s5 = scalar_lea.hbm %s9368_s13, 256 }
 0xa93   :  { %p8344_p9 = scmp.ne.s32.totalorder %s9368_s13, %s8343_s5  ;;  %p8347_p10 = scmp.lt.u32.totalorder %s8343_s5, %s9368_s13 }
 0xa95   :  { %p8349_p11 = pnand %p8347_p10, %p8344_p9 }
 0xa97   :  { %8352 = shalt.err (!%p8349_p11)
}
 0xa98   :  { %6202 = dma.vmem_to_hbm [thread:$0]  %s6197_s3, 256, %s9368_s13, [#allocation4], %s8399_s7, %s8399_s7, %s8400_s25   ;;  %v6817_v52 = vld [vmem:[#allocation19] ss:$0 sm:$0xff] }
 0xa99   :  { %s8414_s4 = smov [#allocation21]  }
 0xa9a   :  { %s6209_s18 = sshll.u32 %s8414_s4, 4  ;;  %s6210_s18 = int_to_ptr.vmem [resolvable:$true] %s6209_s18 }
 0xa9b   :  { %s8353_s28 = scalar_lea.vmem %s6210_s18, 32  ;;  %p8358_p13 = scmp.lt.s32.totalorder %s6210_s18, %s6210_s18 }
 0xa9c   :  { %p8354_p12 = scmp.ne.s32.totalorder %s6210_s18, %s8353_s28  ;;  %p8359_p0 = scmp.lt.s32.totalorder %s8353_s28, %s8353_s28 }
 0xa9e   :  { %p8360_p1 = por %p8359_p0, %p8358_p13 }
 0xaa0   :  { %p8361_p2 = pnand %p8360_p1, %p8354_p12 }
 0xb63   :  { %v6992_v51 = vpop.f32.mrb[28].mxu0 }
 0xb64   :  { %v6993_v24 = vpop.f32.mrb[29].mxu0 }
 0xb65   :  { %v6994_v28 = vadd.f32 %v6993_v24, %v6992_v51  ;;  %v6995_v31 = vpop.f32.mrb[30].mxu0 }
 0xb66   :  { %v6996_v32 = vpop.f32.mrb[31].mxu0 }
 0xb67   :  { %v6185_v33 = vadd.f32 %v6994_v28, %v6817_v52 }
 0xb69   :  { %6190 = vst [vmem:[#allocation21] sm:$0x3] %v6185_v33 }
 0xb6a   :  { %8364 = shalt.err (!%p8361_p2)
}
 0xb6b   :  { %s8365_s7 = scalar_lea.hbm %s9369_s14, 32 }
 0xb6c   :  { %p8366_p3 = scmp.ne.s32.totalorder %s9369_s14, %s8365_s7  ;;  %p8369_p4 = scmp.lt.u32.totalorder %s8365_s7, %s9369_s14 }
 0xb6e   :  { %p8371_p5 = pnand %p8369_p4, %p8366_p3 }
 0xb70   :  { %8374 = shalt.err (!%p8371_p5)
}
 0xb71   :  { %6212 = dma.vmem_to_hbm [thread:$0]  %s6210_s18, 32, %s9369_s14, [#allocation22]  }
 0xb72   :  { %8387 = dma.done.wait [#allocation4], 256  }
 0xb73   :  { %8388 = vsyncadd [#allocation4], 4294967040 }
 0xb74   :  { %8389 = dma.done.wait [#allocation22], 32  }
 0xb75   :  { %8390 = vsyncadd [#allocation22], 4294967264 }
 0xb76   :  { %6219 = vsyncpa [#allocation3], 1 }
 0xb77   :  { %6220 = vsyncpa [#allocation6], 1 }
 0xb78   :  { %6221 = vsyncpa [#allocation9], 1 }
 0xb79   :  { %6222 = vsyncpa [#allocation12], 1 }
 0xb7a   :  { %6223 = vsyncpa [#allocation15], 1 }
 0xb7b   :  { %6224 = vsyncpa [#allocation18], 1 }
 0xb7c   :  { %6225 = vsyncpa [#allocation4], 1 }
 0xb7d   :  { %6226 = vsyncpa [#allocation22], 1 }

</bundles_post_ra>
